<compile_context>
chip_gen: v7x
topology: tpu7x:2x2x1
jax: 0.10.0
libtpu: 0.0.40
codegen_flags: <defaults>
</compile_context>

<pallas_src>
import jax
import jax.numpy as jnp
from jax.experimental import pallas as pl
from jax.experimental.pallas import tpu as pltpu


def _round_up(x, m):
    return ((x + m - 1) // m) * m


def _pwd_kernel(p_ref, ct_ref, csq_ref, mind_ref, minl_ref, dacc_ref, lacc_ref):
    # p_ref:    (TN, D)      tile of points
    # ct_ref:   (D, TK)      chunk of pre-transposed centroids
    # csq_ref:  (1, TK)      squared norms of that centroid chunk (+inf padding)
    # mind_ref: (1, TN)      lane-dense min partial distance per point
    # minl_ref: (1, TN)      lane-dense argmin centroid index (int32)
    # dacc_ref: (TN, 1) f32  running min accumulator  (VMEM scratch)
    # lacc_ref: (TN, 1) i32  running argmin accumulator (VMEM scratch)
    j = pl.program_id(1)
    tile_k = ct_ref.shape[1]

    @pl.when(j == 0)
    def _init():
        dacc_ref[...] = jnp.full(dacc_ref.shape, jnp.inf, dacc_ref.dtype)
        lacc_ref[...] = jnp.zeros(lacc_ref.shape, lacc_ref.dtype)

    # MXU: p @ c.T chunk, accumulate in f32.  Centroids arrive pre-transposed.
    pc = jnp.dot(p_ref[...], ct_ref[...], preferred_element_type=jnp.float32)
    # Partial distance; pn is a per-row constant and is added once in the wrapper.
    dist = csq_ref[...] - 2.0 * pc                            # (TN, TK) f32

    chunk_min = jnp.min(dist, axis=1, keepdims=True)          # (TN, 1)
    col = jax.lax.broadcasted_iota(jnp.int32, dist.shape, 1) + j * tile_k
    chunk_lab = jnp.min(
        jnp.where(dist == chunk_min, col, jnp.int32(2 ** 30)),
        axis=1, keepdims=True)                                # first occurrence

    # Merge with running accumulators.  Strict `<` keeps the earlier (lower
    # index) chunk on exact ties -> first-occurrence semantics across chunks.
    better = chunk_min < dacc_ref[...]
    dacc_ref[...] = jnp.where(better, chunk_min, dacc_ref[...])
    lacc_ref[...] = jnp.where(better, chunk_lab, lacc_ref[...])

    @pl.when(j == pl.num_programs(1) - 1)
    def _finalize():
        # One small XLU transpose per N-tile -> lane-dense (1, TN) stores.
        mind_ref[...] = jnp.transpose(dacc_ref[...])
        minl_ref[...] = jnp.transpose(lacc_ref[...])


def pwd(p, pn, c, c_sq, *, tile_n=512, tile_k=512, compute_dtype=None):
    """Pallas equivalent of PWD.forward(p, pn, c, c_sq).

    p    : (N, D) float32
    pn   : (N, 1) float32   (row squared norms of p)
    c    : (K, D) float32
    c_sq : (1, K) float32   (row squared norms of c)
    compute_dtype: optional dtype (e.g. jnp.bfloat16) for the MXU matmul
                   operands on v6e/v7x; distance math stays f32.
    returns (min_dists (N,) float32, min_labels (N,) int32)
    """
    n, d = p.shape
    k, d2 = c.shape
    assert d == d2, "p and c feature dims must match"

    # Tile sizes: lane-friendly (multiples of 128), clamped to the padded extents.
    tile_n = _round_up(min(tile_n, _round_up(n, 128)), 128)
    tile_k = _round_up(min(tile_k, _round_up(k, 128)), 128)
    n_pad = _round_up(n, tile_n)
    k_pad = _round_up(k, tile_k)
    grid = (n_pad // tile_n, k_pad // tile_k)

    p = p.astype(jnp.float32)
    c = c.astype(jnp.float32)
    c_sq = c_sq.astype(jnp.float32).reshape(1, k)

    # Pad N with zero rows (results sliced off), pad K with zero centroid
    # columns whose squared norm is +inf so they can never win the argmin.
    p_pad = jnp.pad(p, ((0, n_pad - n), (0, 0)))
    c_t = jnp.pad(c.T, ((0, 0), (0, k_pad - k)))                 # (D, K_pad)
    csq_pad = jnp.pad(c_sq, ((0, 0), (0, k_pad - k)),
                      constant_values=jnp.inf)                   # (1, K_pad)

    if compute_dtype is not None:
        p_pad = p_pad.astype(compute_dtype)
        c_t = c_t.astype(compute_dtype)

    min_d, min_l = pl.pallas_call(
        _pwd_kernel,
        out_shape=(
            jax.ShapeDtypeStruct((1, n_pad), jnp.float32),
            jax.ShapeDtypeStruct((1, n_pad), jnp.int32),
        ),
        grid_spec=pltpu.PrefetchScalarGridSpec(
            num_scalar_prefetch=0,
            grid=grid,
            in_specs=[
                pl.BlockSpec((tile_n, d), lambda i, j: (i, 0)),   # p tile
                pl.BlockSpec((d, tile_k), lambda i, j: (0, j)),   # centroid chunk
                pl.BlockSpec((1, tile_k), lambda i, j: (0, j)),   # centroid norms
            ],
            out_specs=[
                pl.BlockSpec((1, tile_n), lambda i, j: (0, i)),
                pl.BlockSpec((1, tile_n), lambda i, j: (0, i)),
            ],
            scratch_shapes=[
                pltpu.VMEM((tile_n, 1), jnp.float32),   # running min
                pltpu.VMEM((tile_n, 1), jnp.int32),     # running argmin
            ],
        ),
        compiler_params=pltpu.CompilerParams(
            dimension_semantics=("parallel", "arbitrary"),
            vmem_limit_bytes=32 * 1024 * 1024,
        ),
    )(p_pad, c_t, csq_pad)

    # min(pn + x_i) == pn + min(x_i) exactly (monotone fp add), so pn is added
    # once per row here instead of as a (TN, K) broadcast inside the kernel.
    min_dists = min_d[0, :n] + pn.reshape(-1).astype(jnp.float32)
    # TODO(synk): torch returns int64 labels; int32 here (fine for K < 2^31).
    min_labels = min_l[0, :n]
    return min_dists, min_labels


if __name__ == "__main__":
    # Small, deterministic kmeans-style inputs: N points, K centroids, D feats.
    # N is not a multiple of the tile and K is not a multiple of 128 to
    # exercise the padding paths; tile_k=128 forces two K chunks so the
    # running-accumulator merge path is exercised too.
    N, D, K = 1000, 32, 200
    key = jax.random.PRNGKey(0)
    kp, kc = jax.random.split(key)
    p = jax.random.normal(kp, (N, D), dtype=jnp.float32)
    c = jax.random.normal(kc, (K, D), dtype=jnp.float32)

    pn = jnp.sum(p * p, axis=1, keepdims=True)          # (N, 1)
    c_sq = jnp.sum(c * c, axis=1, keepdims=True).T      # (1, K)

    min_dists, min_labels = pwd(p, pn, c, c_sq, tile_n=512, tile_k=128)
    jax.block_until_ready((min_dists, min_labels))

    # Reference (torch-faithful formula, plain JAX).
    dist_ref = pn + c_sq - 2.0 * (p @ c.T)
    ref_d = jnp.min(dist_ref, axis=1)
    ref_l = jnp.argmin(dist_ref, axis=1).astype(jnp.int32)

    assert min_dists.shape == (N,) and min_labels.shape == (N,)
    assert min_labels.dtype == jnp.int32
    assert jnp.allclose(min_dists, ref_d, atol=1e-3, rtol=1e-4), (
        "max |dmin err| =", float(jnp.max(jnp.abs(min_dists - ref_d))))
    # Labels must match exactly except at numerical near-ties, where the chosen
    # centroid's distance must still equal the true minimum to tolerance.
    chosen_d = dist_ref[jnp.arange(N), min_labels]
    label_ok = (min_labels == ref_l) | (jnp.abs(chosen_d - ref_d) < 1e-3)
    assert bool(jnp.all(label_ok))
    assert float(jnp.mean(min_labels == ref_l)) > 0.999

    print("KERNEL_OK")
</pallas_src>

<mosaic_0001>
module attributes {stable_mosaic.version = 11 : i64} {
  func.func @_pwd_kernel(%arg0: i32, %arg1: i32, %arg2: memref<512x32xf32, #tpu.memory_space<vmem>>, %arg3: memref<32x128xf32, #tpu.memory_space<vmem>>, %arg4: memref<1x128xf32, #tpu.memory_space<vmem>>, %arg5: memref<1x512xf32, #tpu.memory_space<vmem>>, %arg6: memref<1x512xi32, #tpu.memory_space<vmem>>, %arg7: memref<512x1xf32, #tpu.memory_space<vmem>>, %arg8: memref<512x1xi32, #tpu.memory_space<vmem>>) attributes {dimension_semantics = [#tpu.dimension_semantics<parallel>, #tpu.dimension_semantics<arbitrary>], iteration_bounds = array<i64: 2, 2>, scalar_prefetch = 0 : i64, scratch_operands = 2 : i64, tpu.core_type = #tpu.core_type<tc>, window_params = [{transform_indices = @transform_0, window_bounds = array<i64: 512, 32>}, {transform_indices = @transform_1, window_bounds = array<i64: 32, 128>}, {transform_indices = @transform_2, window_bounds = array<i64: 1, 128>}, {transform_indices = @transform_3, window_bounds = array<i64: 1, 512>}, {transform_indices = @transform_4, window_bounds = array<i64: 1, 512>}]} {
    %c0_i32 = arith.constant 0 : i32
    %0 = arith.cmpi eq, %arg1, %c0_i32 : i32
    %1 = arith.extui %0 : i1 to i32
    %c0_i32_0 = arith.constant 0 : i32
    %2 = arith.cmpi ne, %1, %c0_i32_0 : i32
    scf.if %2 {
      %cst_20 = arith.constant 0x7F800000 : f32
      %34 = vector.broadcast %cst_20 : f32 to vector<512x1xf32>
      %c0_21 = arith.constant 0 : index
      %c0_22 = arith.constant 0 : index
      %35 = vector.load %arg7[%c0_21, %c0_22] : memref<512x1xf32, #tpu.memory_space<vmem>>, vector<512x1xf32>
      tpu.vector_store %arg7[%c0_21, %c0_22], %34 {strides = array<i32>} : memref<512x1xf32, #tpu.memory_space<vmem>>, vector<512x1xf32>,
      %c0_i32_23 = arith.constant 0 : i32
      %36 = vector.broadcast %c0_i32_23 : i32 to vector<512x1xi32>
      %c0_24 = arith.constant 0 : index
      %c0_25 = arith.constant 0 : index
      %37 = vector.load %arg8[%c0_24, %c0_25] : memref<512x1xi32, #tpu.memory_space<vmem>>, vector<512x1xi32>
      tpu.vector_store %arg8[%c0_24, %c0_25], %36 {strides = array<i32>} : memref<512x1xi32, #tpu.memory_space<vmem>>, vector<512x1xi32>,
    } else {
    }
    %c0 = arith.constant 0 : index
    %c0_1 = arith.constant 0 : index
    %3 = vector.load %arg2[%c0, %c0_1] : memref<512x32xf32, #tpu.memory_space<vmem>>, vector<512x32xf32>
    %c0_2 = arith.constant 0 : index
    %c0_3 = arith.constant 0 : index
    %4 = vector.load %arg3[%c0_2, %c0_3] : memref<32x128xf32, #tpu.memory_space<vmem>>, vector<32x128xf32>
    %cst = arith.constant dense<0.000000e+00> : vector<512x128xf32>
    %5 = tpu.matmul %3, %4, %cst {dimension_numbers = #tpu.dot_dimension_numbers<[1], [0], [0], [1], [0, 0, 1, 1], [], []>} : vector<512x32xf32>, vector<32x128xf32>, vector<512x128xf32> -> vector<512x128xf32>
    %c0_4 = arith.constant 0 : index
    %c0_5 = arith.constant 0 : index
    %6 = vector.load %arg4[%c0_4, %c0_5] : memref<1x128xf32, #tpu.memory_space<vmem>>, vector<1x128xf32>
    %cst_6 = arith.constant 2.000000e+00 : f32
    %7 = vector.broadcast %cst_6 : f32 to vector<512x128xf32>
    %8 = arith.mulf %7, %5 : vector<512x128xf32>
    %9 = vector.broadcast %6 : vector<1x128xf32> to vector<512x128xf32>
    %10 = arith.subf %9, %8 : vector<512x128xf32>
    %cst_7 = arith.constant dense<0x7F800000> : vector<512xf32>
    %11 = vector.multi_reduction <minimumf>, %10, %cst_7 [1] : vector<512x128xf32> to vector<512xf32>
    %12 = vector.shape_cast %11 : vector<512xf32> to vector<512x1xf32>
    %13 = tpu.iota {dimensions = array<i32: 1>} : vector<512x128xi32>
    %c128_i32 = arith.constant 128 : i32
    %14 = arith.muli %arg1, %c128_i32 : i32
    %15 = vector.broadcast %14 : i32 to vector<512x128xi32>
    %16 = arith.addi %13, %15 : vector<512x128xi32>
    %17 = vector.broadcast %12 : vector<512x1xf32> to vector<512x128xf32>
    %18 = arith.cmpf oeq, %10, %17 : vector<512x128xf32>
    %c1073741824_i32 = arith.constant 1073741824 : i32
    %19 = vector.broadcast %c1073741824_i32 : i32 to vector<512x128xi32>
    %20 = arith.select %18, %16, %19 : vector<512x128xi1>, vector<512x128xi32>
    %cst_8 = arith.constant dense<2147483647> : vector<512xi32>
    %21 = vector.multi_reduction <minsi>, %20, %cst_8 [1] : vector<512x128xi32> to vector<512xi32>
    %22 = vector.shape_cast %21 : vector<512xi32> to vector<512x1xi32>
    %c0_9 = arith.constant 0 : index
    %c0_10 = arith.constant 0 : index
    %23 = vector.load %arg7[%c0_9, %c0_10] : memref<512x1xf32, #tpu.memory_space<vmem>>, vector<512x1xf32>
    %24 = arith.cmpf olt, %12, %23 : vector<512x1xf32>
    %c0_11 = arith.constant 0 : index
    %c0_12 = arith.constant 0 : index
    %25 = vector.load %arg7[%c0_11, %c0_12] : memref<512x1xf32, #tpu.memory_space<vmem>>, vector<512x1xf32>
    %26 = arith.select %24, %12, %25 : vector<512x1xi1>, vector<512x1xf32>
    %c0_13 = arith.constant 0 : index
    %c0_14 = arith.constant 0 : index
    %27 = vector.load %arg7[%c0_13, %c0_14] : memref<512x1xf32, #tpu.memory_space<vmem>>, vector<512x1xf32>
    tpu.vector_store %arg7[%c0_13, %c0_14], %26 {strides = array<i32>} : memref<512x1xf32, #tpu.memory_space<vmem>>, vector<512x1xf32>,
    %c0_15 = arith.constant 0 : index
    %c0_16 = arith.constant 0 : index
    %28 = vector.load %arg8[%c0_15, %c0_16] : memref<512x1xi32, #tpu.memory_space<vmem>>, vector<512x1xi32>
    %29 = arith.select %24, %22, %28 : vector<512x1xi1>, vector<512x1xi32>
    %c0_17 = arith.constant 0 : index
    %c0_18 = arith.constant 0 : index
    %30 = vector.load %arg8[%c0_17, %c0_18] : memref<512x1xi32, #tpu.memory_space<vmem>>, vector<512x1xi32>
    tpu.vector_store %arg8[%c0_17, %c0_18], %29 {strides = array<i32>} : memref<512x1xi32, #tpu.memory_space<vmem>>, vector<512x1xi32>,
    %c1_i32 = arith.constant 1 : i32
    %31 = arith.cmpi eq, %arg1, %c1_i32 : i32
    %32 = arith.extui %31 : i1 to i32
    %c0_i32_19 = arith.constant 0 : i32
    %33 = arith.cmpi ne, %32, %c0_i32_19 : i32
    scf.if %33 {
      %c0_20 = arith.constant 0 : index
      %c0_21 = arith.constant 0 : index
      %34 = vector.load %arg7[%c0_20, %c0_21] : memref<512x1xf32, #tpu.memory_space<vmem>>, vector<512x1xf32>
      %35 = tpu.transpose %34, [1, 0] : vector<512x1xf32> -> vector<1x512xf32>
      %c0_22 = arith.constant 0 : index
      %c0_23 = arith.constant 0 : index
      %36 = vector.load %arg5[%c0_22, %c0_23] : memref<1x512xf32, #tpu.memory_space<vmem>>, vector<1x512xf32>
      tpu.vector_store %arg5[%c0_22, %c0_23], %35 {strides = array<i32>} : memref<1x512xf32, #tpu.memory_space<vmem>>, vector<1x512xf32>,
      %c0_24 = arith.constant 0 : index
      %c0_25 = arith.constant 0 : index
      %37 = vector.load %arg8[%c0_24, %c0_25] : memref<512x1xi32, #tpu.memory_space<vmem>>, vector<512x1xi32>
      %38 = tpu.transpose %37, [1, 0] : vector<512x1xi32> -> vector<1x512xi32>
      %c0_26 = arith.constant 0 : index
      %c0_27 = arith.constant 0 : index
      %39 = vector.load %arg6[%c0_26, %c0_27] : memref<1x512xi32, #tpu.memory_space<vmem>>, vector<1x512xi32>
      tpu.vector_store %arg6[%c0_26, %c0_27], %38 {strides = array<i32>} : memref<1x512xi32, #tpu.memory_space<vmem>>, vector<1x512xi32>,
    } else {
    }
    return
  }
  func.func @transform_0(%arg0: i32, %arg1: i32) -> (i32, i32) {
    %c0_i32 = arith.constant 0 : i32
    %c0_i32_0 = arith.constant 0 : i32
    return %arg0, %c0_i32 : i32, i32
  }
  func.func @transform_1(%arg0: i32, %arg1: i32) -> (i32, i32) {
    %c0_i32 = arith.constant 0 : i32
    %c0_i32_0 = arith.constant 0 : i32
    return %c0_i32, %arg1 : i32, i32
  }
  func.func @transform_2(%arg0: i32, %arg1: i32) -> (i32, i32) {
    %c0_i32 = arith.constant 0 : i32
    %c0_i32_0 = arith.constant 0 : i32
    return %c0_i32, %arg1 : i32, i32
  }
  func.func @transform_3(%arg0: i32, %arg1: i32) -> (i32, i32) {
    %c0_i32 = arith.constant 0 : i32
    %c0_i32_0 = arith.constant 0 : i32
    return %c0_i32, %arg0 : i32, i32
  }
  func.func @transform_4(%arg0: i32, %arg1: i32) -> (i32, i32) {
    %c0_i32 = arith.constant 0 : i32
    %c0_i32_0 = arith.constant 0 : i32
    return %c0_i32, %arg0 : i32, i32
  }
}

</mosaic_0001>

<bundles_post_ra>
// kernel: tpu_custom_call.1
= control target key start
LH: loop header
LB: loop body
LE: loop exit
PB: predicated region body
PF: predicated region fallthrough
CT: control target
= control target key end

     0   :  { %s6943_s0 = inlined_call_operand.vmem [shape: f32[1024,32], index: 0, kind: input, shape index: {}]   ;;  %s6944_s1 = inlined_call_operand.vmem [shape: f32[32,256], index: 1, kind: input, shape index: {}]   ;;  %s6945_s2 = inlined_call_operand.vmem [shape: f32[1,256], index: 2, kind: input, shape index: {}]   ;;  %s6946_s3 = inlined_call_operand.hbm [shape: f32[1,1024], index: 3, kind: output, shape index: {0}]   ;;  %s6947_s4 = inlined_call_operand.hbm [shape: s32[1,1024], index: 4, kind: output, shape index: {1}]  }
   0x1   :  { %7255 = sst [smem:[#allocation219_spill]] %s6944_s1 }
   0x2   :  { %10 = vsyncpa [#allocation6], 0 }
   0x3   :  { %12 = vsyncpa [#allocation6 + $0x1], 0 }
   0x4   :  { %13 = vsyncpa [#allocation8], 0 }
   0x5   :  { %15 = vsyncpa [#allocation8 + $0x1], 0  ;;  %s3976_s15 = smov 0   ;;  %s3978_s16 = smov 0  }
   0x6   :  { %s3980_s17 = smov 0   ;;  %s3982_s18 = smov 0  }
   0x7   :  { %s3984_s19 = smov 0   ;;  %s3986_s20 = smov 0  }
   0x8   :  { %s3988_s21 = smov 0   ;;  %s3990_s22 = smov 0  }
   0x9   :  { %s3992_s23 = smov 0   ;;  %s3994_s24 = smov 0  }
   0xa LB: > { %7256 = sst [smem:[#allocation11_spill]] %s3940_s23  ;;  %s3433_s25 = sadd.s32 4294967295, %s3944_s24   ;;  %s3944_s24 = sphi %s3994_s24, %s21_s24   ;;  %s3940_s23 = sphi %s3992_s23, %s7801_s23   ;;  %s3936_s22 = sphi %s3990_s22, %s7808_s22   ;;  %s3932_s21 = sphi %s3988_s21, %s7799_s21   ;;  %s3928_s20 = sphi %s3986_s20, %s7807_s20   ;;  %s3924_s19 = sphi %s3984_s19, %s7806_s19   ;;  %s3920_s18 = sphi %s3982_s18, %s7805_s18   ;;  %s3916_s17 = sphi %s3980_s17, %s7804_s17   ;;  %s3912_s16 = sphi %s3978_s16, %s7803_s16   ;;  %s3908_s15 = sphi %s3976_s15, %s7802_s15  }
   0xb   : > { %s3434_s26 = sadd.s32 4294967294, %s3944_s24   ;;  %s30_s27 = sadd.s32 1, %s3936_s22 }
   0xc   : > { %s33_s28 = sadd.s32 1, %s3940_s23  ;;  %p31_p0 = scmp.ge.s32.totalorder %s30_s27, 2 }
   0xd   : > { %s66_s29 = sadd.s32 1, %s3924_s19  ;;  %p73_p1 = scmp.ne.s32.totalorder %s3924_s19, %s3920_s18 }
   0xe   : > { %p74_p2 = scmp.eq.s32.totalorder %s3944_s24, 0  ;;  %s7810_s27 = smov (%p31_p0, %s30_s27), 0 }
   0xf   : > { %7257 = sst [smem:[#allocation12_spill]] %s7810_s27  ;;  %s7812_s28 = smov (!%p31_p0, %s33_s28), %s3940_s23 }
  0x10   : > { %s63_s30 = ssub.s32 %s3936_s22, %s7810_s27  ;;  %p4039_p3 = por %p74_p2, %p73_p1 }
  0x11   : > { %p35_p4 = scmp.ge.s32.totalorder %s7812_s28, 2  ;;  %p64_p5 = scmp.eq.s32.totalorder %s63_s30, 0 }
  0x12   : > { %s118_s6 = sadd.s32 1, %s3916_s17  ;;  %p128_p6 = scmp.ne.s32.totalorder %s3916_s17, %s3912_s16 }
  0x13   : > { %s7814_s28 = smov (%p35_p4, %s7812_s28), 0  ;;  %p129_p7 = scmp.eq.s32.totalorder %s3433_s25, 3 }
  0x14   : > { %7259 = sst [smem:[#allocation13_spill]] %s7814_s28  ;;  %s115_s8 = ssub.s32 %s3940_s23, %s7814_s28 }
  0x15   : > { %s4049_s7 = scalar_select %p64_p5, %s3924_s19, %s66_s29  }
  0x16   : > { %p116_p8 = scmp.eq.s32.totalorder %s115_s8, 0  ;;  %p134_p9 = scmp.ne.s32.totalorder %s3912_s16, %s3908_s15 }
  0x17   : > { %p4055_p10 = por %p129_p7, %p128_p6  ;;  %p135_p11 = scmp.eq.s32.totalorder %s3434_s26, 3 }
  0x18   : > { %s4060_s10 = scalar_select %p116_p8, %s3916_s17, %s118_s6  }
  0x19   : > { %p4062_p12 = por %p135_p11, %p134_p9  ;;  %p3436_p13 = scmp.ge.s32.totalorder %s3944_s24, 4 }
  0x1b   : > { %177 = sbr.rel (%p3436_p13) target bundleno = 46 (0x2e), region = 16 }
  0x22   : > { %189 = sbr.rel (!%p4039_p3) target bundleno = 46 (0x2e), region = 24  ;;  %s191_s12 = sand.u32 (%p4039_p3), 1, %s3924_s19  }
  0x23   : > { %s3438_s13 = sshll.u32 (%p4039_p3), %s3936_s22, 3  ;;  %s3437_s14 = sshll.u32 (%p4039_p3), %s191_s12, 5 }
  0x24   : > { %s7262_s1 = sld [smem:[#allocation219_spill]] (%p4039_p3)  ;;  %s193_s30 = scalar_lea.vmem (%p4039_p3), [#allocation4], %s3437_s14 }
  0x2a   : > { %s195_s26 = scalar_lea.vmem %s7262_s1, %s3438_s13 }
  0x2b   : > { %v229_v0 = vld [vmem:[%s195_s26] sm:$0xff]  ;;  %v231_v1 = vld [vmem:[%s195_s26 + $0x10] sm:$0xff] }
  0x2c   : > { %v233_v2 = vld [vmem:[%s195_s26 + $0x20] sm:$0xff]  ;;  %230 = vst [vmem:[%s193_s30] sm:$0xff] %v229_v0  ;;  %232 = vst [vmem:[%s193_s30 + $0x8] sm:$0xff] %v231_v1  ;;  %v235_v3 = vld [vmem:[%s195_s26 + $0x30] sm:$0xff] }
  0x2d   : > { %234 = vst [vmem:[%s193_s30 + $0x10] sm:$0xff] %v233_v2  ;;  %236 = vst [vmem:[%s193_s30 + $0x18] sm:$0xff] %v235_v3 }
  0x2e PF: > { %p3439_p0 = scmp.ge.s32.totalorder %s3944_s24, 1  ;;  %p247_p1 = scmp.lt.s32.totalorder %s3944_s24, 5 }
  0x30   : > { %p248_p2 = pnand %p3439_p0, %p247_p1 }
  0x32   : > { %251 = sbr.rel (%p248_p2) target bundleno = 1341 (0x53d), region = 66 }
  0x39   : > { %s254_s5 = sand.u32 1, %s3920_s18   ;;  %s4078_s6 = sand.u32 1, %s3912_s16  }
  0x3a   : > { %s3440_s8 = sshll.u32 %s254_s5, 5  ;;  %s3441_s12 = sshll.u32 %s4078_s6, 2 }
  0x3b   : > { %s4082_s13 = sshll.u32 %s3932_s21, 6  ;;  %p298_p4 = scmp.lt.s32.totalorder %s3928_s20, 1 }
  0x3c   : > { %p293_p3 = scmp.lt.s32.totalorder %s4082_s13, 127  ;;  %s4099_s21 = scalar_lea.vmem [#allocation4], %s3440_s8 }
  0x3d   : > { %s4088_s25 = scalar_select %p298_p4, %s3928_s20, 1 }
  0x3e   : > { %s294_s14 = scalar_select %p293_p3, %s4082_s13, 127 }
  0x3f   : > { %s300_s5 = scalar_lea.vmem %s6945_s2, %s4088_s25  ;;  %s4101_s27 = scalar_lea.vmem [#allocation5], %s3441_s12 }
  0x40   : > { %s3444_s29 = sshll.u32 %s294_s14, 3  ;;  %s4103_s23 = scalar_lea.vmem [#allocation7], %s3441_s12 }
  0x41   : > { %s4093_s18 = scalar_lea.vmem %s6943_s0, %s3444_s29  ;;  %p3445_p5 = scmp.ne.s32.totalorder %s3928_s20, 0 }
  0x42   : > { %vm307_vm0 = vcmask (!%p3445_p5), 7168   ;;  %v3946_v4 = vmov (!%p3445_p5), inf   ;;  %v3947_v5 = vmov (!%p3445_p5), 0  }
  0x43   : > { %306 = sbr.rel (%p3445_p5) target bundleno = 131 (0x83), region = 74  ;;  %308 = vst.msk [vmem:[#allocation2] sm:$0xff] (!%p3445_p5), %vm307_vm0, %v3946_v4  ;;  %309 = vst.msk [vmem:[#allocation2 + $0x8] sm:$0xff] (!%p3445_p5), %vm307_vm0, %v3946_v4 }
  0x44   : > { %310 = vst.msk [vmem:[#allocation2 + $0x10] sm:$0xff] (!%p3445_p5), %vm307_vm0, %v3946_v4  ;;  %311 = vst.msk [vmem:[#allocation2 + $0x18] sm:$0xff] (!%p3445_p5), %vm307_vm0, %v3946_v4 }
  0x45   : > { %312 = vst.msk [vmem:[#allocation2 + $0x20] sm:$0xff] (!%p3445_p5), %vm307_vm0, %v3946_v4  ;;  %313 = vst.msk [vmem:[#allocation2 + $0x28] sm:$0xff] (!%p3445_p5), %vm307_vm0, %v3946_v4 }
  0x46   : > { %314 = vst.msk [vmem:[#allocation2 + $0x30] sm:$0xff] (!%p3445_p5), %vm307_vm0, %v3946_v4  ;;  %315 = vst.msk [vmem:[#allocation2 + $0x38] sm:$0xff] (!%p3445_p5), %vm307_vm0, %v3946_v4 }
  0x47   : > { %316 = vst.msk [vmem:[#allocation2 + $0x40] sm:$0xff] (!%p3445_p5), %vm307_vm0, %v3946_v4  ;;  %317 = vst.msk [vmem:[#allocation2 + $0x48] sm:$0xff] (!%p3445_p5), %vm307_vm0, %v3946_v4 }
  0x48   : > { %318 = vst.msk [vmem:[#allocation2 + $0x50] sm:$0xff] (!%p3445_p5), %vm307_vm0, %v3946_v4  ;;  %319 = vst.msk [vmem:[#allocation2 + $0x58] sm:$0xff] (!%p3445_p5), %vm307_vm0, %v3946_v4 }
  0x49   : > { %320 = vst.msk [vmem:[#allocation2 + $0x60] sm:$0xff] (!%p3445_p5), %vm307_vm0, %v3946_v4  ;;  %321 = vst.msk [vmem:[#allocation2 + $0x68] sm:$0xff] (!%p3445_p5), %vm307_vm0, %v3946_v4 }
  0x4a   : > { %322 = vst.msk [vmem:[#allocation2 + $0x70] sm:$0xff] %vm307_vm0, %v3946_v4  ;;  %323 = vst.msk [vmem:[#allocation2 + $0x78] sm:$0xff] %vm307_vm0, %v3946_v4 }
  0x4b   : > { %324 = vst.msk [vmem:[#allocation2 + $0x80] sm:$0xff] %vm307_vm0, %v3946_v4  ;;  %325 = vst.msk [vmem:[#allocation2 + $0x88] sm:$0xff] %vm307_vm0, %v3946_v4 }
  0x4c   : > { %326 = vst.msk [vmem:[#allocation2 + $0x90] sm:$0xff] %vm307_vm0, %v3946_v4  ;;  %327 = vst.msk [vmem:[#allocation2 + $0x98] sm:$0xff] %vm307_vm0, %v3946_v4 }
  0x4d   : > { %328 = vst.msk [vmem:[#allocation2 + $0xa0] sm:$0xff] %vm307_vm0, %v3946_v4  ;;  %329 = vst.msk [vmem:[#allocation2 + $0xa8] sm:$0xff] %vm307_vm0, %v3946_v4 }
  0x4e   : > { %330 = vst.msk [vmem:[#allocation2 + $0xb0] sm:$0xff] %vm307_vm0, %v3946_v4  ;;  %331 = vst.msk [vmem:[#allocation2 + $0xb8] sm:$0xff] %vm307_vm0, %v3946_v4 }
  0x4f   : > { %332 = vst.msk [vmem:[#allocation2 + $0xc0] sm:$0xff] %vm307_vm0, %v3946_v4  ;;  %333 = vst.msk [vmem:[#allocation2 + $0xc8] sm:$0xff] %vm307_vm0, %v3946_v4 }
  0x50   : > { %334 = vst.msk [vmem:[#allocation2 + $0xd0] sm:$0xff] %vm307_vm0, %v3946_v4  ;;  %335 = vst.msk [vmem:[#allocation2 + $0xd8] sm:$0xff] %vm307_vm0, %v3946_v4 }
  0x51   : > { %336 = vst.msk [vmem:[#allocation2 + $0xe0] sm:$0xff] %vm307_vm0, %v3946_v4  ;;  %337 = vst.msk [vmem:[#allocation2 + $0xe8] sm:$0xff] %vm307_vm0, %v3946_v4 }
  0x52   : > { %338 = vst.msk [vmem:[#allocation2 + $0xf0] sm:$0xff] %vm307_vm0, %v3946_v4  ;;  %339 = vst.msk [vmem:[#allocation2 + $0xf8] sm:$0xff] %vm307_vm0, %v3946_v4 }
  0x53   : > { %340 = vst.msk [vmem:[#allocation2 + $0x100] sm:$0xff] %vm307_vm0, %v3946_v4  ;;  %341 = vst.msk [vmem:[#allocation2 + $0x108] sm:$0xff] %vm307_vm0, %v3946_v4 }
  0x54   : > { %342 = vst.msk [vmem:[#allocation2 + $0x110] sm:$0xff] %vm307_vm0, %v3946_v4  ;;  %343 = vst.msk [vmem:[#allocation2 + $0x118] sm:$0xff] %vm307_vm0, %v3946_v4 }
  0x55   : > { %344 = vst.msk [vmem:[#allocation2 + $0x120] sm:$0xff] %vm307_vm0, %v3946_v4  ;;  %345 = vst.msk [vmem:[#allocation2 + $0x128] sm:$0xff] %vm307_vm0, %v3946_v4 }
  0x56   : > { %346 = vst.msk [vmem:[#allocation2 + $0x130] sm:$0xff] %vm307_vm0, %v3946_v4  ;;  %347 = vst.msk [vmem:[#allocation2 + $0x138] sm:$0xff] %vm307_vm0, %v3946_v4 }
  0x57   : > { %348 = vst.msk [vmem:[#allocation2 + $0x140] sm:$0xff] %vm307_vm0, %v3946_v4  ;;  %349 = vst.msk [vmem:[#allocation2 + $0x148] sm:$0xff] %vm307_vm0, %v3946_v4 }
  0x58   : > { %350 = vst.msk [vmem:[#allocation2 + $0x150] sm:$0xff] %vm307_vm0, %v3946_v4  ;;  %351 = vst.msk [vmem:[#allocation2 + $0x158] sm:$0xff] %vm307_vm0, %v3946_v4 }
  0x59   : > { %352 = vst.msk [vmem:[#allocation2 + $0x160] sm:$0xff] %vm307_vm0, %v3946_v4  ;;  %353 = vst.msk [vmem:[#allocation2 + $0x168] sm:$0xff] %vm307_vm0, %v3946_v4 }
  0x5a   : > { %354 = vst.msk [vmem:[#allocation2 + $0x170] sm:$0xff] %vm307_vm0, %v3946_v4  ;;  %355 = vst.msk [vmem:[#allocation2 + $0x178] sm:$0xff] %vm307_vm0, %v3946_v4 }
  0x5b   : > { %356 = vst.msk [vmem:[#allocation2 + $0x180] sm:$0xff] %vm307_vm0, %v3946_v4  ;;  %357 = vst.msk [vmem:[#allocation2 + $0x188] sm:$0xff] %vm307_vm0, %v3946_v4 }
  0x5c   : > { %358 = vst.msk [vmem:[#allocation2 + $0x190] sm:$0xff] %vm307_vm0, %v3946_v4  ;;  %359 = vst.msk [vmem:[#allocation2 + $0x198] sm:$0xff] %vm307_vm0, %v3946_v4 }
  0x5d   : > { %360 = vst.msk [vmem:[#allocation2 + $0x1a0] sm:$0xff] %vm307_vm0, %v3946_v4  ;;  %361 = vst.msk [vmem:[#allocation2 + $0x1a8] sm:$0xff] %vm307_vm0, %v3946_v4 }
  0x5e   : > { %362 = vst.msk [vmem:[#allocation2 + $0x1b0] sm:$0xff] %vm307_vm0, %v3946_v4  ;;  %363 = vst.msk [vmem:[#allocation2 + $0x1b8] sm:$0xff] %vm307_vm0, %v3946_v4 }
  0x5f   : > { %364 = vst.msk [vmem:[#allocation2 + $0x1c0] sm:$0xff] %vm307_vm0, %v3946_v4  ;;  %365 = vst.msk [vmem:[#allocation2 + $0x1c8] sm:$0xff] %vm307_vm0, %v3946_v4 }
  0x60   : > { %366 = vst.msk [vmem:[#allocation2 + $0x1d0] sm:$0xff] %vm307_vm0, %v3946_v4  ;;  %367 = vst.msk [vmem:[#allocation2 + $0x1d8] sm:$0xff] %vm307_vm0, %v3946_v4 }
  0x61   : > { %368 = vst.msk [vmem:[#allocation2 + $0x1e0] sm:$0xff] %vm307_vm0, %v3946_v4  ;;  %369 = vst.msk [vmem:[#allocation2 + $0x1e8] sm:$0xff] %vm307_vm0, %v3946_v4 }
  0x62   : > { %370 = vst.msk [vmem:[#allocation2 + $0x1f0] sm:$0xff] %vm307_vm0, %v3946_v4  ;;  %371 = vst.msk [vmem:[#allocation2 + $0x1f8] sm:$0xff] %vm307_vm0, %v3946_v4 }
  0x63   : > { %372 = vst.msk [vmem:[#allocation3] sm:$0xff] %vm307_vm0, %v3947_v5  ;;  %373 = vst.msk [vmem:[#allocation3 + $0x8] sm:$0xff] %vm307_vm0, %v3947_v5 }
  0x64   : > { %374 = vst.msk [vmem:[#allocation3 + $0x10] sm:$0xff] %vm307_vm0, %v3947_v5  ;;  %375 = vst.msk [vmem:[#allocation3 + $0x18] sm:$0xff] %vm307_vm0, %v3947_v5 }
  0x65   : > { %376 = vst.msk [vmem:[#allocation3 + $0x20] sm:$0xff] %vm307_vm0, %v3947_v5  ;;  %377 = vst.msk [vmem:[#allocation3 + $0x28] sm:$0xff] %vm307_vm0, %v3947_v5 }
  0x66   : > { %378 = vst.msk [vmem:[#allocation3 + $0x30] sm:$0xff] %vm307_vm0, %v3947_v5  ;;  %379 = vst.msk [vmem:[#allocation3 + $0x38] sm:$0xff] %vm307_vm0, %v3947_v5 }
  0x67   : > { %380 = vst.msk [vmem:[#allocation3 + $0x40] sm:$0xff] %vm307_vm0, %v3947_v5  ;;  %381 = vst.msk [vmem:[#allocation3 + $0x48] sm:$0xff] %vm307_vm0, %v3947_v5 }
  0x68   : > { %382 = vst.msk [vmem:[#allocation3 + $0x50] sm:$0xff] %vm307_vm0, %v3947_v5  ;;  %383 = vst.msk [vmem:[#allocation3 + $0x58] sm:$0xff] %vm307_vm0, %v3947_v5 }
  0x69   : > { %384 = vst.msk [vmem:[#allocation3 + $0x60] sm:$0xff] %vm307_vm0, %v3947_v5  ;;  %385 = vst.msk [vmem:[#allocation3 + $0x68] sm:$0xff] %vm307_vm0, %v3947_v5 }
  0x6a   : > { %386 = vst.msk [vmem:[#allocation3 + $0x70] sm:$0xff] %vm307_vm0, %v3947_v5  ;;  %387 = vst.msk [vmem:[#allocation3 + $0x78] sm:$0xff] %vm307_vm0, %v3947_v5 }
  0x6b   : > { %388 = vst.msk [vmem:[#allocation3 + $0x80] sm:$0xff] %vm307_vm0, %v3947_v5  ;;  %389 = vst.msk [vmem:[#allocation3 + $0x88] sm:$0xff] %vm307_vm0, %v3947_v5 }
  0x6c   : > { %390 = vst.msk [vmem:[#allocation3 + $0x90] sm:$0xff] %vm307_vm0, %v3947_v5  ;;  %391 = vst.msk [vmem:[#allocation3 + $0x98] sm:$0xff] %vm307_vm0, %v3947_v5 }
  0x6d   : > { %392 = vst.msk [vmem:[#allocation3 + $0xa0] sm:$0xff] %vm307_vm0, %v3947_v5  ;;  %393 = vst.msk [vmem:[#allocation3 + $0xa8] sm:$0xff] %vm307_vm0, %v3947_v5 }
  0x6e   : > { %394 = vst.msk [vmem:[#allocation3 + $0xb0] sm:$0xff] %vm307_vm0, %v3947_v5  ;;  %395 = vst.msk [vmem:[#allocation3 + $0xb8] sm:$0xff] %vm307_vm0, %v3947_v5 }
  0x6f   : > { %396 = vst.msk [vmem:[#allocation3 + $0xc0] sm:$0xff] %vm307_vm0, %v3947_v5  ;;  %397 = vst.msk [vmem:[#allocation3 + $0xc8] sm:$0xff] %vm307_vm0, %v3947_v5 }
  0x70   : > { %398 = vst.msk [vmem:[#allocation3 + $0xd0] sm:$0xff] %vm307_vm0, %v3947_v5  ;;  %399 = vst.msk [vmem:[#allocation3 + $0xd8] sm:$0xff] %vm307_vm0, %v3947_v5 }
  0x71   : > { %400 = vst.msk [vmem:[#allocation3 + $0xe0] sm:$0xff] %vm307_vm0, %v3947_v5  ;;  %401 = vst.msk [vmem:[#allocation3 + $0xe8] sm:$0xff] %vm307_vm0, %v3947_v5 }
  0x72   : > { %402 = vst.msk [vmem:[#allocation3 + $0xf0] sm:$0xff] %vm307_vm0, %v3947_v5  ;;  %403 = vst.msk [vmem:[#allocation3 + $0xf8] sm:$0xff] %vm307_vm0, %v3947_v5 }
  0x73   : > { %404 = vst.msk [vmem:[#allocation3 + $0x100] sm:$0xff] %vm307_vm0, %v3947_v5  ;;  %405 = vst.msk [vmem:[#allocation3 + $0x108] sm:$0xff] %vm307_vm0, %v3947_v5 }
  0x74   : > { %406 = vst.msk [vmem:[#allocation3 + $0x110] sm:$0xff] %vm307_vm0, %v3947_v5  ;;  %407 = vst.msk [vmem:[#allocation3 + $0x118] sm:$0xff] %vm307_vm0, %v3947_v5 }
  0x75   : > { %408 = vst.msk [vmem:[#allocation3 + $0x120] sm:$0xff] %vm307_vm0, %v3947_v5  ;;  %409 = vst.msk [vmem:[#allocation3 + $0x128] sm:$0xff] %vm307_vm0, %v3947_v5 }
  0x76   : > { %410 = vst.msk [vmem:[#allocation3 + $0x130] sm:$0xff] %vm307_vm0, %v3947_v5  ;;  %411 = vst.msk [vmem:[#allocation3 + $0x138] sm:$0xff] %vm307_vm0, %v3947_v5 }
  0x77   : > { %412 = vst.msk [vmem:[#allocation3 + $0x140] sm:$0xff] %vm307_vm0, %v3947_v5  ;;  %413 = vst.msk [vmem:[#allocation3 + $0x148] sm:$0xff] %vm307_vm0, %v3947_v5 }
  0x78   : > { %414 = vst.msk [vmem:[#allocation3 + $0x150] sm:$0xff] %vm307_vm0, %v3947_v5  ;;  %415 = vst.msk [vmem:[#allocation3 + $0x158] sm:$0xff] %vm307_vm0, %v3947_v5 }
  0x79   : > { %416 = vst.msk [vmem:[#allocation3 + $0x160] sm:$0xff] %vm307_vm0, %v3947_v5  ;;  %417 = vst.msk [vmem:[#allocation3 + $0x168] sm:$0xff] %vm307_vm0, %v3947_v5 }
  0x7a   : > { %418 = vst.msk [vmem:[#allocation3 + $0x170] sm:$0xff] %vm307_vm0, %v3947_v5  ;;  %419 = vst.msk [vmem:[#allocation3 + $0x178] sm:$0xff] %vm307_vm0, %v3947_v5 }
  0x7b   : > { %420 = vst.msk [vmem:[#allocation3 + $0x180] sm:$0xff] %vm307_vm0, %v3947_v5  ;;  %421 = vst.msk [vmem:[#allocation3 + $0x188] sm:$0xff] %vm307_vm0, %v3947_v5 }
  0x7c   : > { %422 = vst.msk [vmem:[#allocation3 + $0x190] sm:$0xff] %vm307_vm0, %v3947_v5  ;;  %423 = vst.msk [vmem:[#allocation3 + $0x198] sm:$0xff] %vm307_vm0, %v3947_v5 }
  0x7d   : > { %424 = vst.msk [vmem:[#allocation3 + $0x1a0] sm:$0xff] %vm307_vm0, %v3947_v5  ;;  %425 = vst.msk [vmem:[#allocation3 + $0x1a8] sm:$0xff] %vm307_vm0, %v3947_v5 }
  0x7e   : > { %426 = vst.msk [vmem:[#allocation3 + $0x1b0] sm:$0xff] %vm307_vm0, %v3947_v5  ;;  %427 = vst.msk [vmem:[#allocation3 + $0x1b8] sm:$0xff] %vm307_vm0, %v3947_v5 }
  0x7f   : > { %428 = vst.msk [vmem:[#allocation3 + $0x1c0] sm:$0xff] %vm307_vm0, %v3947_v5  ;;  %429 = vst.msk [vmem:[#allocation3 + $0x1c8] sm:$0xff] %vm307_vm0, %v3947_v5 }
  0x80   : > { %430 = vst.msk [vmem:[#allocation3 + $0x1d0] sm:$0xff] %vm307_vm0, %v3947_v5  ;;  %431 = vst.msk [vmem:[#allocation3 + $0x1d8] sm:$0xff] %vm307_vm0, %v3947_v5 }
  0x81   : > { %432 = vst.msk [vmem:[#allocation3 + $0x1e0] sm:$0xff] %vm307_vm0, %v3947_v5  ;;  %433 = vst.msk [vmem:[#allocation3 + $0x1e8] sm:$0xff] %vm307_vm0, %v3947_v5 }
  0x82   : > { %434 = vst.msk [vmem:[#allocation3 + $0x1f0] sm:$0xff] %vm307_vm0, %v3947_v5  ;;  %435 = vst.msk [vmem:[#allocation3 + $0x1f8] sm:$0xff] %vm307_vm0, %v3947_v5 }
  0x83 PF: > { %v500_v6 = vld [vmem:[%s4099_s21] sm:$0xff]  ;;  %v501_v7 = vld [vmem:[%s4099_s21 + $0x8] sm:$0xff]  ;;  %v502_v8 = vld [vmem:[%s4099_s21 + $0x10] sm:$0xff]  ;;  %vm504_vm1 = vcmask 261120   ;;  %s3511_s8 = sshll.u32 %s3928_s20, 7  ;;  %vm2566_vm2 = vcmask 7168  }
  0x84   : > { %v3695_v9 = vpack.c.bf16 %v501_v7, %v500_v6  ;;  %v503_v10 = vld [vmem:[%s4099_s21 + $0x18] sm:$0xff]  ;;  %v436_v11 = vld [vmem:[%s4093_s18] sm:$0xff]  ;;  %v437_v14 = vld [vmem:[%s4093_s18 + $0x8] sm:$0xff]  ;;  %p3512_p6 = scmp.ne.s32.totalorder %s3928_s20, 1 }
  0x85   : > { %v468_v12 = vld [vmem:[%s4093_s18 + $0x100] sm:$0xff]  ;;  %v3699_v13 = vpack.c.bf16 %v503_v10, %v502_v8  ;;  %3599 = vmatprep.mubr.msk.f32.mxu0 %vm504_vm1, %v436_v11  ;;  %v469_v15 = vld [vmem:[%s4093_s18 + $0x108] sm:$0xff]  ;;  %v438_v16 = vld [vmem:[%s4093_s18 + $0x10] sm:$0xff] }
  0x86   : > { %3647 = vmatprep.mubr.msk.f32.mxu1 %vm504_vm1, %v468_v12  ;;  %3696 = vmatprep.subr.bf16.mxu0 %v3695_v9  ;;  %v470_v17 = vld [vmem:[%s4093_s18 + $0x110] sm:$0xff]  ;;  %v439_v18 = vld [vmem:[%s4093_s18 + $0x18] sm:$0xff]  ;;  %v440_v20 = vld [vmem:[%s4093_s18 + $0x20] sm:$0xff] }
  0x87   : > { %3703 = vmatprep.subr.bf16.mxu1 %v3695_v9  ;;  %3698 = vmatpush3.bf16.msra.mxu0 %v3695_v9  ;;  %v471_v19 = vld [vmem:[%s4093_s18 + $0x118] sm:$0xff]  ;;  %v472_v21 = vld [vmem:[%s4093_s18 + $0x120] sm:$0xff]  ;;  %v441_v22 = vld [vmem:[%s4093_s18 + $0x28] sm:$0xff] }
  0x88   : > { %3705 = vmatpush3.bf16.msra.mxu1 %v3695_v9  ;;  %3700 = vmatprep.subr.bf16.mxu0 %v3699_v13  ;;  %v473_v23 = vld [vmem:[%s4093_s18 + $0x128] sm:$0xff]  ;;  %v442_v24 = vld [vmem:[%s4093_s18 + $0x30] sm:$0xff]  ;;  %v443_v26 = vld [vmem:[%s4093_s18 + $0x38] sm:$0xff] }
  0x89   : > { %3704 = vmatprep.subr.bf16.mxu1 %v3699_v13  ;;  %v474_v25 = vld [vmem:[%s4093_s18 + $0x130] sm:$0xff]  ;;  %v475_v27 = vld [vmem:[%s4093_s18 + $0x138] sm:$0xff]  ;;  %v444_v28 = vld [vmem:[%s4093_s18 + $0x40] sm:$0xff] }
  0x8a   : > { %v476_v29 = vld [vmem:[%s4093_s18 + $0x140] sm:$0xff]  ;;  %v445_v30 = vld [vmem:[%s4093_s18 + $0x48] sm:$0xff]  ;;  %v446_v32 = vld [vmem:[%s4093_s18 + $0x50] sm:$0xff] }
  0x8b   : > { %3702 = vmatpush3.bf16.msra.mxu0 %v3699_v13  ;;  %v477_v31 = vld [vmem:[%s4093_s18 + $0x148] sm:$0xff]  ;;  %v478_v33 = vld [vmem:[%s4093_s18 + $0x150] sm:$0xff]  ;;  %v447_v34 = vld [vmem:[%s4093_s18 + $0x58] sm:$0xff] }
  0x8c   : > { %3706 = vmatpush3.bf16.msra.mxu1 %v3699_v13  ;;  %v479_v35 = vld [vmem:[%s4093_s18 + $0x158] sm:$0xff]  ;;  %v448_v36 = vld [vmem:[%s4093_s18 + $0x60] sm:$0xff]  ;;  %v449_v38 = vld [vmem:[%s4093_s18 + $0x68] sm:$0xff] }
  0x8d   : > { %v480_v37 = vld [vmem:[%s4093_s18 + $0x160] sm:$0xff]  ;;  %v481_v39 = vld [vmem:[%s4093_s18 + $0x168] sm:$0xff]  ;;  %v450_v40 = vld [vmem:[%s4093_s18 + $0x70] sm:$0xff] }
  0x8e   : > { %3600 = vmatmul.mubr.msk.f32.vlgmr.msra.gmra.mrb[0].mxu0 %vm504_vm1, %v437_v14  ;;  %v482_v41 = vld [vmem:[%s4093_s18 + $0x170] sm:$0xff]  ;;  %v451_v42 = vld [vmem:[%s4093_s18 + $0x78] sm:$0xff]  ;;  %v452_v44 = vld [vmem:[%s4093_s18 + $0x80] sm:$0xff] }
  0x8f   : > { %3648 = vmatmul.mubr.msk.f32.vlgmr.msra.gmra.mrb[0].mxu1 %vm504_vm1, %v469_v15  ;;  %3602 = vmatprep.mubr.msk.f32.mxu0 %vm504_vm1, %v438_v16  ;;  %v483_v43 = vld [vmem:[%s4093_s18 + $0x178] sm:$0xff]  ;;  %v484_v45 = vld [vmem:[%s4093_s18 + $0x180] sm:$0xff]  ;;  %v453_v46 = vld [vmem:[%s4093_s18 + $0x88] sm:$0xff] }
  0x90   : > { %3650 = vmatprep.mubr.msk.f32.mxu1 %vm504_vm1, %v470_v17  ;;  %v485_v47 = vld [vmem:[%s4093_s18 + $0x188] sm:$0xff]  ;;  %v454_v48 = vld [vmem:[%s4093_s18 + $0x90] sm:$0xff]  ;;  %v455_v50 = vld [vmem:[%s4093_s18 + $0x98] sm:$0xff] }
  0x91   : > { %v486_v49 = vld [vmem:[%s4093_s18 + $0x190] sm:$0xff]  ;;  %v487_v51 = vld [vmem:[%s4093_s18 + $0x198] sm:$0xff]  ;;  %v456_v52 = vld [vmem:[%s4093_s18 + $0xa0] sm:$0xff] }
  0x92   : > { %3603 = vmatmul.mubr.msk.f32.gmra.mrb[2].mxu0 %vm504_vm1, %v439_v18  ;;  %v488_v53 = vld [vmem:[%s4093_s18 + $0x1a0] sm:$0xff]  ;;  %v457_v54 = vld [vmem:[%s4093_s18 + $0xa8] sm:$0xff]  ;;  %v458_v56 = vld [vmem:[%s4093_s18 + $0xb0] sm:$0xff] }
  0x93   : > { %3651 = vmatmul.mubr.msk.f32.gmra.mrb[2].mxu1 %vm504_vm1, %v471_v19  ;;  %3605 = vmatprep.mubr.msk.f32.mxu0 %vm504_vm1, %v440_v20  ;;  %v489_v55 = vld [vmem:[%s4093_s18 + $0x1a8] sm:$0xff]  ;;  %v490_v57 = vld [vmem:[%s4093_s18 + $0x1b0] sm:$0xff]  ;;  %v459_v58 = vld [vmem:[%s4093_s18 + $0xb8] sm:$0xff] }
  0x94   : > { %3653 = vmatprep.mubr.msk.f32.mxu1 %vm504_vm1, %v472_v21  ;;  %v491_v59 = vld [vmem:[%s4093_s18 + $0x1b8] sm:$0xff]  ;;  %v460_v60 = vld [vmem:[%s4093_s18 + $0xc0] sm:$0xff]  ;;  %v461_v62 = vld [vmem:[%s4093_s18 + $0xc8] sm:$0xff] }
  0x95   : > { %v492_v61 = vld [vmem:[%s4093_s18 + $0x1c0] sm:$0xff]  ;;  %v493_v63 = vld [vmem:[%s4093_s18 + $0x1c8] sm:$0xff]  ;;  %v462_v0 = vld [vmem:[%s4093_s18 + $0xd0] sm:$0xff] }
  0x96   : > { %3606 = vmatmul.mubr.msk.f32.gmra.mrb[4].mxu0 %vm504_vm1, %v441_v22  ;;  %v494_v1 = vld [vmem:[%s4093_s18 + $0x1d0] sm:$0xff]  ;;  %v463_v2 = vld [vmem:[%s4093_s18 + $0xd8] sm:$0xff]  ;;  %v464_v4 = vld [vmem:[%s4093_s18 + $0xe0] sm:$0xff] }
  0x97   : > { %3654 = vmatmul.mubr.msk.f32.gmra.mrb[4].mxu1 %vm504_vm1, %v473_v23  ;;  %3608 = vmatprep.mubr.msk.f32.mxu0 %vm504_vm1, %v442_v24  ;;  %v495_v3 = vld [vmem:[%s4093_s18 + $0x1d8] sm:$0xff]  ;;  %v496_v5 = vld [vmem:[%s4093_s18 + $0x1e0] sm:$0xff]  ;;  %v465_v6 = vld [vmem:[%s4093_s18 + $0xe8] sm:$0xff] }
  0x98   : > { %3656 = vmatprep.mubr.msk.f32.mxu1 %vm504_vm1, %v474_v25  ;;  %v497_v7 = vld [vmem:[%s4093_s18 + $0x1e8] sm:$0xff]  ;;  %v466_v8 = vld [vmem:[%s4093_s18 + $0xf0] sm:$0xff]  ;;  %v467_v10 = vld [vmem:[%s4093_s18 + $0xf8] sm:$0xff] }
  0x99   : > { %v498_v9 = vld [vmem:[%s4093_s18 + $0x1f0] sm:$0xff]  ;;  %v499_v11 = vld [vmem:[%s4093_s18 + $0x1f8] sm:$0xff]  ;;  %v4499_v14 = vld [vmem:[%s300_s5] ss:$0 sm:$0xff] }
  0x9a   : > { %3609 = vmatmul.mubr.msk.f32.gmra.mrb[6].mxu0 %vm504_vm1, %v443_v26 }
  0x9b   : > { %3657 = vmatmul.mubr.msk.f32.gmra.mrb[6].mxu1 %vm504_vm1, %v475_v27  ;;  %3611 = vmatprep.mubr.msk.f32.mxu0 %vm504_vm1, %v444_v28 }
  0x9c   : > { %3659 = vmatprep.mubr.msk.f32.mxu1 %vm504_vm1, %v476_v29 }
  0x9e   : > { %3612 = vmatmul.mubr.msk.f32.gmra.mrb[8].mxu0 %vm504_vm1, %v445_v30 }
  0x9f   : > { %3660 = vmatmul.mubr.msk.f32.gmra.mrb[8].mxu1 %vm504_vm1, %v477_v31  ;;  %3614 = vmatprep.mubr.msk.f32.mxu0 %vm504_vm1, %v446_v32 }
  0xa0   : > { %3662 = vmatprep.mubr.msk.f32.mxu1 %vm504_vm1, %v478_v33 }
  0xa2   : > { %3615 = vmatmul.mubr.msk.f32.gmra.mrb[10].mxu0 %vm504_vm1, %v447_v34 }
  0xa3   : > { %3663 = vmatmul.mubr.msk.f32.gmra.mrb[10].mxu1 %vm504_vm1, %v479_v35  ;;  %3617 = vmatprep.mubr.msk.f32.mxu0 %vm504_vm1, %v448_v36 }
  0xa4   : > { %3665 = vmatprep.mubr.msk.f32.mxu1 %vm504_vm1, %v480_v37 }
  0xa6   : > { %3618 = vmatmul.mubr.msk.f32.gmra.mrb[12].mxu0 %vm504_vm1, %v449_v38 }
  0xa7   : > { %3666 = vmatmul.mubr.msk.f32.gmra.mrb[12].mxu1 %vm504_vm1, %v481_v39  ;;  %3620 = vmatprep.mubr.msk.f32.mxu0 %vm504_vm1, %v450_v40 }
  0xa8   : > { %3668 = vmatprep.mubr.msk.f32.mxu1 %vm504_vm1, %v482_v41 }
  0xaa   : > { %3621 = vmatmul.mubr.msk.f32.gmra.mrb[14].mxu0 %vm504_vm1, %v451_v42 }
  0xab   : > { %3669 = vmatmul.mubr.msk.f32.gmra.mrb[14].mxu1 %vm504_vm1, %v483_v43  ;;  %3623 = vmatprep.mubr.msk.f32.mxu0 %vm504_vm1, %v452_v44 }
  0xac   : > { %3671 = vmatprep.mubr.msk.f32.mxu1 %vm504_vm1, %v484_v45 }
  0xae   : > { %3624 = vmatmul.mubr.msk.f32.gmra.mrb[16].mxu0 %vm504_vm1, %v453_v46 }
  0xaf   : > { %3672 = vmatmul.mubr.msk.f32.gmra.mrb[16].mxu1 %vm504_vm1, %v485_v47  ;;  %3626 = vmatprep.mubr.msk.f32.mxu0 %vm504_vm1, %v454_v48 }
  0xb0   : > { %3674 = vmatprep.mubr.msk.f32.mxu1 %vm504_vm1, %v486_v49 }
  0xb2   : > { %3627 = vmatmul.mubr.msk.f32.gmra.mrb[18].mxu0 %vm504_vm1, %v455_v50 }
  0xb3   : > { %3675 = vmatmul.mubr.msk.f32.gmra.mrb[18].mxu1 %vm504_vm1, %v487_v51  ;;  %3629 = vmatprep.mubr.msk.f32.mxu0 %vm504_vm1, %v456_v52 }
  0xb4   : > { %3677 = vmatprep.mubr.msk.f32.mxu1 %vm504_vm1, %v488_v53 }
  0xb6   : > { %3630 = vmatmul.mubr.msk.f32.gmra.mrb[20].mxu0 %vm504_vm1, %v457_v54 }
  0xb7   : > { %3678 = vmatmul.mubr.msk.f32.gmra.mrb[20].mxu1 %vm504_vm1, %v489_v55  ;;  %3632 = vmatprep.mubr.msk.f32.mxu0 %vm504_vm1, %v458_v56 }
  0xb8   : > { %3680 = vmatprep.mubr.msk.f32.mxu1 %vm504_vm1, %v490_v57 }
  0xba   : > { %3633 = vmatmul.mubr.msk.f32.gmra.mrb[22].mxu0 %vm504_vm1, %v459_v58 }
  0xbb   : > { %3681 = vmatmul.mubr.msk.f32.gmra.mrb[22].mxu1 %vm504_vm1, %v491_v59  ;;  %3635 = vmatprep.mubr.msk.f32.mxu0 %vm504_vm1, %v460_v60 }
  0xbc   : > { %3683 = vmatprep.mubr.msk.f32.mxu1 %vm504_vm1, %v492_v61 }
  0xbe   : > { %3636 = vmatmul.mubr.msk.f32.gmra.mrb[24].mxu0 %vm504_vm1, %v461_v62 }
  0xbf   : > { %3684 = vmatmul.mubr.msk.f32.gmra.mrb[24].mxu1 %vm504_vm1, %v493_v63  ;;  %3638 = vmatprep.mubr.msk.f32.mxu0 %vm504_vm1, %v462_v0 }
  0xc0   : > { %3686 = vmatprep.mubr.msk.f32.mxu1 %vm504_vm1, %v494_v1 }
  0xc2   : > { %3639 = vmatmul.mubr.msk.f32.gmra.mrb[26].mxu0 %vm504_vm1, %v463_v2 }
  0xc3   : > { %3687 = vmatmul.mubr.msk.f32.gmra.mrb[26].mxu1 %vm504_vm1, %v495_v3  ;;  %3641 = vmatprep.mubr.msk.f32.mxu0 %vm504_vm1, %v464_v4 }
  0xc4   : > { %3689 = vmatprep.mubr.msk.f32.mxu1 %vm504_vm1, %v496_v5 }
  0xc6   : > { %3642 = vmatmul.mubr.msk.f32.gmra.mrb[28].mxu0 %vm504_vm1, %v465_v6 }
  0xc7   : > { %3690 = vmatmul.mubr.msk.f32.gmra.mrb[28].mxu1 %vm504_vm1, %v497_v7  ;;  %3644 = vmatprep.mubr.msk.f32.mxu0 %vm504_vm1, %v466_v8 }
  0xc8   : > { %3692 = vmatprep.mubr.msk.f32.mxu1 %vm504_vm1, %v498_v9 }
  0xca   : > { %3645 = vmatmul.mubr.msk.f32.gmra.mrb[30].mxu0 %vm504_vm1, %v467_v10 }
  0xcb   : > { %3693 = vmatmul.mubr.msk.f32.gmra.mrb[30].mxu1 %vm504_vm1, %v499_v11 }
 0x161   : > { %v3601_v12 = vpop.f32.mrb[0].mxu0 }
 0x162   : > { %v3649_v13 = vpop.f32.mrb[0].mxu1  ;;  %v1084_v15 = vmul.f32 2.0, %v3601_v12  ;;  %v763_v17 = vpop.f32.mrb[1].mxu0 }
 0x163   : > { %v1116_v16 = vmul.f32 2.0, %v3649_v13  ;;  %v923_v18 = vpop.f32.mrb[1].mxu1  ;;  %v1083_v19 = vmul.f32 2.0, %v763_v17 }
 0x164   : > { %v4505_v21 = vsub.f32 %v4499_v14, %v1084_v15  ;;  %v1115_v28 = vmul.f32 2.0, %v923_v18 }
 0x165   : > { %v4502_v20 = vsub.f32 %v4499_v14, %v1116_v16  ;;  %v3604_v22 = vpop.f32.mrb[2].mxu0  ;;  %v4510_v29 = vsub.f32 %v4499_v14, %v1083_v19 }
 0x166   : > { %v3652_v23 = vpop.f32.mrb[2].mxu1  ;;  %v1086_v24 = vmul.f32 2.0, %v3604_v22  ;;  %1219 = vmin.xlane.f32.xlu0 %v4505_v21  ;;  %v773_v25 = vpop.f32.mrb[3].mxu0  ;;  %v4521_v38 = vsub.f32 %v4499_v14, %v1115_v28 }
 0x167   : > { %1283 = vmin.xlane.f32.xlu1 %v4502_v20  ;;  %v1118_v26 = vmul.f32 2.0, %v3652_v23  ;;  %v933_v27 = vpop.f32.mrb[3].mxu1  ;;  %v1085_v37 = vmul.f32 2.0, %v773_v25 }
 0x168   : > { %v4513_v30 = vsub.f32 %v4499_v14, %v1086_v24  ;;  %v1117_v33 = vmul.f32 2.0, %v933_v27 }
 0x169   : > { %v3607_v31 = vpop.f32.mrb[4].mxu0  ;;  %v4518_v34 = vsub.f32 %v4499_v14, %v1118_v26  ;;  %v4529_v46 = vsub.f32 %v4499_v14, %v1085_v37 }
 0x16a   : > { %v3655_v32 = vpop.f32.mrb[4].mxu1  ;;  %1217 = vmin.xlane.f32.xlu0 %v4510_v29  ;;  %v783_v35 = vpop.f32.mrb[5].mxu0  ;;  %v1088_v41 = vmul.f32 2.0, %v3607_v31  ;;  %v4526_v43 = vsub.f32 %v4499_v14, %v1117_v33 }
 0x16b   : > { %1223 = vmin.xlane.f32.xlu1 %v4513_v30  ;;  %v943_v36 = vpop.f32.mrb[5].mxu1  ;;  %v1087_v42 = vmul.f32 2.0, %v783_v35  ;;  %v1120_v49 = vmul.f32 2.0, %v3655_v32 }
 0x16c   : > { %v1119_v50 = vmul.f32 2.0, %v943_v36  ;;  %v4534_v51 = vsub.f32 %v4499_v14, %v1088_v41 }
 0x16d   : > { %v3610_v39 = vpop.f32.mrb[6].mxu0  ;;  %v4537_v52 = vsub.f32 %v4499_v14, %v1087_v42  ;;  %v4544_v59 = vsub.f32 %v4499_v14, %v1120_v49 }
 0x16e   : > { %v3658_v40 = vpop.f32.mrb[6].mxu1  ;;  %1281 = vmin.xlane.f32.xlu0 %v4521_v38  ;;  %v793_v44 = vpop.f32.mrb[7].mxu0  ;;  %v1090_v57 = vmul.f32 2.0, %v3610_v39  ;;  %v4547_v60 = vsub.f32 %v4499_v14, %v1119_v50 }
 0x16f   : > { %1287 = vmin.xlane.f32.xlu1 %v4518_v34  ;;  %v953_v45 = vpop.f32.mrb[7].mxu1  ;;  %v1089_v58 = vmul.f32 2.0, %v793_v44  ;;  %v1122_v1 = vmul.f32 2.0, %v3658_v40 }
 0x170   : > { %v1121_v2 = vmul.f32 2.0, %v953_v45  ;;  %v4556_v3 = vsub.f32 %v4499_v14, %v1090_v57 }
 0x171   : > { %v3613_v47 = vpop.f32.mrb[8].mxu0  ;;  %v4559_v4 = vsub.f32 %v4499_v14, %v1089_v58  ;;  %v4572_v11 = vsub.f32 %v4499_v14, %v1122_v1 }
 0x172   : > { %v3661_v48 = vpop.f32.mrb[8].mxu1  ;;  %1285 = vmin.xlane.f32.xlu0 %v4526_v43  ;;  %v803_v53 = vpop.f32.mrb[9].mxu0  ;;  %v1092_v9 = vmul.f32 2.0, %v3613_v47  ;;  %v4575_v12 = vsub.f32 %v4499_v14, %v1121_v2 }
 0x173   : > { %1221 = vmin.xlane.f32.xlu1 %v4529_v46  ;;  %v963_v54 = vpop.f32.mrb[9].mxu1  ;;  %v1091_v10 = vmul.f32 2.0, %v803_v53  ;;  %v1124_v16 = vmul.f32 2.0, %v3661_v48 }
 0x174   : > { %v1123_v17 = vmul.f32 2.0, %v963_v54  ;;  %v4584_v22 = vsub.f32 %v4499_v14, %v1092_v9 }
 0x175   : > { %v3616_v55 = vpop.f32.mrb[10].mxu0  ;;  %v4587_v23 = vsub.f32 %v4499_v14, %v1091_v10  ;;  %v4596_v35 = vsub.f32 %v4499_v14, %v1124_v16 }
 0x176   : > { %v4539_v56 = vpop.f32.mrb[10].mxu1  ;;  %1225 = vmin.xlane.f32.xlu0 %v4537_v52  ;;  %v813_v61 = vpop.f32.mrb[11].mxu0  ;;  %v4599_v36 = vsub.f32 %v4499_v14, %v1123_v17  ;;  %v1094_v42 = vmul.f32 2.0, %v3616_v55 }
 0x177   : > { %1227 = vmin.xlane.f32.xlu1 %v4534_v51  ;;  %v973_v62 = vpop.f32.mrb[11].mxu1  ;;  %7263 = vst [vmem:[#allocation14_spill] sm:$0xff] %v4587_v23  ;;  %v1093_v44 = vmul.f32 2.0, %v813_v61  ;;  %v1126_v58 = vmul.f32 2.0, %v4539_v56 }
 0x178   : > { %7264 = vst [vmem:[#allocation15_spill] sm:$0xff] %v4599_v36  ;;  %v1125_v1 = vmul.f32 2.0, %v973_v62  ;;  %v4625_v10 = vsub.f32 %v4499_v14, %v1094_v42 }
 0x179   : > { %v4549_v63 = vpop.f32.mrb[12].mxu0  ;;  %v4628_v16 = vsub.f32 %v4499_v14, %v1093_v44 }
 0x17a   : > { %v4551_v0 = vpop.f32.mrb[12].mxu1  ;;  %1289 = vmin.xlane.f32.xlu0 %v4547_v60  ;;  %v4561_v5 = vpop.f32.mrb[13].mxu0  ;;  %7265 = vst [vmem:[#allocation16_spill] sm:$0xff] %v4625_v10  ;;  %v1096_v44 = vmul.f32 2.0, %v4549_v63 }
 0x17b   : > { %1291 = vmin.xlane.f32.xlu1 %v4544_v59  ;;  %v4563_v6 = vpop.f32.mrb[13].mxu1  ;;  %7266 = vst [vmem:[#allocation17_spill] sm:$0xff] %v4628_v16 }
 0x17d   : > { %v4565_v7 = vpop.f32.mrb[14].mxu0 }
 0x17e   : > { %v4567_v8 = vpop.f32.mrb[14].mxu1  ;;  %1229 = vmin.xlane.f32.xlu0 %v4559_v4  ;;  %v4577_v13 = vpop.f32.mrb[15].mxu0 }
 0x17f   : > { %1231 = vmin.xlane.f32.xlu1 %v4556_v3  ;;  %v4579_v15 = vpop.f32.mrb[15].mxu1 }
 0x181   : > { %v3625_v18 = vpop.f32.mrb[16].mxu0 }
 0x182   : > { %v3673_v19 = vpop.f32.mrb[16].mxu1  ;;  %1293 = vmin.xlane.f32.xlu0 %v4575_v12  ;;  %v1100_v24 = vmul.f32 2.0, %v3625_v18  ;;  %v843_v25 = vpop.f32.mrb[17].mxu0 }
 0x183   : > { %1295 = vmin.xlane.f32.xlu1 %v4572_v11  ;;  %v1132_v26 = vmul.f32 2.0, %v3673_v19  ;;  %v1003_v27 = vpop.f32.mrb[17].mxu1  ;;  %v1099_v28 = vmul.f32 2.0, %v843_v25 }
 0x184   : > { %v1131_v31 = vmul.f32 2.0, %v1003_v27  ;;  %v4590_v32 = vsub.f32 %v4499_v14, %v1100_v24  ;;  %v4637_v27 = vsub.f32 %v4499_v14, %v1126_v58 }
 0x185   : > { %v4593_v33 = vsub.f32 %v4499_v14, %v1132_v26  ;;  %v4602_v37 = vsub.f32 %v4499_v14, %v1099_v28  ;;  %v3628_v39 = vpop.f32.mrb[18].mxu0  ;;  %v4640_v28 = vsub.f32 %v4499_v14, %v1125_v1 }
 0x186   : > { %v4605_v40 = vsub.f32 %v4499_v14, %v1131_v31  ;;  %v3676_v41 = vpop.f32.mrb[18].mxu1  ;;  %1233 = vmin.xlane.f32.xlu0 %v4587_v23  ;;  %v1102_v45 = vmul.f32 2.0, %v3628_v39  ;;  %v853_v47 = vpop.f32.mrb[19].mxu0 }
 0x187   : > { %1235 = vmin.xlane.f32.xlu1 %v4584_v22  ;;  %v1134_v48 = vmul.f32 2.0, %v3676_v41  ;;  %v1013_v49 = vpop.f32.mrb[19].mxu1  ;;  %v1101_v50 = vmul.f32 2.0, %v853_v47  ;;  %7267 = vst [vmem:[#allocation18_spill] sm:$0xff] %v4640_v28 }
 0x188   : > { %v1133_v53 = vmul.f32 2.0, %v1013_v49  ;;  %v4610_v54 = vsub.f32 %v4499_v14, %v1102_v45  ;;  %v1095_v45 = vmul.f32 2.0, %v4561_v5 }
 0x189   : > { %v4613_v57 = vsub.f32 %v4499_v14, %v1134_v48  ;;  %v4617_v2 = vsub.f32 %v4499_v14, %v1101_v50  ;;  %v3631_v55 = vpop.f32.mrb[20].mxu0 }
 0x18a   : > { %v4620_v61 = vsub.f32 %v4499_v14, %v1133_v53  ;;  %v3679_v9 = vpop.f32.mrb[20].mxu1  ;;  %1297 = vmin.xlane.f32.xlu0 %v4599_v36  ;;  %v1104_v56 = vmul.f32 2.0, %v3631_v55  ;;  %v863_v62 = vpop.f32.mrb[21].mxu0 }
 0x18b   : > { %1299 = vmin.xlane.f32.xlu1 %v4596_v35  ;;  %v1136_v17 = vmul.f32 2.0, %v3679_v9  ;;  %v1023_v18 = vpop.f32.mrb[21].mxu1  ;;  %v1103_v19 = vmul.f32 2.0, %v863_v62  ;;  %v1128_v9 = vmul.f32 2.0, %v4551_v0 }
 0x18c   : > { %v1135_v24 = vmul.f32 2.0, %v1023_v18  ;;  %v4631_v25 = vsub.f32 %v4499_v14, %v1104_v56  ;;  %v1127_v56 = vmul.f32 2.0, %v4563_v6  ;;  %v4669_v18 = vsub.f32 %v4499_v14, %v1096_v44 }
 0x18d   : > { %v4634_v26 = vsub.f32 %v4499_v14, %v1136_v17  ;;  %v4643_v31 = vsub.f32 %v4499_v14, %v1103_v19  ;;  %v3634_v39 = vpop.f32.mrb[22].mxu0  ;;  %v4672_v19 = vsub.f32 %v4499_v14, %v1095_v45 }
 0x18e   : > { %v4646_v41 = vsub.f32 %v4499_v14, %v1135_v24  ;;  %v3682_v42 = vpop.f32.mrb[22].mxu1  ;;  %1237 = vmin.xlane.f32.xlu0 %v4628_v16  ;;  %v1106_v47 = vmul.f32 2.0, %v3634_v39  ;;  %v873_v48 = vpop.f32.mrb[23].mxu0  ;;  %7268 = vst [vmem:[#allocation19_spill] sm:$0xff] %v4669_v18  ;;  %v4684_v44 = vsub.f32 %v4499_v14, %v1127_v56 }
 0x18f   : > { %1239 = vmin.xlane.f32.xlu1 %v4625_v10  ;;  %v1138_v49 = vmul.f32 2.0, %v3682_v42  ;;  %v1033_v50 = vpop.f32.mrb[23].mxu1  ;;  %v1105_v53 = vmul.f32 2.0, %v873_v48  ;;  %7269 = vst [vmem:[#allocation20_spill] sm:$0xff] %v4672_v19 }
 0x190   : > { %v1137_v58 = vmul.f32 2.0, %v1033_v50  ;;  %v4653_v1 = vsub.f32 %v4499_v14, %v1106_v47  ;;  %v4681_v50 = vsub.f32 %v4499_v14, %v1128_v9  ;;  %7271 = vst [vmem:[#allocation22_spill] sm:$0xff] %v4684_v44  ;;  %v1097_v9 = vmul.f32 2.0, %v4577_v13 }
 0x191   : > { %v4656_v55 = vsub.f32 %v4499_v14, %v1138_v49  ;;  %v4661_v63 = vsub.f32 %v4499_v14, %v1105_v53  ;;  %v3637_v5 = vpop.f32.mrb[24].mxu0 }
 0x192   : > { %v4664_v62 = vsub.f32 %v4499_v14, %v1137_v58  ;;  %v3685_v17 = vpop.f32.mrb[24].mxu1  ;;  %1301 = vmin.xlane.f32.xlu0 %v4640_v28  ;;  %v1108_v0 = vmul.f32 2.0, %v3637_v5  ;;  %v883_v6 = vpop.f32.mrb[25].mxu0  ;;  %7270 = vst [vmem:[#allocation21_spill] sm:$0xff] %v4681_v50 }
 0x193   : > { %1303 = vmin.xlane.f32.xlu1 %v4637_v27  ;;  %v1140_v24 = vmul.f32 2.0, %v3685_v17  ;;  %v1043_v39 = vpop.f32.mrb[25].mxu1  ;;  %v1107_v42 = vmul.f32 2.0, %v883_v6  ;;  %v1098_v17 = vmul.f32 2.0, %v4565_v7 }
 0x194   : > { %v1139_v47 = vmul.f32 2.0, %v1043_v39  ;;  %v4675_v48 = vsub.f32 %v4499_v14, %v1108_v0 }
 0x195   : > { %v4678_v49 = vsub.f32 %v4499_v14, %v1140_v24  ;;  %v4687_v45 = vsub.f32 %v4499_v14, %v1107_v42  ;;  %v3640_v53 = vpop.f32.mrb[26].mxu0 }
 0x196   : > { %v4690_v58 = vsub.f32 %v4499_v14, %v1139_v47  ;;  %v3688_v5 = vpop.f32.mrb[26].mxu1  ;;  %1241 = vmin.xlane.f32.xlu0 %v4672_v19  ;;  %v1110_v0 = vmul.f32 2.0, %v3640_v53  ;;  %v893_v6 = vpop.f32.mrb[27].mxu0  ;;  %v1129_v19 = vmul.f32 2.0, %v4579_v15 }
 0x197   : > { %1243 = vmin.xlane.f32.xlu1 %v4669_v18  ;;  %v1142_v56 = vmul.f32 2.0, %v3688_v5  ;;  %v1053_v24 = vpop.f32.mrb[27].mxu1  ;;  %v1109_v39 = vmul.f32 2.0, %v893_v6  ;;  %v1130_v18 = vmul.f32 2.0, %v4567_v8  ;;  %v4716_v6 = vsub.f32 %v4499_v14, %v1097_v9 }
 0x198   : > { %v1141_v42 = vmul.f32 2.0, %v1053_v24  ;;  %v4697_v28 = vsub.f32 %v4499_v14, %v1110_v0  ;;  %v4713_v0 = vsub.f32 %v4499_v14, %v1098_v17 }
 0x199   : > { %v4700_v47 = vsub.f32 %v4499_v14, %v1142_v56  ;;  %v4705_v7 = vsub.f32 %v4499_v14, %v1109_v39  ;;  %v3643_v13 = vpop.f32.mrb[28].mxu0  ;;  %7272 = vst [vmem:[#allocation23_spill] sm:$0xff] %v4716_v6 }
 0x19a   : > { %v4708_v53 = vsub.f32 %v4499_v14, %v1141_v42  ;;  %v3691_v5 = vpop.f32.mrb[28].mxu1  ;;  %1305 = vmin.xlane.f32.xlu0 %v4684_v44  ;;  %v1112_v8 = vmul.f32 2.0, %v3643_v13  ;;  %v903_v15 = vpop.f32.mrb[29].mxu0  ;;  %v4733_v13 = vsub.f32 %v4499_v14, %v1130_v18 }
 0x19b   : > { %1307 = vmin.xlane.f32.xlu1 %v4681_v50  ;;  %v1144_v56 = vmul.f32 2.0, %v3691_v5  ;;  %v1063_v24 = vpop.f32.mrb[29].mxu1  ;;  %v1111_v39 = vmul.f32 2.0, %v903_v15  ;;  %v4736_v5 = vsub.f32 %v4499_v14, %v1129_v19  ;;  %v1348_v19 = vstv %s3511_s8 }
 0x19c   : > { %v1143_v16 = vmul.f32 2.0, %v1063_v24  ;;  %v4719_v42 = vsub.f32 %v4499_v14, %v1112_v8 }
 0x19d   : > { %v4722_v10 = vsub.f32 %v4499_v14, %v1144_v56  ;;  %v4725_v44 = vsub.f32 %v4499_v14, %v1111_v39  ;;  %v3646_v17 = vpop.f32.mrb[30].mxu0 }
 0x19e   : > { %v4728_v50 = vsub.f32 %v4499_v14, %v1143_v16  ;;  %v3694_v9 = vpop.f32.mrb[30].mxu1  ;;  %1245 = vmin.xlane.f32.xlu0 %v4716_v6  ;;  %v1114_v8 = vmul.f32 2.0, %v3646_v17  ;;  %v913_v15 = vpop.f32.mrb[31].mxu0  ;;  %v4786_v17 = vld [vmem:[#allocation2 + $0x108] sm:$0xff] }
 0x19f   : > { %7273 = vst [vmem:[#allocation24_spill] sm:$0xff] %v4725_v44  ;;  %1247 = vmin.xlane.f32.xlu1 %v4713_v0  ;;  %v1146_v56 = vmul.f32 2.0, %v3694_v9  ;;  %v1073_v24 = vpop.f32.mrb[31].mxu1  ;;  %v1113_v39 = vmul.f32 2.0, %v913_v15  ;;  %7277 = vst [vmem:[#allocation28_spill] sm:$0xff] %v4786_v17  ;;  %v4788_v9 = vld [vmem:[#allocation2 + $0x8] sm:$0xff] }
 0x1a0   : > { %7274 = vst [vmem:[#allocation25_spill] sm:$0xff] %v4728_v50  ;;  %v1145_v36 = vmul.f32 2.0, %v1073_v24  ;;  %v4739_v16 = vsub.f32 %v4499_v14, %v1114_v8  ;;  %7278 = vst [vmem:[#allocation29_spill] sm:$0xff] %v4788_v9 }
 0x1a1   : > { %v4742_v23 = vsub.f32 %v4499_v14, %v1146_v56  ;;  %v4745_v6 = vsub.f32 %v4499_v14, %v1113_v39 }
 0x1a2   : > { %v4748_v18 = vsub.f32 %v4499_v14, %v1145_v36  ;;  %1309 = vmin.xlane.f32.xlu0 %v4736_v5  ;;  %v6966_v14 = vlaneseq }
 0x1a3   : > { %7275 = vst [vmem:[#allocation26_spill] sm:$0xff] %v4745_v6  ;;  %1311 = vmin.xlane.f32.xlu1 %v4733_v13 }
 0x1a4   : > { %7276 = vst [vmem:[#allocation27_spill] sm:$0xff] %v4748_v18  ;;  %v1346_v36 = vand.u32 127, %v6966_v14 }
 0x1a6   : > { %1249 = vmin.xlane.f32.xlu0 %v4602_v37  ;;  %v4790_v8 = vadd.s32 %v1348_v19, %v1346_v36  ;;  %v4814_v36 = vld [vmem:[#allocation2] sm:$0xff]  ;;  %v4816_v19 = vld [vmem:[#allocation2 + $0x18] sm:$0xff] }
 0x1a7   : > { %1251 = vmin.xlane.f32.xlu1 %v4590_v32  ;;  %7281 = vst [vmem:[#allocation32_spill] sm:$0xff] %v4814_v36  ;;  %7282 = vst [vmem:[#allocation33_spill] sm:$0xff] %v4816_v19 }
 0x1aa   : > { %1313 = vmin.xlane.f32.xlu0 %v4605_v40 }
 0x1ab   : > { %1315 = vmin.xlane.f32.xlu1 %v4593_v33 }
 0x1ae   : > { %1253 = vmin.xlane.f32.xlu0 %v4617_v2 }
 0x1af   : > { %1255 = vmin.xlane.f32.xlu1 %v4610_v54 }
 0x1b2   : > { %1317 = vmin.xlane.f32.xlu0 %v4620_v61 }
 0x1b3   : > { %1319 = vmin.xlane.f32.xlu1 %v4613_v57 }
 0x1b6   : > { %1257 = vmin.xlane.f32.xlu0 %v4643_v31 }
 0x1b7   : > { %1259 = vmin.xlane.f32.xlu1 %v4631_v25 }
 0x1ba   : > { %1321 = vmin.xlane.f32.xlu0 %v4646_v41 }
 0x1bb   : > { %1323 = vmin.xlane.f32.xlu1 %v4634_v26 }
 0x1be   : > { %1261 = vmin.xlane.f32.xlu0 %v4661_v63 }
 0x1bf   : > { %1263 = vmin.xlane.f32.xlu1 %v4653_v1 }
 0x1c2   : > { %1325 = vmin.xlane.f32.xlu0 %v4664_v62 }
 0x1c3   : > { %1327 = vmin.xlane.f32.xlu1 %v4656_v55 }
 0x1c6   : > { %1265 = vmin.xlane.f32.xlu0 %v4687_v45 }
 0x1c7   : > { %1267 = vmin.xlane.f32.xlu1 %v4675_v48 }
 0x1ca   : > { %1329 = vmin.xlane.f32.xlu0 %v4690_v58 }
 0x1cb   : > { %1331 = vmin.xlane.f32.xlu1 %v4678_v49 }
 0x1ce   : > { %1269 = vmin.xlane.f32.xlu0 %v4705_v7 }
 0x1cf   : > { %1271 = vmin.xlane.f32.xlu1 %v4697_v28 }
 0x1d2   : > { %1333 = vmin.xlane.f32.xlu0 %v4708_v53 }
 0x1d3   : > { %1335 = vmin.xlane.f32.xlu1 %v4700_v47 }
 0x1d6   : > { %1273 = vmin.xlane.f32.xlu0 %v4725_v44  ;;  %v4933_v44 = vld [vmem:[#allocation2 + $0x28] sm:$0xff] }
 0x1d7   : > { %1275 = vmin.xlane.f32.xlu1 %v4719_v42  ;;  %7297 = vst [vmem:[#allocation48_spill] sm:$0xff] %v4933_v44 }
 0x1da   : > { %1337 = vmin.xlane.f32.xlu0 %v4728_v50  ;;  %v4852_v50 = vld [vmem:[#allocation2 + $0x118] sm:$0xff] }
 0x1db   : > { %1339 = vmin.xlane.f32.xlu1 %v4722_v10  ;;  %7286 = vst [vmem:[#allocation37_spill] sm:$0xff] %v4852_v50 }
 0x1de   : > { %1277 = vmin.xlane.f32.xlu0 %v4745_v6  ;;  %v4850_v6 = vld [vmem:[#allocation2 + $0x100] sm:$0xff] }
 0x1df   : > { %1279 = vmin.xlane.f32.xlu1 %v4739_v16  ;;  %7285 = vst [vmem:[#allocation36_spill] sm:$0xff] %v4850_v6 }
 0x1e2   : > { %1341 = vmin.xlane.f32.xlu0 %v4748_v18 }
 0x1e3   : > { %1343 = vmin.xlane.f32.xlu1 %v4742_v23 }
 0x1f3   : > { %v4794_v56 = vpop.xlane.xlu0 %1219 }
 0x1f4   : > { %v4792_v15 = vpop.xlane.xlu1 %1283  ;;  %7280 = vst [vmem:[#allocation31_spill] sm:$0xff] %v4794_v56  ;;  %vm2439_vm4 = vcmp.lt.f32.partialorder %v4794_v56, %v4788_v9  ;;  %vm1351_vm6 = vcmp.eq.f32.partialorder %v4505_v21, %v4794_v56 }
 0x1f5   : > { %7279 = vst [vmem:[#allocation30_spill] sm:$0xff] %v4792_v15  ;;  %vm2471_vm3 = vcmp.lt.f32.partialorder %v4792_v15, %v4786_v17  ;;  %vm1383_vm5 = vcmp.eq.f32.partialorder %v4502_v20, %v4792_v15  ;;  %v2503_v39 = vsel %vm2439_vm4, %v4794_v56, %v4788_v9  ;;  %v4822_v21 = vsel %vm1351_vm6, %v4790_v8, 1073741824 }
 0x1f6   : > { %v2535_v24 = vsel %vm2471_vm3, %v4792_v15, %v4786_v17  ;;  %v4819_v20 = vsel %vm1383_vm5, %v4790_v8, 1073741824  ;;  %2568 = vst.msk [vmem:[#allocation2 + $0x8] sm:$0xff] %vm2566_vm2, %v2503_v39  ;;  %v1493_v17 = vshra.s32 %v4822_v21, 16 }
 0x1f7   : > { %2600 = vst.msk [vmem:[#allocation2 + $0x108] sm:$0xff] %vm2566_vm2, %v2535_v24  ;;  %v1941_v14 = vshra.s32 %v4819_v20, 16  ;;  %v4828_v15 = vpop.xlane.xlu0 %1217 }
 0x1f8   : > { %7283 = vst [vmem:[#allocation34_spill] sm:$0xff] %v4828_v15  ;;  %v4830_v9 = vpop.xlane.xlu1 %1223  ;;  %vm2438_vm7 = vcmp.lt.f32.partialorder %v4828_v15, %v4814_v36  ;;  %v4838_v18 = vcvt.s32.f32 %v1493_v17  ;;  %vm1350_vm9 = vcmp.eq.f32.partialorder %v4510_v29, %v4828_v15 }
 0x1f9   : > { %7284 = vst [vmem:[#allocation35_spill] sm:$0xff] %v4830_v9  ;;  %vm2441_vm8 = vcmp.lt.f32.partialorder %v4830_v9, %v4816_v19  ;;  %v4836_v56 = vcvt.s32.f32 %v1941_v14  ;;  %v2502_v24 = vsel %vm2438_vm7, %v4828_v15, %v4814_v36  ;;  %vm1353_vm10 = vcmp.eq.f32.partialorder %v4513_v30, %v4830_v9 }
 0x1fa   : > { %v2505_v39 = vsel %vm2441_vm8, %v4830_v9, %v4816_v19  ;;  %2567 = vst.msk [vmem:[#allocation2] sm:$0xff] %vm2566_vm2, %v2502_v24  ;;  %1496 = vmin.xlane.f32.xlu0 %v4838_v18  ;;  %v4863_v14 = vsel %vm1350_vm9, %v4790_v8, 1073741824  ;;  %v4871_v36 = vsel %vm1353_vm10, %v4790_v8, 1073741824  ;;  %v4893_v9 = vld [vmem:[#allocation2 + $0x110] sm:$0xff] }
 0x1fb   : > { %2570 = vst.msk [vmem:[#allocation2 + $0x18] sm:$0xff] %vm2566_vm2, %v2505_v39  ;;  %1944 = vmin.xlane.f32.xlu1 %v4836_v56  ;;  %v4865_v17 = vpop.xlane.xlu0 %1281  ;;  %v1479_v29 = vshra.s32 %v4863_v14, 16  ;;  %7289 = vst [vmem:[#allocation40_spill] sm:$0xff] %v4893_v9  ;;  %v1521_v15 = vshra.s32 %v4871_v36, 16 }
 0x1fc   : > { %7287 = vst [vmem:[#allocation38_spill] sm:$0xff] %v4865_v17  ;;  %v4867_v19 = vpop.xlane.xlu1 %1287  ;;  %vm7007_vm11 = vcmp.lt.f32.partialorder %v4865_v17, %v4850_v6  ;;  %vm1382_vm14 = vcmp.eq.f32.partialorder %v4521_v38, %v4865_v17 }
 0x1fd   : > { %7288 = vst [vmem:[#allocation39_spill] sm:$0xff] %v4867_v19  ;;  %vm2473_vm12 = vcmp.lt.f32.partialorder %v4867_v19, %v4852_v50  ;;  %vm1385_vm13 = vcmp.eq.f32.partialorder %v4518_v34, %v4867_v19  ;;  %v2534_v30 = vsel %vm7007_vm11, %v4865_v17, %v4850_v6  ;;  %v4891_v39 = vcvt.s32.f32 %v1479_v29  ;;  %v4895_v34 = vld [vmem:[#allocation2 + $0x10] sm:$0xff] }
 0x1fe   : > { %v2537_v24 = vsel %vm2473_vm12, %v4867_v19, %v4852_v50  ;;  %7290 = vst [vmem:[#allocation41_spill] sm:$0xff] %v4895_v34  ;;  %v4898_v38 = vsel %vm1385_vm13, %v4790_v8, 1073741824  ;;  %2599 = vst.msk [vmem:[#allocation2 + $0x100] sm:$0xff] %vm2566_vm2, %v2534_v30  ;;  %v4904_v17 = vsel %vm1382_vm14, %v4790_v8, 1073741824 }
 0x1ff   : > { %7291 = vst [vmem:[#allocation42_spill] sm:$0xff] %v4898_v38  ;;  %2602 = vst.msk [vmem:[#allocation2 + $0x118] sm:$0xff] %vm2566_vm2, %v2537_v24  ;;  %v1969_v6 = vshra.s32 %v4898_v38, 16  ;;  %1482 = vmin.xlane.f32.xlu0 %v4891_v39  ;;  %v4907_v29 = vpop.xlane.xlu0 %1285  ;;  %v1927_v19 = vshra.s32 %v4904_v17, 16 }
 0x200   : > { %7292 = vst [vmem:[#allocation43_spill] sm:$0xff] %v4904_v17  ;;  %7293 = vst [vmem:[#allocation44_spill] sm:$0xff] %v4907_v29  ;;  %v4909_v50 = vpop.xlane.xlu1 %1221  ;;  %vm7006_vm15 = vcmp.lt.f32.partialorder %v4907_v29, %v4893_v9  ;;  %vm1384_vm5 = vcmp.eq.f32.partialorder %v4526_v43, %v4907_v29  ;;  %v4967_v43 = vld [vmem:[#allocation2 + $0x128] sm:$0xff] }
 0x201   : > { %7294 = vst [vmem:[#allocation45_spill] sm:$0xff] %v4909_v50  ;;  %vm2440_vm0 = vcmp.lt.f32.partialorder %v4909_v50, %v4895_v34  ;;  %v4917_v30 = vcvt.s32.f32 %v1969_v6  ;;  %vm1352_vm1 = vcmp.eq.f32.partialorder %v4529_v46, %v4909_v50  ;;  %v2536_v24 = vsel %vm7006_vm15, %v4907_v29, %v4893_v9  ;;  %v4935_v6 = vld [vmem:[#allocation2 + $0x20] sm:$0xff]  ;;  %7302 = vst [vmem:[#allocation53_spill] sm:$0xff] %v4967_v43 }
 0x202   : > { %v2504_v17 = vsel %vm2440_vm0, %v4909_v50, %v4895_v34  ;;  %v4931_v38 = vcvt.s32.f32 %v1927_v19  ;;  %7298 = vst [vmem:[#allocation49_spill] sm:$0xff] %v4935_v6  ;;  %v4938_v46 = vsel %vm1352_vm1, %v4790_v8, 1073741824  ;;  %2601 = vst.msk [vmem:[#allocation2 + $0x110] sm:$0xff] %vm2566_vm2, %v2536_v24  ;;  %v4965_v50 = vcvt.s32.f32 %v1521_v15  ;;  %v4969_v29 = vld [vmem:[#allocation2 + $0x120] sm:$0xff] }
 0x203   : > { %7295 = vst [vmem:[#allocation46_spill] sm:$0xff] %v4917_v30  ;;  %7299 = vst [vmem:[#allocation50_spill] sm:$0xff] %v4938_v46  ;;  %1972 = vmin.xlane.f32.xlu1 %v4917_v30  ;;  %v4946_v34 = vpop.xlane.xlu0 %1225  ;;  %v1507_v19 = vshra.s32 %v4938_v46, 16 }
 0x204   : > { %7296 = vst [vmem:[#allocation47_spill] sm:$0xff] %v4931_v38  ;;  %2569 = vst.msk [vmem:[#allocation2 + $0x10] sm:$0xff] %vm2566_vm2, %v2504_v17  ;;  %1930 = vmin.xlane.f32.xlu0 %v4931_v38  ;;  %v4944_v9 = vpop.xlane.xlu1 %1227  ;;  %vm2442_vm9 = vcmp.lt.f32.partialorder %v4946_v34, %v4935_v6 }
 0x205   : > { %7300 = vst [vmem:[#allocation51_spill] sm:$0xff] %v4944_v9  ;;  %7301 = vst [vmem:[#allocation52_spill] sm:$0xff] %v4946_v34  ;;  %vm2443_vm6 = vcmp.lt.f32.partialorder %v4944_v9, %v4933_v44  ;;  %v2506_v24 = vsel %vm2442_vm9, %v4946_v34, %v4935_v6  ;;  %vm1355_vm10 = vcmp.eq.f32.partialorder %v4534_v51, %v4944_v9  ;;  %v4983_v6 = vcvt.s32.f32 %v1507_v19 }
 0x206   : > { %v2507_v17 = vsel %vm2443_vm6, %v4944_v9, %v4933_v44  ;;  %7303 = vst [vmem:[#allocation54_spill] sm:$0xff] %v4969_v29  ;;  %2571 = vst.msk [vmem:[#allocation2 + $0x20] sm:$0xff] %vm2566_vm2, %v2506_v24  ;;  %v4976_v44 = vsel %vm1384_vm5, %v4790_v8, 1073741824  ;;  %v4992_v51 = vsel %vm1355_vm10, %v4790_v8, 1073741824  ;;  %v5004_v24 = vld [vmem:[#allocation2 + $0x38] sm:$0xff]  ;;  %v5006_v9 = vld [vmem:[#allocation2 + $0x30] sm:$0xff]  ;;  %vm1354_vm5 = vcmp.eq.f32.partialorder %v4537_v52, %v4946_v34 }
 0x207   : > { %2572 = vst.msk [vmem:[#allocation2 + $0x28] sm:$0xff] %vm2566_vm2, %v2507_v17  ;;  %7304 = vst [vmem:[#allocation55_spill] sm:$0xff] %v4976_v44  ;;  %v4981_v15 = vpop.xlane.xlu0 %1289  ;;  %v1955_v46 = vshra.s32 %v4976_v44, 16  ;;  %v1549_v30 = vshra.s32 %v4992_v51, 16  ;;  %v5041_v44 = vld [vmem:[#allocation2 + $0x138] sm:$0xff] }
 0x208   : > { %1524 = vmin.xlane.f32.xlu0 %v4965_v50  ;;  %v4979_v38 = vpop.xlane.xlu1 %1291  ;;  %7306 = vst [vmem:[#allocation57_spill] sm:$0xff] %v4981_v15  ;;  %vm7002_vm14 = vcmp.lt.f32.partialorder %v4981_v15, %v4969_v29  ;;  %7307 = vst [vmem:[#allocation58_spill] sm:$0xff] %v5004_v24 }
 0x209   : > { %7305 = vst [vmem:[#allocation56_spill] sm:$0xff] %v4979_v38  ;;  %vm2475_vm13 = vcmp.lt.f32.partialorder %v4979_v38, %v4967_v43  ;;  %vm1387_vm1 = vcmp.eq.f32.partialorder %v4544_v59, %v4979_v38  ;;  %v2538_v19 = vsel %vm7002_vm14, %v4981_v15, %v4969_v29  ;;  %7308 = vst [vmem:[#allocation59_spill] sm:$0xff] %v5006_v9  ;;  %v5039_v34 = vcvt.s32.f32 %v1955_v46 }
 0x20a   : > { %v2539_v17 = vsel %vm2475_vm13, %v4979_v38, %v4967_v43  ;;  %v5009_v59 = vsel %vm1387_vm1, %v4790_v8, 1073741824  ;;  %2603 = vst.msk [vmem:[#allocation2 + $0x120] sm:$0xff] %vm2566_vm2, %v2538_v19  ;;  %7314 = vst [vmem:[#allocation65_spill] sm:$0xff] %v5041_v44  ;;  %vm1386_vm14 = vcmp.eq.f32.partialorder %v4547_v60, %v4981_v15  ;;  %v5081_v15 = vld [vmem:[#allocation2 + $0x40] sm:$0xff] }
 0x20b   : > { %7309 = vst [vmem:[#allocation60_spill] sm:$0xff] %v5009_v59  ;;  %2604 = vst.msk [vmem:[#allocation2 + $0x128] sm:$0xff] %vm2566_vm2, %v2539_v17  ;;  %v1997_v43 = vshra.s32 %v5009_v59, 16  ;;  %v5018_v29 = vpop.xlane.xlu0 %1229  ;;  %v5043_v59 = vld [vmem:[#allocation2 + $0x130] sm:$0xff]  ;;  %v5067_v60 = vsel %vm1386_vm14, %v4790_v8, 1073741824 }
 0x20c   : > { %1510 = vmin.xlane.f32.xlu0 %v4983_v6  ;;  %v5016_v38 = vpop.xlane.xlu1 %1231  ;;  %7311 = vst [vmem:[#allocation62_spill] sm:$0xff] %v5018_v29  ;;  %vm7005_vm1 = vcmp.lt.f32.partialorder %v5018_v29, %v5006_v9  ;;  %7313 = vst [vmem:[#allocation64_spill] sm:$0xff] %v5039_v34 }
 0x20d   : > { %7310 = vst [vmem:[#allocation61_spill] sm:$0xff] %v5016_v38  ;;  %vm2445_vm10 = vcmp.lt.f32.partialorder %v5016_v38, %v5004_v24  ;;  %v5027_v17 = vcvt.s32.f32 %v1997_v43  ;;  %v2508_v52 = vsel %vm7005_vm1, %v5018_v29, %v5006_v9  ;;  %7315 = vst [vmem:[#allocation66_spill] sm:$0xff] %v5043_v59  ;;  %v5051_v43 = vsel %vm1354_vm5, %v4790_v8, 1073741824 }
 0x20e   : > { %v2509_v19 = vsel %vm2445_vm10, %v5016_v38, %v5004_v24  ;;  %2573 = vst.msk [vmem:[#allocation2 + $0x30] sm:$0xff] %vm2566_vm2, %v2508_v52  ;;  %7316 = vst [vmem:[#allocation67_spill] sm:$0xff] %v5051_v43  ;;  %v5058_v24 = vcvt.s32.f32 %v1549_v30  ;;  %v5079_v52 = vld [vmem:[#allocation2 + $0x48] sm:$0xff]  ;;  %vm1357_vm14 = vcmp.eq.f32.partialorder %v4556_v3, %v5016_v38 }
 0x20f   : > { %7312 = vst [vmem:[#allocation63_spill] sm:$0xff] %v5027_v17  ;;  %2574 = vst.msk [vmem:[#allocation2 + $0x38] sm:$0xff] %vm2566_vm2, %v2509_v19  ;;  %2000 = vmin.xlane.f32.xlu1 %v5027_v17  ;;  %v5056_v9 = vpop.xlane.xlu0 %1293  ;;  %v1983_v17 = vshra.s32 %v5067_v60, 16 }
 0x210   : > { %1958 = vmin.xlane.f32.xlu0 %v5039_v34  ;;  %v5054_v46 = vpop.xlane.xlu1 %1295  ;;  %7318 = vst [vmem:[#allocation69_spill] sm:$0xff] %v5056_v9  ;;  %vm7014_vm15 = vcmp.lt.f32.partialorder %v5056_v9, %v5043_v59  ;;  %7319 = vst [vmem:[#allocation70_spill] sm:$0xff] %v5067_v60  ;;  %v1535_v34 = vshra.s32 %v5051_v43, 16  ;;  %v5118_v60 = vld [vmem:[#allocation2 + $0x148] sm:$0xff] }
 0x211   : > { %7317 = vst [vmem:[#allocation68_spill] sm:$0xff] %v5054_v46  ;;  %vm7090_vm1 = vcmp.lt.f32.partialorder %v5054_v46, %v5041_v44  ;;  %vm1389_vm11 = vcmp.eq.f32.partialorder %v4572_v11, %v5054_v46  ;;  %v2540_v30 = vsel %vm7014_vm15, %v5056_v9, %v5043_v59  ;;  %7320 = vst [vmem:[#allocation71_spill] sm:$0xff] %v5079_v52 }
 0x212   : > { %v2541_v19 = vsel %vm7090_vm1, %v5054_v46, %v5041_v44  ;;  %7321 = vst [vmem:[#allocation72_spill] sm:$0xff] %v5081_v15  ;;  %v5084_v11 = vsel %vm1389_vm11, %v4790_v8, 1073741824  ;;  %2605 = vst.msk [vmem:[#allocation2 + $0x130] sm:$0xff] %vm2566_vm2, %v2540_v30  ;;  %vm1356_vm15 = vcmp.eq.f32.partialorder %v4559_v4, %v5018_v29  ;;  %v5116_v38 = vcvt.s32.f32 %v1535_v34 }
 0x213   : > { %7322 = vst [vmem:[#allocation73_spill] sm:$0xff] %v5084_v11  ;;  %2606 = vst.msk [vmem:[#allocation2 + $0x138] sm:$0xff] %vm2566_vm2, %v2541_v19  ;;  %v2025_v44 = vshra.s32 %v5084_v11, 16  ;;  %v5095_v46 = vpop.xlane.xlu0 %1233  ;;  %v5123_v4 = vsel %vm1357_vm14, %v4790_v8, 1073741824  ;;  %v5133_v34 = vcvt.s32.f32 %v1983_v17  ;;  %v5136_v29 = vsel %vm1356_vm15, %v4790_v8, 1073741824  ;;  %v5157_v11 = vld [vmem:[#allocation2 + $0x50] sm:$0xff] }
 0x214   : > { %1552 = vmin.xlane.f32.xlu0 %v5058_v24  ;;  %v5093_v59 = vpop.xlane.xlu1 %1235  ;;  %7324 = vst [vmem:[#allocation75_spill] sm:$0xff] %v5095_v46  ;;  %vm7020_vm5 = vcmp.lt.f32.partialorder %v5095_v46, %v5081_v15  ;;  %7326 = vst [vmem:[#allocation77_spill] sm:$0xff] %v5116_v38  ;;  %vm1388_vm15 = vcmp.eq.f32.partialorder %v4575_v12, %v5056_v9 }
 0x215   : > { %7323 = vst [vmem:[#allocation74_spill] sm:$0xff] %v5093_v59  ;;  %vm7021_vm11 = vcmp.lt.f32.partialorder %v5093_v59, %v5079_v52  ;;  %v5102_v19 = vcvt.s32.f32 %v2025_v44  ;;  %v2510_v30 = vsel %vm7020_vm5, %v5095_v46, %v5081_v15  ;;  %7327 = vst [vmem:[#allocation78_spill] sm:$0xff] %v5118_v60  ;;  %v5120_v44 = vld [vmem:[#allocation2 + $0x140] sm:$0xff] }
 0x216   : > { %v2511_v3 = vsel %vm7021_vm11, %v5093_v59, %v5079_v52  ;;  %7328 = vst [vmem:[#allocation79_spill] sm:$0xff] %v5120_v44  ;;  %7329 = vst [vmem:[#allocation80_spill] sm:$0xff] %v5123_v4 }
 0x217   : > { %7325 = vst [vmem:[#allocation76_spill] sm:$0xff] %v5102_v19  ;;  %2576 = vst.msk [vmem:[#allocation2 + $0x48] sm:$0xff] %vm2566_vm2, %v2511_v3  ;;  %2028 = vmin.xlane.f32.xlu1 %v5102_v19  ;;  %v5131_v15 = vpop.xlane.xlu0 %1297  ;;  %v1577_v3 = vshra.s32 %v5123_v4, 16  ;;  %v5155_v19 = vld [vmem:[#allocation2 + $0x58] sm:$0xff]  ;;  %v1563_v4 = vshra.s32 %v5136_v29, 16 }
 0x218   : > { %2575 = vst.msk [vmem:[#allocation2 + $0x40] sm:$0xff] %vm2566_vm2, %v2510_v30  ;;  %1538 = vmin.xlane.f32.xlu0 %v5116_v38  ;;  %v5129_v52 = vpop.xlane.xlu1 %1299  ;;  %7331 = vst [vmem:[#allocation82_spill] sm:$0xff] %v5131_v15  ;;  %vm7028_vm5 = vcmp.lt.f32.partialorder %v5131_v15, %v5120_v44 }
 0x219   : > { %7330 = vst [vmem:[#allocation81_spill] sm:$0xff] %v5129_v52  ;;  %7332 = vst [vmem:[#allocation83_spill] sm:$0xff] %v5133_v34  ;;  %vm7037_vm14 = vcmp.lt.f32.partialorder %v5129_v52, %v5118_v60  ;;  %vm1391_vm11 = vcmp.eq.f32.partialorder %v4596_v35, %v5129_v52  ;;  %v2542_v30 = vsel %vm7028_vm5, %v5131_v15, %v5120_v44 }
 0x21a   : > { %7333 = vst [vmem:[#allocation84_spill] sm:$0xff] %v5136_v29  ;;  %v2543_v17 = vsel %vm7037_vm14, %v5129_v52, %v5118_v60  ;;  %7334 = vst [vmem:[#allocation85_spill] sm:$0xff] %v5155_v19  ;;  %v5160_v35 = vsel %vm1391_vm11, %v4790_v8, 1073741824 }
 0x21b   : > { %7335 = vst [vmem:[#allocation86_spill] sm:$0xff] %v5157_v11  ;;  %7336 = vst [vmem:[#allocation87_spill] sm:$0xff] %v5160_v35  ;;  %v2053_v60 = vshra.s32 %v5160_v35, 16  ;;  %v5170_v44 = vpop.xlane.xlu0 %1237  ;;  %v5192_v35 = vcvt.s32.f32 %v1577_v3  ;;  %v5208_v3 = vcvt.s32.f32 %v1563_v4 }
 0x21c   : > { %2608 = vst.msk [vmem:[#allocation2 + $0x148] sm:$0xff] %vm2566_vm2, %v2543_v17  ;;  %2607 = vst.msk [vmem:[#allocation2 + $0x140] sm:$0xff] %vm2566_vm2, %v2542_v30  ;;  %1986 = vmin.xlane.f32.xlu0 %v5133_v34  ;;  %v5168_v52 = vpop.xlane.xlu1 %1239  ;;  %vm7035_vm5 = vcmp.lt.f32.partialorder %v5170_v44, %v5157_v11  ;;  %v5180_v17 = vsel %vm1388_vm15, %v4790_v8, 1073741824  ;;  %v5194_v34 = vld [vmem:[#allocation2 + $0x158] sm:$0xff]  ;;  %vm1359_vm15 = vcmp.eq.f32.partialorder %v4584_v22, %v5093_v59  ;;  %v5232_v59 = vld [vmem:[#allocation2 + $0x60] sm:$0xff] }
 0x21d   : > { %7337 = vst [vmem:[#allocation88_spill] sm:$0xff] %v5168_v52  ;;  %7338 = vst [vmem:[#allocation89_spill] sm:$0xff] %v5170_v44  ;;  %vm7036_vm11 = vcmp.lt.f32.partialorder %v5168_v52, %v5155_v19  ;;  %v5177_v12 = vcvt.s32.f32 %v2053_v60  ;;  %v2512_v9 = vsel %vm7035_vm5, %v5170_v44, %v5157_v11  ;;  %v5196_v60 = vld [vmem:[#allocation2 + $0x150] sm:$0xff]  ;;  %v2011_v29 = vshra.s32 %v5180_v17, 16 }
 0x21e   : > { %7340 = vst [vmem:[#allocation91_spill] sm:$0xff] %v5180_v17  ;;  %v2513_v30 = vsel %vm7036_vm11, %v5168_v52, %v5155_v19  ;;  %7341 = vst [vmem:[#allocation92_spill] sm:$0xff] %v5192_v35  ;;  %v5218_v22 = vsel %vm1359_vm15, %v4790_v8, 1073741824 }
 0x21f   : > { %7339 = vst [vmem:[#allocation90_spill] sm:$0xff] %v5177_v12  ;;  %7342 = vst [vmem:[#allocation93_spill] sm:$0xff] %v5194_v34  ;;  %2056 = vmin.xlane.f32.xlu1 %v5177_v12  ;;  %v5206_v11 = vpop.xlane.xlu0 %1301  ;;  %v7351_v12 = vld [vmem:[#allocation14_spill] sm:$0xff]  ;;  %v1605_v17 = vshra.s32 %v5218_v22, 16 }
 0x220   : > { %7343 = vst [vmem:[#allocation94_spill] sm:$0xff] %v5196_v60  ;;  %2578 = vst.msk [vmem:[#allocation2 + $0x58] sm:$0xff] %vm2566_vm2, %v2513_v30  ;;  %1580 = vmin.xlane.f32.xlu0 %v5192_v35  ;;  %v5204_v19 = vpop.xlane.xlu1 %1303  ;;  %vm7044_vm11 = vcmp.lt.f32.partialorder %v5206_v11, %v5196_v60  ;;  %v5230_v30 = vld [vmem:[#allocation2 + $0x68] sm:$0xff]  ;;  %vm1358_vm15 = vcmp.eq.f32.partialorder %v7351_v12, %v5095_v46  ;;  %v5252_v12 = vcvt.s32.f32 %v2011_v29  ;;  %v5271_v29 = vld [vmem:[#allocation2 + $0x160] sm:$0xff] }
 0x221   : > { %2577 = vst.msk [vmem:[#allocation2 + $0x50] sm:$0xff] %vm2566_vm2, %v2512_v9  ;;  %7344 = vst [vmem:[#allocation95_spill] sm:$0xff] %v5204_v19  ;;  %vm7054_vm5 = vcmp.lt.f32.partialorder %v5204_v19, %v5194_v34  ;;  %vm1393_vm14 = vcmp.eq.f32.partialorder %v4637_v27, %v5204_v19  ;;  %v2544_v4 = vsel %vm7044_vm11, %v5206_v11, %v5196_v60 }
 0x222   : > { %7345 = vst [vmem:[#allocation96_spill] sm:$0xff] %v5206_v11  ;;  %7346 = vst [vmem:[#allocation97_spill] sm:$0xff] %v5208_v3  ;;  %v2545_v9 = vsel %vm7054_vm5, %v5204_v19, %v5194_v34  ;;  %v5235_v27 = vsel %vm1393_vm14, %v4790_v8, 1073741824 }
 0x223   : > { %7347 = vst [vmem:[#allocation98_spill] sm:$0xff] %v5218_v22  ;;  %7348 = vst [vmem:[#allocation99_spill] sm:$0xff] %v5230_v30  ;;  %v2081_v34 = vshra.s32 %v5235_v27, 16  ;;  %v5245_v60 = vpop.xlane.xlu0 %1241  ;;  %v5269_v22 = vld [vmem:[#allocation2 + $0x168] sm:$0xff] }
 0x224   : > { %7349 = vst [vmem:[#allocation100_spill] sm:$0xff] %v5232_v59  ;;  %7350 = vst [vmem:[#allocation101_spill] sm:$0xff] %v5235_v27  ;;  %1566 = vmin.xlane.f32.xlu0 %v5208_v3  ;;  %v5243_v19 = vpop.xlane.xlu1 %1243  ;;  %vm7052_vm11 = vcmp.lt.f32.partialorder %v5245_v60, %v5232_v59  ;;  %v7359_v3 = vld [vmem:[#allocation15_spill] sm:$0xff] }
 0x225   : > { %2610 = vst.msk [vmem:[#allocation2 + $0x158] sm:$0xff] %vm2566_vm2, %v2545_v9  ;;  %2609 = vst.msk [vmem:[#allocation2 + $0x150] sm:$0xff] %vm2566_vm2, %v2544_v4  ;;  %vm7053_vm14 = vcmp.lt.f32.partialorder %v5243_v19, %v5230_v30  ;;  %v5255_v9 = vsel %vm1358_vm15, %v4790_v8, 1073741824  ;;  %v2514_v46 = vsel %vm7052_vm11, %v5245_v60, %v5232_v59  ;;  %v5267_v27 = vcvt.s32.f32 %v2081_v34 }
 0x226   : > { %7352 = vst [vmem:[#allocation14_spill] sm:$0xff] %v5243_v19  ;;  %7353 = vst [vmem:[#allocation102_spill] sm:$0xff] %v5245_v60  ;;  %v2515_v4 = vsel %vm7053_vm14, %v5243_v19, %v5230_v30  ;;  %vm1390_vm15 = vcmp.eq.f32.partialorder %v7359_v3, %v5131_v15  ;;  %v5283_v34 = vcvt.s32.f32 %v1605_v17  ;;  %v1591_v35 = vshra.s32 %v5255_v9, 16  ;;  %v5305_v15 = vld [vmem:[#allocation2 + $0x78] sm:$0xff] }
 0x227   : > { %7354 = vst [vmem:[#allocation103_spill] sm:$0xff] %v5252_v12  ;;  %7355 = vst [vmem:[#allocation104_spill] sm:$0xff] %v5255_v9  ;;  %2084 = vmin.xlane.f32.xlu1 %v5267_v27  ;;  %v5281_v59 = vpop.xlane.xlu0 %1305  ;;  %v5293_v3 = vsel %vm1390_vm15, %v4790_v8, 1073741824  ;;  %v7368_v9 = vld [vmem:[#allocation16_spill] sm:$0xff] }
 0x228   : > { %7356 = vst [vmem:[#allocation105_spill] sm:$0xff] %v5267_v27  ;;  %7357 = vst [vmem:[#allocation106_spill] sm:$0xff] %v5269_v22  ;;  %2014 = vmin.xlane.f32.xlu0 %v5252_v12  ;;  %v5279_v30 = vpop.xlane.xlu1 %1307  ;;  %vm7062_vm14 = vcmp.lt.f32.partialorder %v5281_v59, %v5271_v29  ;;  %v5307_v27 = vld [vmem:[#allocation2 + $0x70] sm:$0xff]  ;;  %vm1361_vm15 = vcmp.eq.f32.partialorder %v7368_v9, %v5168_v52  ;;  %v5322_v12 = vcvt.s32.f32 %v1591_v35  ;;  %v2039_v9 = vshra.s32 %v5293_v3, 16 }
 0x229   : > { %7358 = vst [vmem:[#allocation107_spill] sm:$0xff] %v5271_v29  ;;  %2580 = vst.msk [vmem:[#allocation2 + $0x68] sm:$0xff] %vm2566_vm2, %v2515_v4  ;;  %vm7071_vm11 = vcmp.lt.f32.partialorder %v5279_v30, %v5269_v22  ;;  %v2546_v4 = vsel %vm7062_vm14, %v5281_v59, %v5271_v29 }
 0x22a   : > { %2579 = vst.msk [vmem:[#allocation2 + $0x60] sm:$0xff] %vm2566_vm2, %v2514_v46  ;;  %7360 = vst [vmem:[#allocation15_spill] sm:$0xff] %v5279_v30  ;;  %v7363_v46 = vld [vmem:[#allocation21_spill] sm:$0xff]  ;;  %v2547_v17 = vsel %vm7071_vm11, %v5279_v30, %v5269_v22 }
 0x22b   : > { %7361 = vst [vmem:[#allocation108_spill] sm:$0xff] %v5281_v59  ;;  %7362 = vst [vmem:[#allocation109_spill] sm:$0xff] %v5283_v34  ;;  %vm1395_vm5 = vcmp.eq.f32.partialorder %v7363_v46, %v5279_v30  ;;  %v5320_v29 = vpop.xlane.xlu0 %1245 }
 0x22c   : > { %7364 = vst [vmem:[#allocation21_spill] sm:$0xff] %v5293_v3  ;;  %7365 = vst [vmem:[#allocation110_spill] sm:$0xff] %v5305_v15  ;;  %v5310_v46 = vsel %vm1395_vm5, %v4790_v8, 1073741824  ;;  %1608 = vmin.xlane.f32.xlu0 %v5283_v34  ;;  %v5318_v30 = vpop.xlane.xlu1 %1247  ;;  %vm7069_vm14 = vcmp.lt.f32.partialorder %v5320_v29, %v5307_v27  ;;  %v5346_v3 = vld [vmem:[#allocation2 + $0x170] sm:$0xff]  ;;  %v7376_v34 = vld [vmem:[#allocation17_spill] sm:$0xff] }
 0x22d   : > { %7366 = vst [vmem:[#allocation111_spill] sm:$0xff] %v5307_v27  ;;  %7367 = vst [vmem:[#allocation112_spill] sm:$0xff] %v5310_v46  ;;  %v2109_v22 = vshra.s32 %v5310_v46, 16  ;;  %vm7070_vm5 = vcmp.lt.f32.partialorder %v5318_v30, %v5305_v15  ;;  %v2516_v35 = vsel %vm7069_vm14, %v5320_v29, %v5307_v27  ;;  %v5344_v46 = vld [vmem:[#allocation2 + $0x178] sm:$0xff] }
 0x22e   : > { %2612 = vst.msk [vmem:[#allocation2 + $0x168] sm:$0xff] %vm2566_vm2, %v2547_v17  ;;  %2611 = vst.msk [vmem:[#allocation2 + $0x160] sm:$0xff] %vm2566_vm2, %v2546_v4  ;;  %v5330_v17 = vsel %vm1361_vm15, %v4790_v8, 1073741824  ;;  %v2517_v4 = vsel %vm7070_vm5, %v5318_v30, %v5305_v15  ;;  %vm1360_vm15 = vcmp.eq.f32.partialorder %v7376_v34, %v5170_v44  ;;  %v5378_v44 = vcvt.s32.f32 %v2039_v9 }
 0x22f   : > { %7369 = vst [vmem:[#allocation16_spill] sm:$0xff] %v5318_v30  ;;  %7370 = vst [vmem:[#allocation113_spill] sm:$0xff] %v5320_v29  ;;  %v5342_v52 = vcvt.s32.f32 %v2109_v22  ;;  %v5356_v27 = vpop.xlane.xlu0 %1309  ;;  %v1633_v22 = vshra.s32 %v5330_v17, 16  ;;  %v5366_v34 = vsel %vm1360_vm15, %v4790_v8, 1073741824 }
 0x230   : > { %7371 = vst [vmem:[#allocation114_spill] sm:$0xff] %v5322_v12  ;;  %7372 = vst [vmem:[#allocation115_spill] sm:$0xff] %v5330_v17  ;;  %1594 = vmin.xlane.f32.xlu0 %v5322_v12  ;;  %v5354_v15 = vpop.xlane.xlu1 %1311  ;;  %vm7079_vm5 = vcmp.lt.f32.partialorder %v5356_v27, %v5346_v3  ;;  %v7384_v12 = vld [vmem:[#allocation18_spill] sm:$0xff] }
 0x231   : > { %7373 = vst [vmem:[#allocation116_spill] sm:$0xff] %v5342_v52  ;;  %7374 = vst [vmem:[#allocation117_spill] sm:$0xff] %v5344_v46  ;;  %2112 = vmin.xlane.f32.xlu1 %v5342_v52  ;;  %vm7089_vm14 = vcmp.lt.f32.partialorder %v5354_v15, %v5344_v46  ;;  %vm1397_vm11 = vcmp.eq.f32.partialorder %v4733_v13, %v5354_v15  ;;  %v5380_v52 = vld [vmem:[#allocation2 + $0x88] sm:$0xff]  ;;  %v5382_v13 = vld [vmem:[#allocation2 + $0x80] sm:$0xff]  ;;  %vm1392_vm15 = vcmp.eq.f32.partialorder %v7384_v12, %v5206_v11 }
 0x232   : > { %7375 = vst [vmem:[#allocation118_spill] sm:$0xff] %v5346_v3  ;;  %2582 = vst.msk [vmem:[#allocation2 + $0x78] sm:$0xff] %vm2566_vm2, %v2517_v4  ;;  %v2549_v4 = vsel %vm7089_vm14, %v5354_v15, %v5344_v46  ;;  %v5385_v17 = vsel %vm1397_vm11, %v4790_v8, 1073741824  ;;  %v5402_v38 = vcvt.s32.f32 %v1633_v22  ;;  %v5424_v22 = vsel %vm1392_vm15, %v4790_v8, 1073741824  ;;  %v5457_v11 = vld [vmem:[#allocation2 + $0x98] sm:$0xff] }
 0x233   : > { %2581 = vst.msk [vmem:[#allocation2 + $0x70] sm:$0xff] %vm2566_vm2, %v2516_v35  ;;  %7377 = vst [vmem:[#allocation17_spill] sm:$0xff] %v5354_v15  ;;  %v2548_v35 = vsel %vm7079_vm5, %v5356_v27, %v5346_v3  ;;  %v2137_v46 = vshra.s32 %v5385_v17, 16  ;;  %v5395_v3 = vpop.xlane.xlu0 %1249  ;;  %v1619_v15 = vshra.s32 %v5366_v34, 16 }
 0x234   : > { %7378 = vst [vmem:[#allocation119_spill] sm:$0xff] %v5356_v27  ;;  %7379 = vst [vmem:[#allocation120_spill] sm:$0xff] %v5366_v34  ;;  %2042 = vmin.xlane.f32.xlu0 %v5378_v44  ;;  %v5393_v9 = vpop.xlane.xlu1 %1251  ;;  %vm7086_vm5 = vcmp.lt.f32.partialorder %v5395_v3, %v5382_v13  ;;  %v5416_v34 = vld [vmem:[#allocation2 + $0x188] sm:$0xff] }
 0x235   : > { %7380 = vst [vmem:[#allocation121_spill] sm:$0xff] %v5378_v44  ;;  %7381 = vst [vmem:[#allocation122_spill] sm:$0xff] %v5380_v52  ;;  %vm7085_vm11 = vcmp.lt.f32.partialorder %v5393_v9, %v5380_v52  ;;  %v5418_v44 = vld [vmem:[#allocation2 + $0x180] sm:$0xff]  ;;  %v5438_v12 = vcvt.s32.f32 %v1619_v15 }
 0x236   : > { %7382 = vst [vmem:[#allocation123_spill] sm:$0xff] %v5382_v13  ;;  %7383 = vst [vmem:[#allocation124_spill] sm:$0xff] %v5385_v17  ;;  %v5414_v17 = vcvt.s32.f32 %v2137_v46  ;;  %v7393_v46 = vld [vmem:[#allocation20_spill] sm:$0xff] }
 0x237   : > { %2614 = vst.msk [vmem:[#allocation2 + $0x178] sm:$0xff] %vm2566_vm2, %v2549_v4  ;;  %2613 = vst.msk [vmem:[#allocation2 + $0x170] sm:$0xff] %vm2566_vm2, %v2548_v35  ;;  %v2519_v4 = vsel %vm7085_vm11, %v5393_v9, %v5380_v52  ;;  %v2518_v35 = vsel %vm7086_vm5, %v5395_v3, %v5382_v13  ;;  %v7392_v52 = vld [vmem:[#allocation19_spill] sm:$0xff]  ;;  %vm1362_vm5 = vcmp.eq.f32.partialorder %v7393_v46, %v5245_v60  ;;  %v5436_v43 = vpop.xlane.xlu0 %1313 }
 0x238   : > { %7385 = vst [vmem:[#allocation18_spill] sm:$0xff] %v5393_v9  ;;  %7386 = vst [vmem:[#allocation125_spill] sm:$0xff] %v5395_v3  ;;  %vm1363_vm11 = vcmp.eq.f32.partialorder %v7392_v52, %v5243_v19  ;;  %2140 = vmin.xlane.f32.xlu1 %v5414_v17  ;;  %1636 = vmin.xlane.f32.xlu0 %v5402_v38  ;;  %v5434_v13 = vpop.xlane.xlu1 %1315  ;;  %vm7098_vm14 = vcmp.lt.f32.partialorder %v5436_v43, %v5418_v44  ;;  %v7404_v52 = vld [vmem:[#allocation22_spill] sm:$0xff] }
 0x239   : > { %7387 = vst [vmem:[#allocation126_spill] sm:$0xff] %v5402_v38  ;;  %7388 = vst [vmem:[#allocation127_spill] sm:$0xff] %v5414_v17  ;;  %vm7123_vm15 = vcmp.lt.f32.partialorder %v5434_v13, %v5416_v34  ;;  %vm1399_vm1 = vcmp.eq.f32.partialorder %v4593_v33, %v5434_v13  ;;  %v2550_v15 = vsel %vm7098_vm14, %v5436_v43, %v5418_v44  ;;  %v5459_v17 = vld [vmem:[#allocation2 + $0x90] sm:$0xff]  ;;  %v5482_v38 = vsel %vm1362_vm5, %v4790_v8, 1073741824 }
 0x23a   : > { %7389 = vst [vmem:[#allocation128_spill] sm:$0xff] %v5416_v34  ;;  %7390 = vst [vmem:[#allocation129_spill] sm:$0xff] %v5418_v44  ;;  %v5462_v33 = vsel %vm1399_vm1, %v4790_v8, 1073741824  ;;  %vm1394_vm1 = vcmp.eq.f32.partialorder %v7404_v52, %v5281_v59  ;;  %v7417_v59 = vld [vmem:[#allocation23_spill] sm:$0xff] }
 0x23b   : > { %7391 = vst [vmem:[#allocation130_spill] sm:$0xff] %v5424_v22  ;;  %2584 = vst.msk [vmem:[#allocation2 + $0x88] sm:$0xff] %vm2566_vm2, %v2519_v4  ;;  %v2067_v4 = vshra.s32 %v5424_v22, 16  ;;  %v5468_v22 = vsel %vm1363_vm11, %v4790_v8, 1073741824 }
 0x23c   : > { %2583 = vst.msk [vmem:[#allocation2 + $0x80] sm:$0xff] %vm2566_vm2, %v2518_v35  ;;  %7394 = vst [vmem:[#allocation19_spill] sm:$0xff] %v5434_v13  ;;  %v2551_v35 = vsel %vm7123_vm15, %v5434_v13, %v5416_v34  ;;  %v2165_v34 = vshra.s32 %v5462_v33, 16  ;;  %1622 = vmin.xlane.f32.xlu0 %v5438_v12  ;;  %v5474_v44 = vpop.xlane.xlu1 %1255  ;;  %v5476_v13 = vpop.xlane.xlu0 %1253  ;;  %vm1396_vm15 = vcmp.eq.f32.partialorder %v4736_v5, %v5356_v27  ;;  %v5667_v5 = vld [vmem:[#allocation2 + $0x1b8] sm:$0xff]  ;;  %v5669_v27 = vld [vmem:[#allocation2 + $0x1b0] sm:$0xff] }
 0x23d   : > { %7395 = vst [vmem:[#allocation20_spill] sm:$0xff] %v5436_v43  ;;  %7396 = vst [vmem:[#allocation131_spill] sm:$0xff] %v5438_v12  ;;  %vm7106_vm11 = vcmp.lt.f32.partialorder %v5474_v44, %v5457_v11  ;;  %vm7105_vm14 = vcmp.lt.f32.partialorder %v5476_v13, %v5459_v17  ;;  %v5503_v19 = vcvt.s32.f32 %v2067_v4  ;;  %v5507_v12 = vld [vmem:[#allocation2 + $0x190] sm:$0xff]  ;;  %v5528_v4 = vsel %vm1394_vm1, %v4790_v8, 1073741824 }
 0x23e   : > { %7397 = vst [vmem:[#allocation132_spill] sm:$0xff] %v5457_v11  ;;  %7398 = vst [vmem:[#allocation133_spill] sm:$0xff] %v5459_v17  ;;  %v2520_v46 = vsel %vm7105_vm14, %v5476_v13, %v5459_v17  ;;  %v5501_v60 = vcvt.s32.f32 %v2165_v34  ;;  %v1647_v34 = vshra.s32 %v5482_v38, 16  ;;  %vm1365_vm1 = vcmp.eq.f32.partialorder %v4713_v0, %v5318_v30 }
 0x23f   : > { %7399 = vst [vmem:[#allocation134_spill] sm:$0xff] %v5462_v33  ;;  %7400 = vst [vmem:[#allocation135_spill] sm:$0xff] %v5468_v22  ;;  %v5505_v33 = vld [vmem:[#allocation2 + $0x198] sm:$0xff] }
 0x240   : > { %2616 = vst.msk [vmem:[#allocation2 + $0x188] sm:$0xff] %vm2566_vm2, %v2551_v35  ;;  %2615 = vst.msk [vmem:[#allocation2 + $0x180] sm:$0xff] %vm2566_vm2, %v2550_v15  ;;  %v1661_v35 = vshra.s32 %v5468_v22, 16  ;;  %v2521_v15 = vsel %vm7106_vm11, %v5474_v44, %v5457_v11  ;;  %2168 = vmin.xlane.f32.xlu1 %v5501_v60  ;;  %2070 = vmin.xlane.f32.xlu0 %v5503_v19  ;;  %v5513_v11 = vpop.xlane.xlu1 %1319  ;;  %v5515_v22 = vpop.xlane.xlu0 %1317 }
 0x241   : > { %7401 = vst [vmem:[#allocation136_spill] sm:$0xff] %v5474_v44  ;;  %7402 = vst [vmem:[#allocation137_spill] sm:$0xff] %v5476_v13  ;;  %vm7114_vm5 = vcmp.lt.f32.partialorder %v5513_v11, %v5505_v33  ;;  %vm7113_vm14 = vcmp.lt.f32.partialorder %v5515_v22, %v5507_v12  ;;  %vm1401_vm11 = vcmp.eq.f32.partialorder %v4613_v57, %v5513_v11  ;;  %v5542_v57 = vld [vmem:[#allocation2 + $0xa8] sm:$0xff] }
 0x242   : > { %7403 = vst [vmem:[#allocation138_spill] sm:$0xff] %v5482_v38  ;;  %7405 = vst [vmem:[#allocation22_spill] sm:$0xff] %v5501_v60  ;;  %v5540_v17 = vcvt.s32.f32 %v1661_v35  ;;  %v5544_v60 = vld [vmem:[#allocation2 + $0xa0] sm:$0xff]  ;;  %v5547_v52 = vsel %vm1401_vm11, %v4790_v8, 1073741824  ;;  %vm1364_vm11 = vcmp.eq.f32.partialorder %v7417_v59, %v5320_v29  ;;  %v5580_v38 = vld [vmem:[#allocation2 + $0x1a8] sm:$0xff] }
 0x243   : > { %7406 = vst [vmem:[#allocation139_spill] sm:$0xff] %v5505_v33  ;;  %7407 = vst [vmem:[#allocation140_spill] sm:$0xff] %v5507_v12  ;;  %v5604_v0 = vsel %vm1364_vm11, %v4790_v8, 1073741824 }
 0x244   : > { %2586 = vst.msk [vmem:[#allocation2 + $0x98] sm:$0xff] %vm2566_vm2, %v2521_v15  ;;  %2585 = vst.msk [vmem:[#allocation2 + $0x90] sm:$0xff] %vm2566_vm2, %v2520_v46  ;;  %v2553_v15 = vsel %vm7114_vm5, %v5513_v11, %v5505_v33  ;;  %v2552_v46 = vsel %vm7113_vm14, %v5515_v22, %v5507_v12  ;;  %v2193_v33 = vshra.s32 %v5547_v52, 16  ;;  %1664 = vmin.xlane.f32.xlu0 %v5540_v17  ;;  %v5555_v35 = vpop.xlane.xlu1 %1259  ;;  %v5557_v12 = vpop.xlane.xlu0 %1257 }
 0x245   : > { %7408 = vst [vmem:[#allocation141_spill] sm:$0xff] %v5513_v11  ;;  %7409 = vst [vmem:[#allocation142_spill] sm:$0xff] %v5515_v22  ;;  %v2095_v11 = vshra.s32 %v5528_v4, 16  ;;  %vm7122_vm14 = vcmp.lt.f32.partialorder %v5555_v35, %v5542_v57  ;;  %vm7121_vm5 = vcmp.lt.f32.partialorder %v5557_v12, %v5544_v60 }
 0x246   : > { %7410 = vst [vmem:[#allocation143_spill] sm:$0xff] %v5528_v4  ;;  %7411 = vst [vmem:[#allocation144_spill] sm:$0xff] %v5540_v17  ;;  %v5578_v4 = vcvt.s32.f32 %v2193_v33  ;;  %v5582_v17 = vld [vmem:[#allocation2 + $0x1a0] sm:$0xff] }
 0x247   : > { %7412 = vst [vmem:[#allocation145_spill] sm:$0xff] %v5542_v57  ;;  %7413 = vst [vmem:[#allocation146_spill] sm:$0xff] %v5544_v60 }
 0x248   : > { %7414 = vst [vmem:[#allocation147_spill] sm:$0xff] %v5547_v52  ;;  %2618 = vst.msk [vmem:[#allocation2 + $0x198] sm:$0xff] %vm2566_vm2, %v2553_v15  ;;  %v5566_v15 = vcvt.s32.f32 %v1647_v34  ;;  %v2522_v52 = vsel %vm7121_vm5, %v5557_v12, %v5544_v60  ;;  %v5588_v34 = vsel %vm1365_vm1, %v4790_v8, 1073741824  ;;  %2196 = vmin.xlane.f32.xlu1 %v5578_v4  ;;  %v5594_v33 = vpop.xlane.xlu1 %1323  ;;  %v5596_v60 = vpop.xlane.xlu0 %1321 }
 0x249   : > { %2617 = vst.msk [vmem:[#allocation2 + $0x190] sm:$0xff] %vm2566_vm2, %v2552_v46  ;;  %7415 = vst [vmem:[#allocation148_spill] sm:$0xff] %v5555_v35  ;;  %v2523_v46 = vsel %vm7122_vm14, %v5555_v35, %v5542_v57  ;;  %v5598_v57 = vcvt.s32.f32 %v2095_v11  ;;  %vm7138_vm1 = vcmp.lt.f32.partialorder %v5594_v33, %v5580_v38  ;;  %vm7130_vm5 = vcmp.lt.f32.partialorder %v5596_v60, %v5582_v17 }
 0x24a   : > { %7416 = vst [vmem:[#allocation149_spill] sm:$0xff] %v5557_v12  ;;  %7418 = vst [vmem:[#allocation23_spill] sm:$0xff] %v5578_v4  ;;  %1650 = vmin.xlane.f32.xlu0 %v5566_v15  ;;  %vm1403_vm14 = vcmp.eq.f32.partialorder %v4634_v26, %v5594_v33  ;;  %v2555_v59 = vsel %vm7138_vm1, %v5594_v33, %v5580_v38  ;;  %v2554_v11 = vsel %vm7130_vm5, %v5596_v60, %v5582_v17  ;;  %v5627_v26 = vld [vmem:[#allocation2 + $0xb0] sm:$0xff] }
 0x24b   : > { %7419 = vst [vmem:[#allocation150_spill] sm:$0xff] %v5580_v38  ;;  %7420 = vst [vmem:[#allocation151_spill] sm:$0xff] %v5582_v17  ;;  %v5630_v29 = vsel %vm1403_vm14, %v4790_v8, 1073741824  ;;  %v1675_v17 = vshra.s32 %v5604_v0, 16  ;;  %vm1367_vm5 = vcmp.eq.f32.partialorder %v4590_v32, %v5393_v9  ;;  %vm1366_vm1 = vcmp.eq.f32.partialorder %v4602_v37, %v5395_v3  ;;  %v5708_v32 = vld [vmem:[#allocation2 + $0xc0] sm:$0xff]  ;;  %v5748_v37 = vld [vmem:[#allocation2 + $0x1c8] sm:$0xff] }
 0x24c   : > { %2588 = vst.msk [vmem:[#allocation2 + $0xa8] sm:$0xff] %vm2566_vm2, %v2523_v46  ;;  %2587 = vst.msk [vmem:[#allocation2 + $0xa0] sm:$0xff] %vm2566_vm2, %v2522_v52  ;;  %v1689_v52 = vshra.s32 %v5588_v34, 16  ;;  %v5625_v46 = vld [vmem:[#allocation2 + $0xb8] sm:$0xff]  ;;  %v2221_v30 = vshra.s32 %v5630_v29, 16  ;;  %v5636_v38 = vpop.xlane.xlu1 %1263  ;;  %v5750_v3 = vld [vmem:[#allocation2 + $0x1c0] sm:$0xff] }
 0x24d   : > { %7421 = vst [vmem:[#allocation152_spill] sm:$0xff] %v5594_v33  ;;  %7422 = vst [vmem:[#allocation153_spill] sm:$0xff] %v5596_v60  ;;  %v5638_v33 = vpop.xlane.xlu0 %1261  ;;  %vm7137_vm11 = vcmp.lt.f32.partialorder %v5636_v38, %v5625_v46 }
 0x24e   : > { %7423 = vst [vmem:[#allocation154_spill] sm:$0xff] %v5598_v57  ;;  %7424 = vst [vmem:[#allocation155_spill] sm:$0xff] %v5604_v0  ;;  %2098 = vmin.xlane.f32.xlu0 %v5598_v57  ;;  %vm7136_vm14 = vcmp.lt.f32.partialorder %v5638_v33, %v5627_v26  ;;  %v5645_v4 = vcvt.s32.f32 %v1689_v52  ;;  %v5679_v57 = vcvt.s32.f32 %v1675_v17 }
 0x24f   : > { %7425 = vst [vmem:[#allocation156_spill] sm:$0xff] %v5625_v46  ;;  %7426 = vst [vmem:[#allocation157_spill] sm:$0xff] %v5627_v26  ;;  %v2524_v52 = vsel %vm7136_vm14, %v5638_v33, %v5627_v26 }
 0x250   : > { %7427 = vst [vmem:[#allocation158_spill] sm:$0xff] %v5630_v29  ;;  %2620 = vst.msk [vmem:[#allocation2 + $0x1a8] sm:$0xff] %vm2566_vm2, %v2555_v59  ;;  %v5651_v59 = vsel %vm1396_vm15, %v4790_v8, 1073741824  ;;  %v5665_v29 = vcvt.s32.f32 %v2221_v30 }
 0x251   : > { %2619 = vst.msk [vmem:[#allocation2 + $0x1a0] sm:$0xff] %vm2566_vm2, %v2554_v11  ;;  %7428 = vst [vmem:[#allocation159_spill] sm:$0xff] %v5636_v38  ;;  %v2525_v11 = vsel %vm7137_vm11, %v5636_v38, %v5625_v46  ;;  %v5675_v46 = vpop.xlane.xlu1 %1327  ;;  %v5677_v0 = vpop.xlane.xlu0 %1325  ;;  %v2123_v30 = vshra.s32 %v5651_v59, 16 }
 0x252   : > { %7429 = vst [vmem:[#allocation160_spill] sm:$0xff] %v5638_v33  ;;  %7430 = vst [vmem:[#allocation161_spill] sm:$0xff] %v5665_v29  ;;  %2224 = vmin.xlane.f32.xlu1 %v5665_v29  ;;  %1692 = vmin.xlane.f32.xlu0 %v5645_v4  ;;  %vm7153_vm15 = vcmp.lt.f32.partialorder %v5675_v46, %v5667_v5  ;;  %vm7145_vm14 = vcmp.lt.f32.partialorder %v5677_v0, %v5669_v27 }
 0x253   : > { %7431 = vst [vmem:[#allocation162_spill] sm:$0xff] %v5667_v5  ;;  %7432 = vst [vmem:[#allocation163_spill] sm:$0xff] %v5669_v27  ;;  %vm1405_vm11 = vcmp.eq.f32.partialorder %v4656_v55, %v5675_v46  ;;  %v2557_v17 = vsel %vm7153_vm15, %v5675_v46, %v5667_v5  ;;  %v2556_v55 = vsel %vm7145_vm14, %v5677_v0, %v5669_v27  ;;  %v5726_v29 = vcvt.s32.f32 %v2123_v30 }
 0x254   : > { %2590 = vst.msk [vmem:[#allocation2 + $0xb8] sm:$0xff] %vm2566_vm2, %v2525_v11  ;;  %2589 = vst.msk [vmem:[#allocation2 + $0xb0] sm:$0xff] %vm2566_vm2, %v2524_v52  ;;  %v5692_v11 = vsel %vm1367_vm5, %v4790_v8, 1073741824  ;;  %v5706_v52 = vld [vmem:[#allocation2 + $0xc8] sm:$0xff]  ;;  %v5711_v26 = vsel %vm1405_vm11, %v4790_v8, 1073741824  ;;  %vm1398_vm14 = vcmp.eq.f32.partialorder %v4605_v40, %v5436_v43  ;;  %vm1369_vm15 = vcmp.eq.f32.partialorder %v4610_v54, %v5474_v44  ;;  %v5789_v40 = vld [vmem:[#allocation2 + $0xd0] sm:$0xff] }
 0x255   : > { %7433 = vst [vmem:[#allocation164_spill] sm:$0xff] %v5675_v46  ;;  %7434 = vst [vmem:[#allocation165_spill] sm:$0xff] %v5677_v0  ;;  %v2249_v9 = vshra.s32 %v5711_v26, 16  ;;  %v5717_v5 = vpop.xlane.xlu1 %1267  ;;  %v5719_v46 = vpop.xlane.xlu0 %1265  ;;  %v1717_v27 = vshra.s32 %v5692_v11, 16 }
 0x256   : > { %7435 = vst [vmem:[#allocation166_spill] sm:$0xff] %v5679_v57  ;;  %7436 = vst [vmem:[#allocation167_spill] sm:$0xff] %v5692_v11  ;;  %1678 = vmin.xlane.f32.xlu0 %v5679_v57  ;;  %vm7152_vm5 = vcmp.lt.f32.partialorder %v5717_v5, %v5706_v52  ;;  %vm7151_vm11 = vcmp.lt.f32.partialorder %v5719_v46, %v5708_v32 }
 0x257   : > { %7437 = vst [vmem:[#allocation168_spill] sm:$0xff] %v5706_v52  ;;  %7438 = vst [vmem:[#allocation169_spill] sm:$0xff] %v5708_v32  ;;  %v2526_v30 = vsel %vm7151_vm11, %v5719_v46, %v5708_v32  ;;  %v5760_v57 = vcvt.s32.f32 %v1717_v27 }
 0x258   : > { %7439 = vst [vmem:[#allocation170_spill] sm:$0xff] %v5711_v26  ;;  %2622 = vst.msk [vmem:[#allocation2 + $0x1b8] sm:$0xff] %vm2566_vm2, %v2557_v17  ;;  %v5732_v17 = vsel %vm1366_vm1, %v4790_v8, 1073741824  ;;  %v5746_v26 = vcvt.s32.f32 %v2249_v9 }
 0x259   : > { %2621 = vst.msk [vmem:[#allocation2 + $0x1b0] sm:$0xff] %vm2566_vm2, %v2556_v55  ;;  %7440 = vst [vmem:[#allocation171_spill] sm:$0xff] %v5717_v5  ;;  %v2527_v55 = vsel %vm7152_vm5, %v5717_v5, %v5706_v52  ;;  %v5756_v52 = vpop.xlane.xlu1 %1331  ;;  %v5758_v11 = vpop.xlane.xlu0 %1329  ;;  %v1703_v9 = vshra.s32 %v5732_v17, 16 }
 0x25a   : > { %7441 = vst [vmem:[#allocation172_spill] sm:$0xff] %v5719_v46  ;;  %7442 = vst [vmem:[#allocation173_spill] sm:$0xff] %v5732_v17  ;;  %2252 = vmin.xlane.f32.xlu1 %v5746_v26  ;;  %2126 = vmin.xlane.f32.xlu0 %v5726_v29  ;;  %vm7169_vm1 = vcmp.lt.f32.partialorder %v5756_v52, %v5748_v37  ;;  %vm7159_vm11 = vcmp.lt.f32.partialorder %v5758_v11, %v5750_v3  ;;  %v5831_v17 = vld [vmem:[#allocation2 + $0x1d0] sm:$0xff] }
 0x25b   : > { %7443 = vst [vmem:[#allocation174_spill] sm:$0xff] %v5746_v26  ;;  %7444 = vst [vmem:[#allocation175_spill] sm:$0xff] %v5748_v37  ;;  %vm1407_vm5 = vcmp.eq.f32.partialorder %v4678_v49, %v5756_v52  ;;  %v2559_v27 = vsel %vm7169_vm1, %v5756_v52, %v5748_v37  ;;  %v2558_v49 = vsel %vm7159_vm11, %v5758_v11, %v5750_v3 }
 0x25c   : > { %7445 = vst [vmem:[#allocation176_spill] sm:$0xff] %v5750_v3  ;;  %2592 = vst.msk [vmem:[#allocation2 + $0xc8] sm:$0xff] %vm2566_vm2, %v2527_v55  ;;  %v5773_v55 = vsel %vm1398_vm14, %v4790_v8, 1073741824  ;;  %v5792_v32 = vsel %vm1407_vm5, %v4790_v8, 1073741824  ;;  %vm1368_vm14 = vcmp.eq.f32.partialorder %v4617_v2, %v5476_v13  ;;  %v5878_v13 = vld [vmem:[#allocation2 + $0xe0] sm:$0xff] }
 0x25d   : > { %2591 = vst.msk [vmem:[#allocation2 + $0xc0] sm:$0xff] %vm2566_vm2, %v2526_v30  ;;  %7446 = vst [vmem:[#allocation177_spill] sm:$0xff] %v5756_v52  ;;  %v5787_v30 = vld [vmem:[#allocation2 + $0xd8] sm:$0xff]  ;;  %v2277_v43 = vshra.s32 %v5792_v32, 16  ;;  %v5800_v37 = vpop.xlane.xlu1 %1271  ;;  %v5802_v3 = vpop.xlane.xlu0 %1269  ;;  %v2151_v52 = vshra.s32 %v5773_v55, 16 }
 0x25e   : > { %7447 = vst [vmem:[#allocation178_spill] sm:$0xff] %v5758_v11  ;;  %7448 = vst [vmem:[#allocation179_spill] sm:$0xff] %v5773_v55  ;;  %1720 = vmin.xlane.f32.xlu0 %v5760_v57  ;;  %vm7168_vm5 = vcmp.lt.f32.partialorder %v5800_v37, %v5787_v30  ;;  %vm7167_vm11 = vcmp.lt.f32.partialorder %v5802_v3, %v5789_v40  ;;  %v5829_v55 = vld [vmem:[#allocation2 + $0x1d8] sm:$0xff] }
 0x25f   : > { %7449 = vst [vmem:[#allocation180_spill] sm:$0xff] %v5787_v30  ;;  %7450 = vst [vmem:[#allocation181_spill] sm:$0xff] %v5789_v40  ;;  %v2528_v26 = vsel %vm7167_vm11, %v5802_v3, %v5789_v40  ;;  %v5847_v44 = vcvt.s32.f32 %v2151_v52 }
 0x260   : > { %7451 = vst [vmem:[#allocation182_spill] sm:$0xff] %v5792_v32  ;;  %2624 = vst.msk [vmem:[#allocation2 + $0x1c8] sm:$0xff] %vm2566_vm2, %v2559_v27  ;;  %v5809_v27 = vcvt.s32.f32 %v2277_v43  ;;  %v2529_v32 = vsel %vm7168_vm5, %v5800_v37, %v5787_v30  ;;  %v5827_v43 = vcvt.s32.f32 %v1703_v9 }
 0x261   : > { %2623 = vst.msk [vmem:[#allocation2 + $0x1c0] sm:$0xff] %vm2566_vm2, %v2558_v49  ;;  %7452 = vst [vmem:[#allocation183_spill] sm:$0xff] %v5800_v37  ;;  %v5815_v49 = vsel %vm1369_vm15, %v4790_v8, 1073741824  ;;  %vm1377_vm15 = vcmp.eq.f32.partialorder %v4697_v28, %v5800_v37  ;;  %v5842_v9 = vpop.xlane.xlu1 %1335  ;;  %v5844_v40 = vpop.xlane.xlu0 %1333  ;;  %v5876_v37 = vld [vmem:[#allocation2 + $0xe8] sm:$0xff] }
 0x262   : > { %7453 = vst [vmem:[#allocation184_spill] sm:$0xff] %v5802_v3  ;;  %7454 = vst [vmem:[#allocation185_spill] sm:$0xff] %v5829_v55  ;;  %2280 = vmin.xlane.f32.xlu1 %v5809_v27  ;;  %v5839_v54 = vsel %vm1377_vm15, %v4790_v8, 1073741824  ;;  %1706 = vmin.xlane.f32.xlu0 %v5827_v43  ;;  %v1745_v28 = vshra.s32 %v5815_v49, 16  ;;  %vm1400_vm15 = vcmp.eq.f32.partialorder %v4620_v61, %v5515_v22  ;;  %v5921_v61 = vld [vmem:[#allocation2 + $0x1e0] sm:$0xff] }
 0x263   : > { %7455 = vst [vmem:[#allocation186_spill] sm:$0xff] %v5831_v17  ;;  %2594 = vst.msk [vmem:[#allocation2 + $0xd8] sm:$0xff] %vm2566_vm2, %v2529_v32  ;;  %v1857_v30 = vshra.s32 %v5839_v54, 16  ;;  %vm7184_vm11 = vcmp.lt.f32.partialorder %v5842_v9, %v5829_v55  ;;  %vm7176_vm5 = vcmp.lt.f32.partialorder %v5844_v40, %v5831_v17  ;;  %vm1409_vm1 = vcmp.eq.f32.partialorder %v4700_v47, %v5842_v9 }
 0x264   : > { %2593 = vst.msk [vmem:[#allocation2 + $0xd0] sm:$0xff] %vm2566_vm2, %v2528_v26  ;;  %7456 = vst [vmem:[#allocation187_spill] sm:$0xff] %v5839_v54  ;;  %v5854_v26 = vsel %vm1368_vm14, %v4790_v8, 1073741824  ;;  %v2561_v2 = vsel %vm7184_vm11, %v5842_v9, %v5829_v55  ;;  %v2560_v52 = vsel %vm7176_vm5, %v5844_v40, %v5831_v17  ;;  %v5881_v47 = vsel %vm1409_vm1, %v4790_v8, 1073741824 }
 0x265   : > { %7457 = vst [vmem:[#allocation188_spill] sm:$0xff] %v5842_v9  ;;  %7458 = vst [vmem:[#allocation189_spill] sm:$0xff] %v5844_v40  ;;  %v5874_v32 = vcvt.s32.f32 %v1857_v30  ;;  %v2305_v55 = vshra.s32 %v5881_v47, 16  ;;  %v5888_v17 = vpop.xlane.xlu1 %1275  ;;  %v5890_v30 = vpop.xlane.xlu0 %1273  ;;  %v5892_v9 = vcvt.s32.f32 %v1745_v28  ;;  %v1731_v54 = vshra.s32 %v5854_v26, 16 }
 0x266   : > { %7460 = vst [vmem:[#allocation191_spill] sm:$0xff] %v5876_v37  ;;  %7461 = vst [vmem:[#allocation192_spill] sm:$0xff] %v5878_v13  ;;  %2154 = vmin.xlane.f32.xlu0 %v5847_v44  ;;  %vm7179_vm1 = vcmp.lt.f32.partialorder %v5888_v17, %v5876_v37  ;;  %vm7183_vm14 = vcmp.lt.f32.partialorder %v5890_v30, %v5878_v13  ;;  %vm1371_vm5 = vcmp.eq.f32.partialorder %v4631_v25, %v5555_v35 }
 0x267   : > { %7459 = vst [vmem:[#allocation190_spill] sm:$0xff] %v5874_v32  ;;  %7462 = vst [vmem:[#allocation193_spill] sm:$0xff] %v5881_v47  ;;  %1860 = vmin.xlane.f32.xlu1 %v5874_v32  ;;  %v2531_v28 = vsel %vm7179_vm1, %v5888_v17, %v5876_v37  ;;  %v5919_v32 = vld [vmem:[#allocation2 + $0x1e8] sm:$0xff]  ;;  %vm1370_vm1 = vcmp.eq.f32.partialorder %v4643_v31, %v5557_v12  ;;  %v5968_v47 = vld [vmem:[#allocation2 + $0xf0] sm:$0xff] }
 0x268   : > { %2626 = vst.msk [vmem:[#allocation2 + $0x1d8] sm:$0xff] %vm2566_vm2, %v2561_v2  ;;  %2625 = vst.msk [vmem:[#allocation2 + $0x1d0] sm:$0xff] %vm2566_vm2, %v2560_v52  ;;  %v5899_v2 = vcvt.s32.f32 %v2305_v55  ;;  %v5905_v52 = vsel %vm1400_vm15, %v4790_v8, 1073741824  ;;  %v2530_v55 = vsel %vm7183_vm14, %v5890_v30, %v5878_v13  ;;  %vm1379_vm15 = vcmp.eq.f32.partialorder %v4719_v42, %v5888_v17  ;;  %v6011_v12 = vld [vmem:[#allocation2 + $0x1f0] sm:$0xff] }
 0x269   : > { %7463 = vst [vmem:[#allocation194_spill] sm:$0xff] %v5888_v17  ;;  %7464 = vst [vmem:[#allocation195_spill] sm:$0xff] %v5890_v30  ;;  %v5928_v22 = vsel %vm1379_vm15, %v4790_v8, 1073741824  ;;  %v5934_v13 = vpop.xlane.xlu1 %1339  ;;  %v5936_v37 = vpop.xlane.xlu0 %1337  ;;  %v5939_v17 = vcvt.s32.f32 %v1731_v54  ;;  %v5988_v35 = vsel %vm1370_vm1, %v4790_v8, 1073741824  ;;  %vm1402_vm1 = vcmp.eq.f32.partialorder %v4646_v41, %v5596_v60 }
 0x26a   : > { %7465 = vst [vmem:[#allocation196_spill] sm:$0xff] %v5899_v2  ;;  %7466 = vst [vmem:[#allocation197_spill] sm:$0xff] %v5919_v32  ;;  %1748 = vmin.xlane.f32.xlu0 %v5892_v9  ;;  %v1885_v42 = vshra.s32 %v5928_v22, 16  ;;  %vm2499_vm15 = vcmp.lt.f32.partialorder %v5934_v13, %v5919_v32  ;;  %vm7192_vm14 = vcmp.lt.f32.partialorder %v5936_v37, %v5921_v61 }
 0x26b   : > { %7467 = vst [vmem:[#allocation198_spill] sm:$0xff] %v5921_v61  ;;  %2596 = vst.msk [vmem:[#allocation2 + $0xe8] sm:$0xff] %vm2566_vm2, %v2531_v28  ;;  %2308 = vmin.xlane.f32.xlu1 %v5899_v2  ;;  %v2179_v28 = vshra.s32 %v5905_v52, 16  ;;  %vm1411_vm11 = vcmp.eq.f32.partialorder %v4722_v10, %v5934_v13  ;;  %v2563_v54 = vsel %vm2499_vm15, %v5934_v13, %v5919_v32  ;;  %v5966_v10 = vld [vmem:[#allocation2 + $0xf8] sm:$0xff] }
 0x26c   : > { %2595 = vst.msk [vmem:[#allocation2 + $0xe0] sm:$0xff] %vm2566_vm2, %v2530_v55  ;;  %7468 = vst [vmem:[#allocation199_spill] sm:$0xff] %v5928_v22  ;;  %v5952_v55 = vsel %vm1371_vm5, %v4790_v8, 1073741824  ;;  %v2562_v2 = vsel %vm7192_vm14, %v5936_v37, %v5921_v61  ;;  %v5964_v22 = vcvt.s32.f32 %v1885_v42  ;;  %v5971_v25 = vsel %vm1411_vm11, %v4790_v8, 1073741824 }
 0x26d   : > { %7469 = vst [vmem:[#allocation200_spill] sm:$0xff] %v5934_v13  ;;  %7470 = vst [vmem:[#allocation201_spill] sm:$0xff] %v5936_v37  ;;  %v2333_v32 = vshra.s32 %v5971_v25, 16  ;;  %v5978_v61 = vpop.xlane.xlu1 %1279  ;;  %v5980_v42 = vpop.xlane.xlu0 %1277  ;;  %v5982_v13 = vcvt.s32.f32 %v2179_v28 }
 0x26e   : > { %7471 = vst [vmem:[#allocation202_spill] sm:$0xff] %v5964_v22  ;;  %7472 = vst [vmem:[#allocation203_spill] sm:$0xff] %v5966_v10  ;;  %1734 = vmin.xlane.f32.xlu0 %v5939_v17  ;;  %vm1381_vm11 = vcmp.eq.f32.partialorder %v4739_v16, %v5978_v61  ;;  %vm7200_vm5 = vcmp.lt.f32.partialorder %v5978_v61, %v5966_v10  ;;  %vm7199_vm14 = vcmp.lt.f32.partialorder %v5980_v42, %v5968_v47 }
 0x26f   : > { %7473 = vst [vmem:[#allocation204_spill] sm:$0xff] %v5968_v47  ;;  %7474 = vst [vmem:[#allocation205_spill] sm:$0xff] %v5971_v25  ;;  %1888 = vmin.xlane.f32.xlu1 %v5964_v22  ;;  %v2533_v28 = vsel %vm7200_vm5, %v5978_v61, %v5966_v10  ;;  %v2532_v31 = vsel %vm7199_vm14, %v5980_v42, %v5968_v47  ;;  %v6007_v16 = vcvt.s32.f32 %v2333_v32  ;;  %v6014_v22 = vsel %vm1381_vm11, %v4790_v8, 1073741824 }
 0x270   : > { %2628 = vst.msk [vmem:[#allocation2 + $0x1e8] sm:$0xff] %vm2566_vm2, %v2563_v54  ;;  %2627 = vst.msk [vmem:[#allocation2 + $0x1e0] sm:$0xff] %vm2566_vm2, %v2562_v2  ;;  %v1773_v2 = vshra.s32 %v5952_v55, 16  ;;  %v6009_v54 = vld [vmem:[#allocation2 + $0x1f8] sm:$0xff]  ;;  %v1913_v10 = vshra.s32 %v6014_v22, 16 }
 0x271   : > { %7475 = vst [vmem:[#allocation206_spill] sm:$0xff] %v5978_v61  ;;  %7476 = vst [vmem:[#allocation207_spill] sm:$0xff] %v5980_v42  ;;  %v6023_v32 = vpop.xlane.xlu1 %1343  ;;  %v6025_v47 = vpop.xlane.xlu0 %1341  ;;  %v1759_v61 = vshra.s32 %v5988_v35, 16 }
 0x272   : > { %7477 = vst [vmem:[#allocation208_spill] sm:$0xff] %v6007_v16  ;;  %7478 = vst [vmem:[#allocation209_spill] sm:$0xff] %v6009_v54  ;;  %2182 = vmin.xlane.f32.xlu0 %v5982_v13  ;;  %vm1413_vm11 = vcmp.eq.f32.partialorder %v4742_v23, %v6023_v32  ;;  %vm7214_vm14 = vcmp.lt.f32.partialorder %v6023_v32, %v6009_v54  ;;  %vm7205_vm5 = vcmp.lt.f32.partialorder %v6025_v47, %v6011_v12 }
 0x273   : > { %7479 = vst [vmem:[#allocation210_spill] sm:$0xff] %v6011_v12  ;;  %7480 = vst [vmem:[#allocation211_spill] sm:$0xff] %v6014_v22  ;;  %2336 = vmin.xlane.f32.xlu1 %v6007_v16  ;;  %v2564_v23 = vsel %vm7205_vm5, %v6025_v47, %v6011_v12  ;;  %v6046_v22 = vcvt.s32.f32 %v1913_v10  ;;  %v6049_v16 = vsel %vm1413_vm11, %v4790_v8, 1073741824  ;;  %vm1373_vm5 = vcmp.eq.f32.partialorder %v4653_v1, %v5636_v38 }
 0x274   : > { %2598 = vst.msk [vmem:[#allocation2 + $0xf8] sm:$0xff] %vm2566_vm2, %v2533_v28  ;;  %2597 = vst.msk [vmem:[#allocation2 + $0xf0] sm:$0xff] %vm2566_vm2, %v2532_v31  ;;  %v6034_v28 = vcvt.s32.f32 %v1773_v2  ;;  %v2565_v31 = vsel %vm7214_vm14, %v6023_v32, %v6009_v54  ;;  %v2361_v2 = vshra.s32 %v6049_v16, 16  ;;  %v6058_v54 = vsel %vm1402_vm1, %v4790_v8, 1073741824 }
 0x275   : > { %7481 = vst [vmem:[#allocation212_spill] sm:$0xff] %v6023_v32  ;;  %7482 = vst [vmem:[#allocation213_spill] sm:$0xff] %v6025_v47  ;;  %v6070_v12 = vsel %vm1373_vm5, %v4790_v8, 1073741824  ;;  %vm1372_vm1 = vcmp.eq.f32.partialorder %v4661_v63, %v5638_v33  ;;  %vm1404_vm11 = vcmp.eq.f32.partialorder %v4664_v62, %v5677_v0  ;;  %vm1375_vm5 = vcmp.eq.f32.partialorder %v4675_v48, %v5717_v5 }
 0x276   : > { %7483 = vst [vmem:[#allocation214_spill] sm:$0xff] %v6046_v22  ;;  %7484 = vst [vmem:[#allocation215_spill] sm:$0xff] %v6049_v16  ;;  %1776 = vmin.xlane.f32.xlu0 %v6034_v28  ;;  %v6064_v10 = vcvt.s32.f32 %v2361_v2  ;;  %v1801_v1 = vshra.s32 %v6070_v12, 16  ;;  %v6080_v2 = vsel %vm1372_vm1, %v4790_v8, 1073741824  ;;  %v6089_v32 = vsel %vm1404_vm11, %v4790_v8, 1073741824 }
 0x277   : > { %2630 = vst.msk [vmem:[#allocation2 + $0x1f8] sm:$0xff] %vm2566_vm2, %v2565_v31  ;;  %2629 = vst.msk [vmem:[#allocation2 + $0x1f0] sm:$0xff] %vm2566_vm2, %v2564_v23  ;;  %1916 = vmin.xlane.f32.xlu1 %v6046_v22  ;;  %v6066_v31 = vcvt.s32.f32 %v1759_v61  ;;  %v2207_v23 = vshra.s32 %v6058_v54, 16  ;;  %v1787_v63 = vshra.s32 %v6080_v2, 16  ;;  %v2235_v33 = vshra.s32 %v6089_v32, 16 }
 0x278   : > { %7485 = vst [vmem:[#allocation216_spill] sm:$0xff] %v6064_v10  ;;  %v6085_v61 = vcvt.s32.f32 %v1801_v1  ;;  %v6098_v62 = vsel %vm1375_vm5, %v4790_v8, 1073741824  ;;  %v1492_v1 = vand.u32 65535, %v4822_v21  ;;  %vm1374_vm1 = vcmp.eq.f32.partialorder %v4687_v45, %v5719_v46 }
 0x279   : > { %v6076_v41 = vcvt.s32.f32 %v2207_v23  ;;  %v6094_v23 = vcvt.s32.f32 %v1787_v63  ;;  %v6104_v0 = vcvt.s32.f32 %v2235_v33  ;;  %v1829_v48 = vshra.s32 %v6098_v62, 16 }
 0x27a   : > { %1762 = vmin.xlane.f32.xlu0 %v6066_v31  ;;  %v6108_v5 = vsel %vm1374_vm1, %v4790_v8, 1073741824  ;;  %v1940_v63 = vand.u32 65535, %v4819_v20  ;;  %vm1406_vm11 = vcmp.eq.f32.partialorder %v4690_v58, %v5758_v11  ;;  %v1494_v45 = vcvt.s32.f32 %v1492_v1 }
 0x27b   : > { %2364 = vmin.xlane.f32.xlu1 %v6064_v10  ;;  %v6120_v33 = vcvt.s32.f32 %v1829_v48  ;;  %v1815_v60 = vshra.s32 %v6108_v5, 16  ;;  %v6126_v58 = vsel %vm1406_vm11, %v4790_v8, 1073741824  ;;  %v1478_v20 = vand.u32 65535, %v4863_v14 }
 0x27c   : > { %vm1376_vm14 = vcmp.eq.f32.partialorder %v4705_v7, %v5802_v3  ;;  %v1520_v14 = vand.u32 65535, %v4871_v36  ;;  %v7487_v3 = vld [vmem:[#allocation24_spill] sm:$0xff] }
 0x27d   : > { %v6134_v48 = vcvt.s32.f32 %v1815_v60  ;;  %v1480_v7 = vcvt.s32.f32 %v1478_v20 }
 0x27e   : > { %2210 = vmin.xlane.f32.xlu0 %v6076_v41 }
 0x282   : > { %1804 = vmin.xlane.f32.xlu0 %v6085_v61 }
 0x286   : > { %1790 = vmin.xlane.f32.xlu0 %v6094_v23 }
 0x287   : > { %v6116_v38 = vpop.xlane.xlu0 %1496 }
 0x288   : > { %v6114_v21 = vpop.xlane.xlu1 %1944  ;;  %vm1498_vm5 = vcmp.eq.f32.partialorder %v4838_v18, %v6116_v38  ;;  %v1942_v18 = vcvt.s32.f32 %v1940_v63 }
 0x289   : > { %v1499_v46 = vsel %vm1498_vm5, %v1494_v45, inf  ;;  %vm1946_vm1 = vcmp.eq.f32.partialorder %v4836_v56, %v6114_v21  ;;  %v6140_v56 = vsel %vm1376_vm14, %v4790_v8, 1073741824  ;;  %vm1408_vm5 = vcmp.eq.f32.partialorder %v4708_v53, %v5844_v40  ;;  %v7488_v53 = vld [vmem:[#allocation42_spill] sm:$0xff] }
 0x28a   : > { %2238 = vmin.xlane.f32.xlu0 %v6104_v0  ;;  %1500 = vmin.xlane.f32.xlu1 %v1499_v46  ;;  %v1947_v45 = vsel %vm1946_vm1, %v1942_v18, inf  ;;  %v2263_v46 = vshra.s32 %v6126_v58, 16  ;;  %vm1378_vm14 = vcmp.eq.f32.partialorder %v7487_v3, %v5890_v30  ;;  %v1968_v20 = vand.u32 65535, %v7488_v53  ;;  %v7490_v3 = vld [vmem:[#allocation25_spill] sm:$0xff]  ;;  %v7491_v53 = vld [vmem:[#allocation46_spill] sm:$0xff] }
 0x28b   : > { %v6168_v10 = vsel %vm1378_vm14, %v4790_v8, 1073741824 }
 0x28c   : > { %v6132_v1 = vpop.xlane.xlu0 %1482  ;;  %v6148_v63 = vcvt.s32.f32 %v2263_v46  ;;  %v1522_v46 = vcvt.s32.f32 %v1520_v14  ;;  %7489 = vst [vmem:[#allocation24_spill] sm:$0xff] %v6168_v10  ;;  %v7492_v14 = vld [vmem:[#allocation50_spill] sm:$0xff] }
 0x28d   : > { %vm1484_vm11 = vcmp.eq.f32.partialorder %v4891_v39, %v6132_v1  ;;  %v6152_v39 = vsel %vm1408_vm5, %v4790_v8, 1073741824 }
 0x28e   : > { %1832 = vmin.xlane.f32.xlu0 %v6120_v33  ;;  %1948 = vmin.xlane.f32.xlu1 %v1947_v45  ;;  %v1485_v18 = vsel %vm1484_vm11, %v1480_v7, inf  ;;  %v1843_v45 = vshra.s32 %v6140_v56, 16  ;;  %v2291_v7 = vshra.s32 %v6152_v39, 16  ;;  %vm1410_vm11 = vcmp.eq.f32.partialorder %v7490_v3, %v5936_v37  ;;  %v7495_v3 = vld [vmem:[#allocation26_spill] sm:$0xff] }
 0x28f   : > { %v6182_v25 = vsel %vm1410_vm11, %v4790_v8, 1073741824  ;;  %vm1380_vm14 = vcmp.eq.f32.partialorder %v7495_v3, %v5980_v42  ;;  %v7498_v3 = vld [vmem:[#allocation27_spill] sm:$0xff] }
 0x290   : > { %v6158_v40 = vpop.xlane.xlu1 %1972  ;;  %v6162_v11 = vcvt.s32.f32 %v1843_v45  ;;  %v1506_v45 = vand.u32 65535, %v7492_v14  ;;  %v6178_v16 = vcvt.s32.f32 %v2291_v7  ;;  %7494 = vst [vmem:[#allocation25_spill] sm:$0xff] %v6182_v25  ;;  %v2319_v14 = vshra.s32 %v6182_v25, 16 }
 0x291   : > { %v6146_v60 = vpop.xlane.xlu0 %1930  ;;  %vm1974_vm5 = vcmp.eq.f32.partialorder %v7491_v53, %v6158_v40  ;;  %v6196_v37 = vsel %vm1380_vm14, %v4790_v8, 1073741824  ;;  %vm1412_vm11 = vcmp.eq.f32.partialorder %v7498_v3, %v6025_v47 }
 0x292   : > { %1818 = vmin.xlane.f32.xlu0 %v6134_v48  ;;  %7486 = vst [vmem:[#allocation217_spill] sm:$0xff] %v6146_v60  ;;  %1486 = vmin.xlane.f32.xlu1 %v1485_v18  ;;  %7493 = vst [vmem:[#allocation42_spill] sm:$0xff] %v6178_v16  ;;  %v1508_v7 = vcvt.s32.f32 %v1506_v45  ;;  %v6212_v3 = vsel %vm1412_vm11, %v4790_v8, 1073741824  ;;  %v7508_v8 = vld [vmem:[#allocation77_spill] sm:$0xff] }
 0x293   : > { %7497 = vst [vmem:[#allocation50_spill] sm:$0xff] %v6196_v37  ;;  %7503 = vst [vmem:[#allocation218_spill] sm:$0xff] %v6212_v3 }
 0x295   : > { %v6160_v36 = vpop.xlane.xlu0 %1524 }
 0x296   : > { %2266 = vmin.xlane.f32.xlu0 %v6148_v63  ;;  %vm1526_vm1 = vcmp.eq.f32.partialorder %v4965_v50, %v6160_v36  ;;  %v1970_v50 = vcvt.s32.f32 %v1968_v20 }
 0x297   : > { %v1527_v18 = vsel %vm1526_vm1, %v1522_v46, inf  ;;  %v1871_v46 = vshra.s32 %v6168_v10, 16 }
 0x298   : > { %1528 = vmin.xlane.f32.xlu1 %v1527_v18  ;;  %v1975_v22 = vsel %vm1974_vm5, %v1970_v50, inf  ;;  %v1548_v18 = vand.u32 65535, %v4992_v51 }
 0x299   : > { %v6176_v30 = vpop.xlane.xlu0 %1510  ;;  %v6192_v53 = vcvt.s32.f32 %v1871_v46  ;;  %v6206_v46 = vcvt.s32.f32 %v2319_v14 }
 0x29a   : > { %1846 = vmin.xlane.f32.xlu0 %v6162_v11  ;;  %vm1512_vm1 = vcmp.eq.f32.partialorder %v4983_v6, %v6176_v30  ;;  %v7499_v6 = vld [vmem:[#allocation60_spill] sm:$0xff]  ;;  %v1550_v45 = vcvt.s32.f32 %v1548_v18 }
 0x29b   : > { %7496 = vst [vmem:[#allocation46_spill] sm:$0xff] %v6192_v53  ;;  %v1513_v50 = vsel %vm1512_vm1, %v1508_v7, inf  ;;  %7502 = vst [vmem:[#allocation60_spill] sm:$0xff] %v6206_v46  ;;  %v1899_v7 = vshra.s32 %v6196_v37, 16 }
 0x29c   : > { %1976 = vmin.xlane.f32.xlu1 %v1975_v22  ;;  %v1996_v22 = vand.u32 65535, %v7499_v6  ;;  %v6202_v51 = vpop.xlane.xlu1 %2000  ;;  %v7505_v6 = vld [vmem:[#allocation67_spill] sm:$0xff] }
 0x29d   : > { %v6190_v20 = vpop.xlane.xlu0 %1958  ;;  %7500 = vst [vmem:[#allocation26_spill] sm:$0xff] %v6202_v51  ;;  %v1534_v47 = vand.u32 65535, %v7505_v6 }
 0x29e   : > { %2294 = vmin.xlane.f32.xlu0 %v6178_v16  ;;  %v1998_v14 = vcvt.s32.f32 %v1996_v22 }
 0x29f   : > { %v1536_v6 = vcvt.s32.f32 %v1534_v47  ;;  %v7516_v47 = vld [vmem:[#allocation92_spill] sm:$0xff] }
 0x2a0   : > { %1514 = vmin.xlane.f32.xlu1 %v1513_v50  ;;  %v7504_v50 = vld [vmem:[#allocation63_spill] sm:$0xff] }
 0x2a1   : > { %v6204_v42 = vpop.xlane.xlu0 %1552  ;;  %vm2002_vm14 = vcmp.eq.f32.partialorder %v7504_v50, %v6202_v51 }
 0x2a2   : > { %1874 = vmin.xlane.f32.xlu0 %v6192_v53  ;;  %7501 = vst [vmem:[#allocation27_spill] sm:$0xff] %v6204_v42  ;;  %vm1554_vm5 = vcmp.eq.f32.partialorder %v5058_v24, %v6204_v42  ;;  %v6220_v53 = vcvt.s32.f32 %v1899_v7  ;;  %v2347_v24 = vshra.s32 %v6212_v3, 16  ;;  %v2003_v37 = vsel %vm2002_vm14, %v1998_v14, inf  ;;  %v7512_v7 = vld [vmem:[#allocation47_spill] sm:$0xff] }
 0x2a3   : > { %v1555_v25 = vsel %vm1554_vm5, %v1550_v45, inf  ;;  %vm1932_vm11 = vcmp.eq.f32.partialorder %v7512_v7, %v6146_v60  ;;  %v7518_v7 = vld [vmem:[#allocation76_spill] sm:$0xff] }
 0x2a4   : > { %1556 = vmin.xlane.f32.xlu1 %v1555_v25  ;;  %7507 = vst [vmem:[#allocation67_spill] sm:$0xff] %v6220_v53  ;;  %v7509_v25 = vld [vmem:[#allocation43_spill] sm:$0xff]  ;;  %v6230_v42 = vcvt.s32.f32 %v2347_v24  ;;  %v6237_v3 = vpop.xlane.xlu1 %2028 }
 0x2a5   : > { %v6218_v18 = vpop.xlane.xlu0 %1538  ;;  %v1926_v45 = vand.u32 65535, %v7509_v25  ;;  %7515 = vst [vmem:[#allocation43_spill] sm:$0xff] %v6237_v3 }
 0x2a6   : > { %2322 = vmin.xlane.f32.xlu0 %v6206_v46  ;;  %7506 = vst [vmem:[#allocation63_spill] sm:$0xff] %v6218_v18  ;;  %vm1540_vm1 = vcmp.eq.f32.partialorder %v7508_v8, %v6218_v18  ;;  %v7510_v46 = vld [vmem:[#allocation80_spill] sm:$0xff]  ;;  %7511 = vst [vmem:[#allocation77_spill] sm:$0xff] %v6230_v42 }
 0x2a7   : > { %v1576_v50 = vand.u32 65535, %v7510_v46  ;;  %v1541_v22 = vsel %vm1540_vm1, %v1536_v6, inf  ;;  %v1928_v46 = vcvt.s32.f32 %v1926_v45  ;;  %vm2030_vm1 = vcmp.eq.f32.partialorder %v7518_v7, %v6237_v3 }
 0x2a8   : > { %2004 = vmin.xlane.f32.xlu1 %v2003_v37  ;;  %v7513_v37 = vld [vmem:[#allocation55_spill] sm:$0xff] }
 0x2a9   : > { %v6228_v51 = vpop.xlane.xlu0 %1986  ;;  %v1954_v14 = vand.u32 65535, %v7513_v37  ;;  %v1578_v18 = vcvt.s32.f32 %v1576_v50  ;;  %v1933_v24 = vsel %vm1932_vm11, %v1928_v46, inf  ;;  %v7523_v46 = vld [vmem:[#allocation97_spill] sm:$0xff] }
 0x2aa   : > { %1902 = vmin.xlane.f32.xlu0 %v6220_v53  ;;  %v7514_v53 = vld [vmem:[#allocation73_spill] sm:$0xff] }
 0x2ab   : > { %v2024_v8 = vand.u32 65535, %v7514_v53  ;;  %v7519_v53 = vld [vmem:[#allocation70_spill] sm:$0xff]  ;;  %v1956_v45 = vcvt.s32.f32 %v1954_v14 }
 0x2ac   : > { %1542 = vmin.xlane.f32.xlu1 %v1541_v22  ;;  %v7517_v22 = vld [vmem:[#allocation64_spill] sm:$0xff]  ;;  %v1982_v37 = vand.u32 65535, %v7519_v53 }
 0x2ad   : > { %v6239_v25 = vpop.xlane.xlu0 %1580  ;;  %vm1960_vm14 = vcmp.eq.f32.partialorder %v7517_v22, %v6190_v20  ;;  %v2026_v50 = vcvt.s32.f32 %v2024_v8  ;;  %v7525_v22 = vld [vmem:[#allocation98_spill] sm:$0xff] }
 0x2ae   : > { %2350 = vmin.xlane.f32.xlu0 %v6230_v42  ;;  %vm1582_vm5 = vcmp.eq.f32.partialorder %v7516_v47, %v6239_v25  ;;  %v7520_v42 = vld [vmem:[#allocation84_spill] sm:$0xff]  ;;  %v1961_v10 = vsel %vm1960_vm14, %v1956_v45, inf  ;;  %v1604_v7 = vand.u32 65535, %v7525_v22  ;;  %v7528_v45 = vld [vmem:[#allocation87_spill] sm:$0xff]  ;;  %v7529_v22 = vld [vmem:[#allocation109_spill] sm:$0xff] }
 0x2af   : > { %v1583_v6 = vsel %vm1582_vm5, %v1578_v18, inf  ;;  %v1562_v60 = vand.u32 65535, %v7520_v42  ;;  %v2031_v47 = vsel %vm2030_vm1, %v2026_v50, inf  ;;  %v7522_v18 = vld [vmem:[#allocation83_spill] sm:$0xff]  ;;  %v1984_v42 = vcvt.s32.f32 %v1982_v37 }
 0x2b0   : > { %1584 = vmin.xlane.f32.xlu1 %v1583_v6  ;;  %vm1988_vm11 = vcmp.eq.f32.partialorder %v7522_v18, %v6228_v51  ;;  %v2052_v50 = vand.u32 65535, %v7528_v45 }
 0x2b1   : > { %v6249_v16 = vpop.xlane.xlu0 %1566  ;;  %v1564_v3 = vcvt.s32.f32 %v1562_v60  ;;  %v1989_v14 = vsel %vm1988_vm11, %v1984_v42, inf  ;;  %v7531_v42 = vld [vmem:[#allocation104_spill] sm:$0xff] }
 0x2b2   : > { %1934 = vmin.xlane.f32.xlu0 %v1933_v24  ;;  %7521 = vst [vmem:[#allocation80_spill] sm:$0xff] %v6249_v16  ;;  %vm1568_vm5 = vcmp.eq.f32.partialorder %v7523_v46, %v6249_v16  ;;  %v7524_v24 = vld [vmem:[#allocation91_spill] sm:$0xff] }
 0x2b3   : > { %v2010_v6 = vand.u32 65535, %v7524_v24  ;;  %v1569_v8 = vsel %vm1568_vm5, %v1564_v3, inf  ;;  %v1606_v24 = vcvt.s32.f32 %v1604_v7  ;;  %v7530_v3 = vld [vmem:[#allocation90_spill] sm:$0xff]  ;;  %v7535_v7 = vld [vmem:[#allocation115_spill] sm:$0xff] }
 0x2b4   : > { %2032 = vmin.xlane.f32.xlu1 %v2031_v47  ;;  %v6262_v47 = vpop.xlane.xlu1 %2056 }
 0x2b5   : > { %v6257_v53 = vpop.xlane.xlu0 %2014  ;;  %v2012_v46 = vcvt.s32.f32 %v2010_v6  ;;  %vm2058_vm11 = vcmp.eq.f32.partialorder %v7530_v3, %v6262_v47  ;;  %v7534_v6 = vld [vmem:[#allocation114_spill] sm:$0xff] }
 0x2b6   : > { %1962 = vmin.xlane.f32.xlu0 %v1961_v10  ;;  %7526 = vst [vmem:[#allocation47_spill] sm:$0xff] %v6257_v53  ;;  %v7527_v10 = vld [vmem:[#allocation103_spill] sm:$0xff] }
 0x2b7   : > { %vm2016_vm14 = vcmp.eq.f32.partialorder %v7527_v10, %v6257_v53  ;;  %v2054_v53 = vcvt.s32.f32 %v2052_v50 }
 0x2b8   : > { %1570 = vmin.xlane.f32.xlu1 %v1569_v8  ;;  %v2017_v37 = vsel %vm2016_vm14, %v2012_v46, inf  ;;  %v7532_v8 = vld [vmem:[#allocation21_spill] sm:$0xff]  ;;  %v1632_v46 = vand.u32 65535, %v7535_v7  ;;  %v7541_v7 = vld [vmem:[#allocation126_spill] sm:$0xff] }
 0x2b9   : > { %v6264_v18 = vpop.xlane.xlu0 %1608  ;;  %v2038_v10 = vand.u32 65535, %v7532_v8  ;;  %v2059_v16 = vsel %vm2058_vm11, %v2054_v53, inf  ;;  %v7538_v8 = vld [vmem:[#allocation101_spill] sm:$0xff]  ;;  %v6282_v53 = vpop.xlane.xlu1 %2084 }
 0x2ba   : > { %1990 = vmin.xlane.f32.xlu0 %v1989_v14  ;;  %vm1610_vm1 = vcmp.eq.f32.partialorder %v7529_v22, %v6264_v18  ;;  %v1590_v14 = vand.u32 65535, %v7531_v42  ;;  %v2080_v50 = vand.u32 65535, %v7538_v8  ;;  %7539 = vst [vmem:[#allocation92_spill] sm:$0xff] %v6282_v53 }
 0x2bb   : > { %v1611_v60 = vsel %vm1610_vm1, %v1606_v24, inf }
 0x2bc   : > { %1612 = vmin.xlane.f32.xlu1 %v1611_v60  ;;  %v1592_v22 = vcvt.s32.f32 %v1590_v14  ;;  %v7537_v60 = vld [vmem:[#allocation121_spill] sm:$0xff] }
 0x2bd   : > { %v6272_v45 = vpop.xlane.xlu0 %1594  ;;  %v7542_v14 = vld [vmem:[#allocation105_spill] sm:$0xff] }
 0x2be   : > { %2018 = vmin.xlane.f32.xlu0 %v2017_v37  ;;  %7533 = vst [vmem:[#allocation55_spill] sm:$0xff] %v6272_v45  ;;  %vm1596_vm5 = vcmp.eq.f32.partialorder %v7534_v6, %v6272_v45  ;;  %v2040_v37 = vcvt.s32.f32 %v2038_v10  ;;  %v1634_v6 = vcvt.s32.f32 %v1632_v46  ;;  %vm2086_vm11 = vcmp.eq.f32.partialorder %v7542_v14, %v6282_v53  ;;  %v7543_v10 = vld [vmem:[#allocation120_spill] sm:$0xff] }
 0x2bf   : > { %v1597_v3 = vsel %vm1596_vm5, %v1592_v22, inf  ;;  %v1618_v22 = vand.u32 65535, %v7543_v10 }
 0x2c0   : > { %2060 = vmin.xlane.f32.xlu1 %v2059_v16 }
 0x2c1   : > { %v6277_v24 = vpop.xlane.xlu0 %2042 }
 0x2c2   : > { %7536 = vst [vmem:[#allocation73_spill] sm:$0xff] %v6277_v24  ;;  %vm2044_vm14 = vcmp.eq.f32.partialorder %v7537_v60, %v6277_v24  ;;  %v2082_v60 = vcvt.s32.f32 %v2080_v50  ;;  %v7545_v24 = vld [vmem:[#allocation131_spill] sm:$0xff]  ;;  %v7547_v50 = vld [vmem:[#allocation112_spill] sm:$0xff] }
 0x2c3   : > { %v2045_v42 = vsel %vm2044_vm14, %v2040_v37, inf }
 0x2c4   : > { %1598 = vmin.xlane.f32.xlu1 %v1597_v3  ;;  %2046 = vmin.xlane.f32.xlu0 %v2045_v42  ;;  %v7544_v3 = vld [vmem:[#allocation130_spill] sm:$0xff]  ;;  %v2087_v8 = vsel %vm2086_vm11, %v2082_v60, inf  ;;  %v6302_v60 = vpop.xlane.xlu1 %2112 }
 0x2c5   : > { %v6284_v16 = vpop.xlane.xlu0 %1636  ;;  %v2066_v42 = vand.u32 65535, %v7544_v3  ;;  %v2108_v3 = vand.u32 65535, %v7547_v50  ;;  %7548 = vst [vmem:[#allocation76_spill] sm:$0xff] %v6302_v60 }
 0x2c6   : > { %7540 = vst [vmem:[#allocation64_spill] sm:$0xff] %v6284_v16  ;;  %vm1638_vm1 = vcmp.eq.f32.partialorder %v7541_v7, %v6284_v16  ;;  %v1620_v7 = vcvt.s32.f32 %v1618_v22 }
 0x2c7   : > { %v1639_v45 = vsel %vm1638_vm1, %v1634_v6, inf  ;;  %v2068_v6 = vcvt.s32.f32 %v2066_v42  ;;  %v7551_v42 = vld [vmem:[#allocation116_spill] sm:$0xff] }
 0x2c8   : > { %1640 = vmin.xlane.f32.xlu1 %v1639_v45  ;;  %v7546_v45 = vld [vmem:[#allocation135_spill] sm:$0xff]  ;;  %vm2114_vm11 = vcmp.eq.f32.partialorder %v7551_v42, %v6302_v60  ;;  %v7555_v42 = vld [vmem:[#allocation154_spill] sm:$0xff] }
 0x2c9   : > { %v6291_v37 = vpop.xlane.xlu0 %1622  ;;  %v1660_v16 = vand.u32 65535, %v7546_v45 }
 0x2ca   : > { %vm1624_vm5 = vcmp.eq.f32.partialorder %v7545_v24, %v6291_v37 }
 0x2cb   : > { %v1625_v14 = vsel %vm1624_vm5, %v1620_v7, inf  ;;  %v1662_v24 = vcvt.s32.f32 %v1660_v16  ;;  %v2110_v7 = vcvt.s32.f32 %v2108_v3 }
 0x2cc   : > { %2088 = vmin.xlane.f32.xlu1 %v2087_v8  ;;  %v7550_v8 = vld [vmem:[#allocation144_spill] sm:$0xff] }
 0x2cd   : > { %v6296_v46 = vpop.xlane.xlu0 %2070  ;;  %v2115_v50 = vsel %vm2114_vm11, %v2110_v7, inf  ;;  %v7557_v7 = vld [vmem:[#allocation124_spill] sm:$0xff] }
 0x2ce   : > { %vm2072_vm14 = vcmp.eq.f32.partialorder %v5503_v19, %v6296_v46 }
 0x2cf   : > { %v2073_v10 = vsel %vm2072_vm14, %v2068_v6, inf  ;;  %v7552_v6 = vld [vmem:[#allocation138_spill] sm:$0xff] }
 0x2d0   : > { %1626 = vmin.xlane.f32.xlu1 %v1625_v14  ;;  %2074 = vmin.xlane.f32.xlu0 %v2073_v10  ;;  %v1646_v45 = vand.u32 65535, %v7552_v6  ;;  %v7553_v14 = vld [vmem:[#allocation143_spill] sm:$0xff]  ;;  %v2136_v6 = vand.u32 65535, %v7557_v7 }
 0x2d1   : > { %v6304_v53 = vpop.xlane.xlu0 %1664  ;;  %v2094_v10 = vand.u32 65535, %v7553_v14 }
 0x2d2   : > { %7549 = vst [vmem:[#allocation70_spill] sm:$0xff] %v6304_v53  ;;  %vm1666_vm1 = vcmp.eq.f32.partialorder %v7550_v8, %v6304_v53  ;;  %v1648_v8 = vcvt.s32.f32 %v1646_v45  ;;  %v6321_v53 = vpop.xlane.xlu1 %2140 }
 0x2d3   : > { %v1667_v22 = vsel %vm1666_vm1, %v1662_v24, inf  ;;  %v2096_v24 = vcvt.s32.f32 %v2094_v10  ;;  %7556 = vst [vmem:[#allocation83_spill] sm:$0xff] %v6321_v53 }
 0x2d4   : > { %1668 = vmin.xlane.f32.xlu1 %v1667_v22  ;;  %v1688_v22 = vand.u32 65535, %v5588_v34  ;;  %v7560_v34 = vld [vmem:[#allocation127_spill] sm:$0xff] }
 0x2d5   : > { %vm2142_vm11 = vcmp.eq.f32.partialorder %v7560_v34, %v6321_v53 }
 0x2d6   : > { %v6328_v10 = vpop.xlane.xlu1 %2168 }
 0x2d7   : > { %v6310_v19 = vpop.xlane.xlu0 %1650  ;;  %7559 = vst [vmem:[#allocation91_spill] sm:$0xff] %v6328_v10 }
 0x2d8   : > { %vm1652_vm5 = vcmp.eq.f32.partialorder %v5566_v15, %v6310_v19  ;;  %2116 = vmin.xlane.f32.xlu1 %v2115_v50  ;;  %v1690_v15 = vcvt.s32.f32 %v1688_v22  ;;  %v7562_v22 = vld [vmem:[#allocation166_spill] sm:$0xff] }
 0x2d9   : > { %v1653_v60 = vsel %vm1652_vm5, %v1648_v8, inf  ;;  %v2138_v8 = vcvt.s32.f32 %v2136_v6 }
 0x2da   : > { %v6336_v7 = vpop.xlane.xlu1 %2196 }
 0x2db   : > { %v6316_v16 = vpop.xlane.xlu0 %2098 }
 0x2dc   : > { %7554 = vst [vmem:[#allocation84_spill] sm:$0xff] %v6316_v16  ;;  %vm2100_vm14 = vcmp.eq.f32.partialorder %v7555_v42, %v6316_v16  ;;  %1654 = vmin.xlane.f32.xlu1 %v1653_v60  ;;  %v7561_v60 = vld [vmem:[#allocation155_spill] sm:$0xff]  ;;  %v2122_v42 = vand.u32 65535, %v5651_v59  ;;  %v7565_v59 = vld [vmem:[#allocation134_spill] sm:$0xff] }
 0x2dd   : > { %v2101_v3 = vsel %vm2100_vm14, %v2096_v24, inf  ;;  %v1674_v24 = vand.u32 65535, %v7561_v60 }
 0x2de   : > { %2102 = vmin.xlane.f32.xlu0 %v2101_v3  ;;  %v2143_v3 = vsel %vm2142_vm11, %v2138_v8, inf  ;;  %v2164_v8 = vand.u32 65535, %v7565_v59 }
 0x2df   : > { %v6324_v14 = vpop.xlane.xlu0 %1692  ;;  %v6345_v53 = vpop.xlane.xlu1 %2224 }
 0x2e0   : > { %7558 = vst [vmem:[#allocation97_spill] sm:$0xff] %v6324_v14  ;;  %vm1694_vm1 = vcmp.eq.f32.partialorder %v5645_v4, %v6324_v14  ;;  %v7564_v14 = vld [vmem:[#allocation167_spill] sm:$0xff] }
 0x2e1   : > { %v1695_v45 = vsel %vm1694_vm1, %v1690_v15, inf  ;;  %v1676_v15 = vcvt.s32.f32 %v1674_v24  ;;  %v1716_v34 = vand.u32 65535, %v7564_v14 }
 0x2e2   : > { %1696 = vmin.xlane.f32.xlu1 %v1695_v45  ;;  %v2124_v45 = vcvt.s32.f32 %v2122_v42 }
 0x2e3   : > { %v6332_v50 = vpop.xlane.xlu0 %1678 }
 0x2e4   : > { %vm1680_vm5 = vcmp.eq.f32.partialorder %v7562_v22, %v6332_v50  ;;  %v2166_v22 = vcvt.s32.f32 %v2164_v8 }
 0x2e5   : > { %v1681_v6 = vsel %vm1680_vm5, %v1676_v15, inf  ;;  %v7567_v15 = vld [vmem:[#allocation173_spill] sm:$0xff] }
 0x2e6   : > { %2144 = vmin.xlane.f32.xlu1 %v2143_v3  ;;  %v1718_v3 = vcvt.s32.f32 %v1716_v34 }
 0x2e7   : > { %v6340_v4 = vpop.xlane.xlu0 %2126  ;;  %v6352_v42 = vpop.xlane.xlu1 %2252 }
 0x2e8   : > { %7563 = vst [vmem:[#allocation98_spill] sm:$0xff] %v6340_v4  ;;  %vm2128_vm14 = vcmp.eq.f32.partialorder %v5726_v29, %v6340_v4  ;;  %v7566_v29 = vld [vmem:[#allocation22_spill] sm:$0xff] }
 0x2e9   : > { %v2129_v60 = vsel %vm2128_vm14, %v2124_v45, inf  ;;  %vm2170_vm11 = vcmp.eq.f32.partialorder %v7566_v29, %v6328_v10  ;;  %v1702_v45 = vand.u32 65535, %v7567_v15 }
 0x2ea   : > { %1682 = vmin.xlane.f32.xlu1 %v1681_v6  ;;  %2130 = vmin.xlane.f32.xlu0 %v2129_v60  ;;  %v7568_v6 = vld [vmem:[#allocation179_spill] sm:$0xff]  ;;  %v2171_v59 = vsel %vm2170_vm11, %v2166_v22, inf }
 0x2eb   : > { %v6348_v16 = vpop.xlane.xlu0 %1720  ;;  %v2150_v60 = vand.u32 65535, %v7568_v6  ;;  %v1704_v34 = vcvt.s32.f32 %v1702_v45  ;;  %v7569_v22 = vld [vmem:[#allocation147_spill] sm:$0xff] }
 0x2ec   : > { %vm1722_vm1 = vcmp.eq.f32.partialorder %v5760_v57, %v6348_v16  ;;  %v2192_v15 = vand.u32 65535, %v7569_v22 }
 0x2ed   : > { %v1723_v24 = vsel %vm1722_vm1, %v1718_v3, inf  ;;  %v2152_v3 = vcvt.s32.f32 %v2150_v60 }
 0x2ee   : > { %1724 = vmin.xlane.f32.xlu1 %v1723_v24  ;;  %v1744_v24 = vand.u32 65535, %v5815_v49  ;;  %v7570_v49 = vld [vmem:[#allocation23_spill] sm:$0xff]  ;;  %v2194_v60 = vcvt.s32.f32 %v2192_v15 }
 0x2ef   : > { %v6356_v14 = vpop.xlane.xlu0 %1706  ;;  %v6360_v4 = vpop.xlane.xlu1 %2280  ;;  %vm2198_vm11 = vcmp.eq.f32.partialorder %v7570_v49, %v6336_v7 }
 0x2f0   : > { %vm1708_vm5 = vcmp.eq.f32.partialorder %v5827_v43, %v6356_v14  ;;  %v1746_v10 = vcvt.s32.f32 %v1744_v24 }
 0x2f1   : > { %v1709_v8 = vsel %vm1708_vm5, %v1704_v34, inf  ;;  %v2178_v34 = vand.u32 65535, %v5905_v52  ;;  %v7571_v52 = vld [vmem:[#allocation158_spill] sm:$0xff] }
 0x2f2   : > { %2172 = vmin.xlane.f32.xlu1 %v2171_v59  ;;  %v1730_v59 = vand.u32 65535, %v5854_v26  ;;  %v2220_v15 = vand.u32 65535, %v7571_v52 }
 0x2f3   : > { %v6364_v57 = vpop.xlane.xlu0 %2154  ;;  %v2180_v24 = vcvt.s32.f32 %v2178_v34  ;;  %v1758_v34 = vand.u32 65535, %v5988_v35 }
 0x2f4   : > { %vm2156_vm14 = vcmp.eq.f32.partialorder %v5847_v44, %v6364_v57  ;;  %v6372_v43 = vpop.xlane.xlu1 %1860 }
 0x2f5   : > { %v2157_v29 = vsel %vm2156_vm14, %v2152_v3, inf  ;;  %v2199_v3 = vsel %vm2198_vm11, %v2194_v60, inf }
 0x2f6   : > { %1710 = vmin.xlane.f32.xlu1 %v1709_v8  ;;  %2158 = vmin.xlane.f32.xlu0 %v2157_v29  ;;  %v1772_v29 = vand.u32 65535, %v5952_v55  ;;  %v7572_v55 = vld [vmem:[#allocation161_spill] sm:$0xff] }
 0x2f7   : > { %v6370_v6 = vpop.xlane.xlu0 %1748  ;;  %vm2226_vm11 = vcmp.eq.f32.partialorder %v7572_v55, %v6345_v53 }
 0x2f8   : > { %vm1750_vm1 = vcmp.eq.f32.partialorder %v5892_v9, %v6370_v6  ;;  %v6382_v8 = vpop.xlane.xlu1 %2308  ;;  %v1774_v49 = vcvt.s32.f32 %v1772_v29  ;;  %v1760_v29 = vcvt.s32.f32 %v1758_v34  ;;  %v1786_v34 = vand.u32 65535, %v6080_v2 }
 0x2f9   : > { %v1751_v45 = vsel %vm1750_vm1, %v1746_v10, inf  ;;  %v1732_v10 = vcvt.s32.f32 %v1730_v59  ;;  %v2222_v59 = vcvt.s32.f32 %v2220_v15 }
 0x2fa   : > { %1752 = vmin.xlane.f32.xlu1 %v1751_v45 }
 0x2fb   : > { %v6378_v44 = vpop.xlane.xlu0 %1734 }
 0x2fc   : > { %vm1736_vm5 = vcmp.eq.f32.partialorder %v5939_v17, %v6378_v44  ;;  %v6394_v17 = vpop.xlane.xlu1 %1888 }
 0x2fd   : > { %v1737_v22 = vsel %vm1736_vm5, %v1732_v10, inf  ;;  %v2227_v10 = vsel %vm2226_vm11, %v2222_v59, inf }
 0x2fe   : > { %2200 = vmin.xlane.f32.xlu1 %v2199_v3  ;;  %v2206_v3 = vand.u32 65535, %v6058_v54  ;;  %v7573_v54 = vld [vmem:[#allocation170_spill] sm:$0xff] }
 0x2ff   : > { %v6386_v9 = vpop.xlane.xlu0 %2182  ;;  %v2248_v15 = vand.u32 65535, %v7573_v54  ;;  %v7575_v54 = vld [vmem:[#allocation182_spill] sm:$0xff] }
 0x300   : > { %vm2184_vm14 = vcmp.eq.f32.partialorder %v5982_v13, %v6386_v9 }
 0x301   : > { %v2185_v26 = vsel %vm2184_vm14, %v2180_v24, inf  ;;  %v6404_v24 = vpop.xlane.xlu1 %2336  ;;  %v2250_v59 = vcvt.s32.f32 %v2248_v15  ;;  %v2276_v15 = vand.u32 65535, %v7575_v54 }
 0x302   : > { %1738 = vmin.xlane.f32.xlu1 %v1737_v22  ;;  %2186 = vmin.xlane.f32.xlu0 %v2185_v26  ;;  %v2208_v22 = vcvt.s32.f32 %v2206_v3  ;;  %v1800_v26 = vand.u32 65535, %v6070_v12  ;;  %v7574_v12 = vld [vmem:[#allocation174_spill] sm:$0xff]  ;;  %v2234_v3 = vand.u32 65535, %v6089_v32 }
 0x303   : > { %v6392_v45 = vpop.xlane.xlu0 %1776  ;;  %vm2254_vm11 = vcmp.eq.f32.partialorder %v7574_v12, %v6352_v42 }
 0x304   : > { %vm1778_vm1 = vcmp.eq.f32.partialorder %v6034_v28, %v6392_v45 }
 0x305   : > { %v1779_v60 = vsel %vm1778_vm1, %v1774_v49, inf }
 0x306   : > { %1780 = vmin.xlane.f32.xlu1 %v1779_v60  ;;  %v1802_v60 = vcvt.s32.f32 %v1800_v26  ;;  %v1788_v26 = vcvt.s32.f32 %v1786_v34  ;;  %v2632_v34 = vld [vmem:[#allocation3 + $0x8] sm:$0xff] }
 0x307   : > { %v6400_v13 = vpop.xlane.xlu0 %1762 }
 0x308   : > { %vm1764_vm5 = vcmp.eq.f32.partialorder %v6066_v31, %v6400_v13  ;;  %v6416_v31 = vpop.xlane.xlu1 %1916 }
 0x309   : > { %v1765_v52 = vsel %vm1764_vm5, %v1760_v29, inf }
 0x30a   : > { %2228 = vmin.xlane.f32.xlu1 %v2227_v10  ;;  %v2255_v10 = vsel %vm2254_vm11, %v2250_v59, inf  ;;  %vm2282_vm11 = vcmp.eq.f32.partialorder %v5809_v27, %v6360_v4  ;;  %v7578_v27 = vld [vmem:[#allocation187_spill] sm:$0xff] }
 0x30b   : > { %v6408_v28 = vpop.xlane.xlu0 %2210 }
 0x30c   : > { %vm2212_vm14 = vcmp.eq.f32.partialorder %v6076_v41, %v6408_v28  ;;  %v6426_v29 = vpop.xlane.xlu1 %2364 }
 0x30d   : > { %v2213_v35 = vsel %vm2212_vm14, %v2208_v22, inf }
 0x30e   : > { %1766 = vmin.xlane.f32.xlu1 %v1765_v52  ;;  %2214 = vmin.xlane.f32.xlu0 %v2213_v35  ;;  %v2236_v52 = vcvt.s32.f32 %v2234_v3  ;;  %v1828_v35 = vand.u32 65535, %v6098_v62 }
 0x30f   : > { %v6414_v49 = vpop.xlane.xlu0 %1804 }
 0x310   : > { %vm1806_vm1 = vcmp.eq.f32.partialorder %v6085_v61, %v6414_v49  ;;  %v1503_v61 = vcvt.f32.s32 %v6116_v38  ;;  %v1830_v59 = vcvt.s32.f32 %v1828_v35  ;;  %v2631_v35 = vld [vmem:[#allocation3] sm:$0xff] }
 0x311   : > { %v1807_v55 = vsel %vm1806_vm1, %v1802_v60, inf }
 0x312   : > { %1808 = vmin.xlane.f32.xlu1 %v1807_v55  ;;  %v1504_v55 = vshll.u32 %v1503_v61, 16 }
 0x313   : > { %v6422_v41 = vpop.xlane.xlu0 %1790 }
 0x314   : > { %vm1792_vm5 = vcmp.eq.f32.partialorder %v6094_v23, %v6422_v41  ;;  %v1951_v23 = vcvt.f32.s32 %v6114_v21  ;;  %v2262_v21 = vand.u32 65535, %v6126_v58 }
 0x315   : > { %v1793_v2 = vsel %vm1792_vm5, %v1788_v26, inf  ;;  %v1814_v26 = vand.u32 65535, %v6108_v5 }
 0x316   : > { %2256 = vmin.xlane.f32.xlu1 %v2255_v10  ;;  %v2278_v10 = vcvt.s32.f32 %v2276_v15  ;;  %v1952_v61 = vshll.u32 %v1951_v23, 16  ;;  %v2664_v15 = vld [vmem:[#allocation3 + $0x108] sm:$0xff] }
 0x317   : > { %v6431_v22 = vpop.xlane.xlu0 %2238  ;;  %v1501_v60 = vpop.xlane.xlu1 %1500  ;;  %v1816_v58 = vcvt.s32.f32 %v1814_v26 }
 0x318   : > { %vm2240_vm14 = vcmp.eq.f32.partialorder %v6104_v0, %v6431_v22  ;;  %v1502_v38 = vcvt.f32.s32 %v1501_v60 }
 0x319   : > { %v2241_v32 = vsel %vm2240_vm14, %v2236_v52, inf  ;;  %v1489_v52 = vcvt.f32.s32 %v6132_v1  ;;  %v2264_v1 = vcvt.s32.f32 %v2262_v21 }
 0x31a   : > { %1794 = vmin.xlane.f32.xlu1 %v1793_v2  ;;  %2242 = vmin.xlane.f32.xlu0 %v2241_v32  ;;  %v1505_v62 = vadd.s32 %v1504_v55, %v1502_v38  ;;  %v2283_v55 = vsel %vm2282_vm11, %v2278_v10, inf  ;;  %v1856_v38 = vand.u32 65535, %v7578_v27  ;;  %v1531_v10 = vcvt.f32.s32 %v6160_v36 }
 0x31b   : > { %v6438_v12 = vpop.xlane.xlu0 %1832  ;;  %v1949_v3 = vpop.xlane.xlu1 %1948  ;;  %v1490_v23 = vshll.u32 %v1489_v52, 16  ;;  %v7581_v52 = vld [vmem:[#allocation193_spill] sm:$0xff] }
 0x31c   : > { %vm1834_vm1 = vcmp.eq.f32.partialorder %v6120_v33, %v6438_v12  ;;  %v2696_v32 = vsel %vm2439_vm4, %v1505_v62, %v2632_v34  ;;  %v1950_v33 = vcvt.f32.s32 %v1949_v3  ;;  %v2304_v2 = vand.u32 65535, %v7581_v52 }
 0x31d   : > { %v1835_v0 = vsel %vm1834_vm1, %v1830_v59, inf  ;;  %2760 = vst.msk [vmem:[#allocation3 + $0x8] sm:$0xff] %vm2566_vm2, %v2696_v32  ;;  %v7582_v32 = vld [vmem:[#allocation190_spill] sm:$0xff] }
 0x31e   : > { %1836 = vmin.xlane.f32.xlu1 %v1835_v0  ;;  %v1953_v60 = vadd.s32 %v1952_v61, %v1950_v33  ;;  %v1842_v61 = vand.u32 65535, %v6140_v56 }
 0x31f   : > { %v6450_v54 = vpop.xlane.xlu0 %1818  ;;  %v1487_v5 = vpop.xlane.xlu1 %1486 }
 0x320   : > { %vm1820_vm5 = vcmp.eq.f32.partialorder %v6134_v48, %v6450_v54  ;;  %v2728_v62 = vsel %vm2471_vm3, %v1953_v60, %v2664_v15  ;;  %v1488_v0 = vcvt.f32.s32 %v1487_v5  ;;  %vm1862_vm3 = vcmp.eq.f32.partialorder %v7582_v32, %v6372_v43  ;;  %v7597_v32 = vld [vmem:[#allocation46_spill] sm:$0xff] }
 0x321   : > { %2792 = vst.msk [vmem:[#allocation3 + $0x108] sm:$0xff] %vm2566_vm2, %v2728_v62  ;;  %v1821_v26 = vsel %vm1820_vm5, %v1816_v58, inf  ;;  %v1844_v27 = vcvt.s32.f32 %v1842_v61  ;;  %v1979_v5 = vcvt.f32.s32 %v6158_v40  ;;  %v1532_v58 = vshll.u32 %v1531_v10, 16  ;;  %v7585_v62 = vld [vmem:[#allocation199_spill] sm:$0xff] }
 0x322   : > { %2284 = vmin.xlane.f32.xlu1 %v2283_v55  ;;  %v1491_v48 = vadd.s32 %v1490_v23, %v1488_v0  ;;  %v1858_v55 = vcvt.s32.f32 %v1856_v38  ;;  %v2634_v23 = vld [vmem:[#allocation3 + $0x18] sm:$0xff]  ;;  %v1884_v0 = vand.u32 65535, %v7585_v62  ;;  %v7586_v38 = vld [vmem:[#allocation196_spill] sm:$0xff]  ;;  %v1517_v40 = vcvt.f32.s32 %v6176_v30  ;;  %v7593_v62 = vld [vmem:[#allocation25_spill] sm:$0xff] }
 0x323   : > { %v6459_v3 = vpop.xlane.xlu0 %2266  ;;  %v2306_v10 = vcvt.s32.f32 %v2304_v2  ;;  %v7592_v2 = vld [vmem:[#allocation202_spill] sm:$0xff] }
 0x324   : > { %vm2268_vm4 = vcmp.eq.f32.partialorder %v6148_v63, %v6459_v3  ;;  %v2695_v36 = vsel %vm2438_vm7, %v1491_v48, %v2631_v35  ;;  %v2290_v63 = vand.u32 65535, %v6152_v39  ;;  %v1863_v59 = vsel %vm1862_vm3, %v1858_v55, inf }
 0x325   : > { %v2269_v21 = vsel %vm2268_vm4, %v2264_v1, inf  ;;  %v1529_v15 = vpop.xlane.xlu1 %1528  ;;  %2759 = vst.msk [vmem:[#allocation3] sm:$0xff] %vm2566_vm2, %v2695_v36  ;;  %vm2310_vm7 = vcmp.eq.f32.partialorder %v7586_v38, %v6382_v8  ;;  %v7590_v36 = vld [vmem:[#allocation42_spill] sm:$0xff]  ;;  %vm1890_vm11 = vcmp.eq.f32.partialorder %v7592_v2, %v6394_v17  ;;  %v7594_v38 = vld [vmem:[#allocation27_spill] sm:$0xff] }
 0x326   : > { %1822 = vmin.xlane.f32.xlu1 %v1821_v26  ;;  %2270 = vmin.xlane.f32.xlu0 %v2269_v21  ;;  %v1530_v1 = vcvt.f32.s32 %v1529_v15  ;;  %v2292_v48 = vcvt.s32.f32 %v2290_v63  ;;  %v7587_v26 = vld [vmem:[#allocation24_spill] sm:$0xff]  ;;  %v1980_v21 = vshll.u32 %v1979_v5, 16  ;;  %v2666_v15 = vld [vmem:[#allocation3 + $0x118] sm:$0xff]  ;;  %v2311_v30 = vsel %vm2310_vm7, %v2306_v10, inf }
 0x327   : > { %v6472_v60 = vpop.xlane.xlu0 %1846  ;;  %v1518_v5 = vshll.u32 %v1517_v40, 16  ;;  %v2633_v40 = vld [vmem:[#allocation3 + $0x10] sm:$0xff] }
 0x328   : > { %vm1848_vm14 = vcmp.eq.f32.partialorder %v6162_v11, %v6472_v60  ;;  %v1533_v35 = vadd.s32 %v1532_v58, %v1530_v1  ;;  %v1870_v11 = vand.u32 65535, %v7587_v26 }
 0x329   : > { %v1849_v34 = vsel %vm1848_vm14, %v1844_v27, inf  ;;  %v1977_v39 = vpop.xlane.xlu1 %1976  ;;  %v7591_v27 = vld [vmem:[#allocation205_spill] sm:$0xff] }
 0x32a   : > { %1864 = vmin.xlane.f32.xlu1 %v1863_v59  ;;  %1850 = vmin.xlane.f32.xlu0 %v1849_v34  ;;  %v2698_v33 = vsel %vm2441_vm8, %v1533_v35, %v2634_v23  ;;  %v1978_v56 = vcvt.f32.s32 %v1977_v39  ;;  %v2332_v58 = vand.u32 65535, %v7591_v27  ;;  %v1886_v59 = vcvt.s32.f32 %v1884_v0 }
 0x32b   : > { %v6483_v61 = vpop.xlane.xlu0 %2294  ;;  %2762 = vst.msk [vmem:[#allocation3 + $0x18] sm:$0xff] %vm2566_vm2, %v2698_v33  ;;  %v1872_v34 = vcvt.s32.f32 %v1870_v11  ;;  %v2318_v35 = vand.u32 65535, %v7593_v62  ;;  %v1559_v39 = vcvt.f32.s32 %v7594_v38  ;;  %v7601_v62 = vld [vmem:[#allocation50_spill] sm:$0xff] }
 0x32c   : > { %vm2296_vm1 = vcmp.eq.f32.partialorder %v7590_v36, %v6483_v61  ;;  %v1981_v63 = vadd.s32 %v1980_v21, %v1978_v56  ;;  %v1891_v0 = vsel %vm1890_vm11, %v1886_v59, inf  ;;  %v7598_v21 = vld [vmem:[#allocation208_spill] sm:$0xff]  ;;  %v2334_v56 = vcvt.s32.f32 %v2332_v58  ;;  %v7599_v36 = vld [vmem:[#allocation26_spill] sm:$0xff]  ;;  %v2636_v58 = vld [vmem:[#allocation3 + $0x28] sm:$0xff] }
 0x32d   : > { %v2297_v55 = vsel %vm2296_vm1, %v2292_v48, inf  ;;  %v1515_v1 = vpop.xlane.xlu1 %1514  ;;  %vm2338_vm5 = vcmp.eq.f32.partialorder %v7598_v21, %v6404_v24  ;;  %v2320_v27 = vcvt.s32.f32 %v2318_v35  ;;  %v1898_v38 = vand.u32 65535, %v7601_v62  ;;  %v7608_v62 = vld [vmem:[#allocation218_spill] sm:$0xff] }
 0x32e   : > { %2312 = vmin.xlane.f32.xlu1 %v2311_v30  ;;  %2298 = vmin.xlane.f32.xlu0 %v2297_v55  ;;  %v2730_v26 = vsel %vm2473_vm12, %v1981_v63, %v2666_v15  ;;  %v1516_v52 = vcvt.f32.s32 %v1515_v1  ;;  %v2007_v15 = vcvt.f32.s32 %v7599_v36  ;;  %v7600_v63 = vld [vmem:[#allocation211_spill] sm:$0xff]  ;;  %v1560_v2 = vshll.u32 %v1559_v39, 16 }
 0x32f   : > { %v6495_v23 = vpop.xlane.xlu0 %1874  ;;  %2794 = vst.msk [vmem:[#allocation3 + $0x118] sm:$0xff] %vm2566_vm2, %v2730_v26  ;;  %v1912_v1 = vand.u32 65535, %v7600_v63  ;;  %v2339_v35 = vsel %vm2338_vm5, %v2334_v56, inf  ;;  %v1900_v63 = vcvt.s32.f32 %v1898_v38  ;;  %v2346_v59 = vand.u32 65535, %v7608_v62  ;;  %v7612_v38 = vld [vmem:[#allocation216_spill] sm:$0xff] }
 0x330   : > { %vm1876_vm8 = vcmp.eq.f32.partialorder %v7597_v32, %v6495_v23  ;;  %v1519_v33 = vadd.s32 %v1518_v5, %v1516_v52  ;;  %v7604_v5 = vld [vmem:[#allocation60_spill] sm:$0xff]  ;;  %v7605_v52 = vld [vmem:[#allocation214_spill] sm:$0xff]  ;;  %v7606_v32 = vld [vmem:[#allocation215_spill] sm:$0xff]  ;;  %v2008_v21 = vshll.u32 %v2007_v15, 16  ;;  %vm2366_vm3 = vcmp.eq.f32.partialorder %v7612_v38, %v6426_v29 }
 0x331   : > { %v1877_v11 = vsel %vm1876_vm8, %v1872_v34, inf  ;;  %v1557_v30 = vpop.xlane.xlu1 %1556  ;;  %vm1918_vm4 = vcmp.eq.f32.partialorder %v7605_v52, %v6416_v31  ;;  %v1587_v62 = vcvt.f32.s32 %v6239_v25  ;;  %v2638_v38 = vld [vmem:[#allocation3 + $0x38] sm:$0xff] }
 0x332   : > { %1892 = vmin.xlane.f32.xlu1 %v1891_v0  ;;  %1878 = vmin.xlane.f32.xlu0 %v1877_v11  ;;  %v2697_v10 = vsel %vm2440_vm0, %v1519_v33, %v2633_v40  ;;  %v1558_v48 = vcvt.f32.s32 %v1557_v30  ;;  %v2360_v40 = vand.u32 65535, %v7606_v32  ;;  %v7607_v0 = vld [vmem:[#allocation63_spill] sm:$0xff]  ;;  %v1914_v30 = vcvt.s32.f32 %v1912_v1 }
 0x333   : > { %v6511_v55 = vpop.xlane.xlu0 %2322  ;;  %2761 = vst.msk [vmem:[#allocation3 + $0x10] sm:$0xff] %vm2566_vm2, %v2697_v10  ;;  %v1545_v11 = vcvt.f32.s32 %v7607_v0 }
 0x334   : > { %vm2324_vm12 = vcmp.eq.f32.partialorder %v7604_v5, %v6511_v55  ;;  %v1561_v39 = vadd.s32 %v1560_v2, %v1558_v48  ;;  %v7611_v2 = vld [vmem:[#allocation67_spill] sm:$0xff]  ;;  %v2668_v48 = vld [vmem:[#allocation3 + $0x128] sm:$0xff]  ;;  %v1919_v5 = vsel %vm1918_vm4, %v1914_v30, inf  ;;  %v2362_v0 = vcvt.s32.f32 %v2360_v40 }
 0x335   : > { %v2325_v26 = vsel %vm2324_vm12, %v2320_v27, inf  ;;  %v2005_v33 = vpop.xlane.xlu1 %2004  ;;  %v7616_v27 = vld [vmem:[#allocation77_spill] sm:$0xff] }
 0x336   : > { %2340 = vmin.xlane.f32.xlu1 %v2339_v35  ;;  %2326 = vmin.xlane.f32.xlu0 %v2325_v26  ;;  %v2700_v34 = vsel %vm2443_vm6, %v1561_v39, %v2636_v58  ;;  %v2006_v10 = vcvt.f32.s32 %v2005_v33  ;;  %v7613_v35 = vld [vmem:[#allocation217_spill] sm:$0xff]  ;;  %v1546_v26 = vshll.u32 %v1545_v11, 16  ;;  %v2348_v33 = vcvt.s32.f32 %v2346_v59 }
 0x337   : > { %v6528_v36 = vpop.xlane.xlu0 %1902  ;;  %2764 = vst.msk [vmem:[#allocation3 + $0x28] sm:$0xff] %vm2566_vm2, %v2700_v34  ;;  %v1937_v58 = vcvt.f32.s32 %v7613_v35  ;;  %v2367_v11 = vsel %vm2366_vm3, %v2362_v0, inf  ;;  %v1965_v59 = vcvt.f32.s32 %v6190_v20  ;;  %v1993_v20 = vcvt.f32.s32 %v6228_v51  ;;  %v2665_v51 = vld [vmem:[#allocation3 + $0x110] sm:$0xff] }
 0x338   : > { %vm1904_vm0 = vcmp.eq.f32.partialorder %v7611_v2, %v6528_v36  ;;  %v2009_v15 = vadd.s32 %v2008_v21, %v2006_v10  ;;  %v2635_v21 = vld [vmem:[#allocation3 + $0x20] sm:$0xff]  ;;  %v7617_v10 = vld [vmem:[#allocation43_spill] sm:$0xff] }
 0x339   : > { %v1905_v1 = vsel %vm1904_vm0, %v1900_v63, inf  ;;  %v1543_v39 = vpop.xlane.xlu1 %1542  ;;  %v1938_v25 = vshll.u32 %v1937_v58, 16  ;;  %v2035_v2 = vcvt.f32.s32 %v7617_v10  ;;  %v1966_v58 = vshll.u32 %v1965_v59, 16 }
 0x33a   : > { %1920 = vmin.xlane.f32.xlu1 %v1919_v5  ;;  %1906 = vmin.xlane.f32.xlu0 %v1905_v1  ;;  %v2732_v30 = vsel %vm2475_vm13, %v2009_v15, %v2668_v48  ;;  %v1544_v63 = vcvt.f32.s32 %v1543_v39  ;;  %v1588_v1 = vshll.u32 %v1587_v62, 16 }
 0x33b   : > { %v6543_v32 = vpop.xlane.xlu0 %2350  ;;  %2796 = vst.msk [vmem:[#allocation3 + $0x128] sm:$0xff] %vm2566_vm2, %v2732_v30  ;;  %v2036_v30 = vshll.u32 %v2035_v2, 16 }
 0x33c   : > { %vm2352_vm6 = vcmp.eq.f32.partialorder %v7616_v27, %v6543_v32  ;;  %v1547_v40 = vadd.s32 %v1546_v26, %v1544_v63  ;;  %v2663_v26 = vld [vmem:[#allocation3 + $0x100] sm:$0xff] }
 0x33d   : > { %v2353_v34 = vsel %vm2352_vm6, %v2348_v33, inf  ;;  %v1585_v48 = vpop.xlane.xlu1 %1584  ;;  %v7620_v63 = vld [vmem:[#allocation80_spill] sm:$0xff] }
 0x33e   : > { %2368 = vmin.xlane.f32.xlu1 %v2367_v11  ;;  %2354 = vmin.xlane.f32.xlu0 %v2353_v34  ;;  %v2699_v39 = vsel %vm2442_vm9, %v1547_v40, %v2635_v21  ;;  %v1586_v56 = vcvt.f32.s32 %v1585_v48  ;;  %v1573_v27 = vcvt.f32.s32 %v7620_v63  ;;  %v7623_v40 = vld [vmem:[#allocation38_spill] sm:$0xff]  ;;  %v7624_v48 = vld [vmem:[#allocation36_spill] sm:$0xff] }
 0x33f   : > { %v1935_v5 = vpop.xlane.xlu0 %1934  ;;  %2763 = vst.msk [vmem:[#allocation3 + $0x20] sm:$0xff] %vm2566_vm2, %v2699_v39  ;;  %vm7625_vm9 = vcmp.lt.f32.partialorder %v7623_v40, %v7624_v48  ;;  %v7627_v34 = vld [vmem:[#allocation68_spill] sm:$0xff] }
 0x340   : > { %v1936_v52 = vcvt.f32.s32 %v1935_v5  ;;  %v1589_v0 = vadd.s32 %v1588_v1, %v1586_v56  ;;  %v1994_v1 = vshll.u32 %v1993_v20, 16  ;;  %v1574_v39 = vshll.u32 %v1573_v27, 16  ;;  %v7626_v56 = vld [vmem:[#allocation47_spill] sm:$0xff] }
 0x341   : > { %v2033_v11 = vpop.xlane.xlu1 %2032  ;;  %v2063_v27 = vcvt.f32.s32 %v6262_v47  ;;  %v2669_v47 = vld [vmem:[#allocation3 + $0x130] sm:$0xff] }
 0x342   : > { %v1939_v33 = vadd.s32 %v1938_v25, %v1936_v52  ;;  %v2702_v21 = vsel %vm2445_vm10, %v1589_v0, %v2638_v38  ;;  %v2034_v15 = vcvt.f32.s32 %v2033_v11  ;;  %v2670_v25 = vld [vmem:[#allocation3 + $0x138] sm:$0xff]  ;;  %v2021_v52 = vcvt.f32.s32 %v7626_v56  ;;  %v7630_v11 = vld [vmem:[#allocation44_spill] sm:$0xff]  ;;  %v7637_v56 = vld [vmem:[#allocation54_spill] sm:$0xff] }
 0x343   : > { %v1963_v62 = vpop.xlane.xlu0 %1962  ;;  %2766 = vst.msk [vmem:[#allocation3 + $0x38] sm:$0xff] %vm2566_vm2, %v2702_v21  ;;  %v1615_v38 = vcvt.f32.s32 %v6264_v18 }
 0x344   : > { %v2727_v5 = vsel %vm7625_vm9, %v1939_v33, %v2663_v26  ;;  %v1964_v35 = vcvt.f32.s32 %v1963_v62  ;;  %v2037_v59 = vadd.s32 %v2036_v30, %v2034_v15  ;;  %v7628_v26 = vld [vmem:[#allocation65_spill] sm:$0xff]  ;;  %v7631_v62 = vld [vmem:[#allocation40_spill] sm:$0xff]  ;;  %v2022_v48 = vshll.u32 %v2021_v52, 16 }
 0x345   : > { %2791 = vst.msk [vmem:[#allocation3 + $0x100] sm:$0xff] %vm2566_vm2, %v2727_v5  ;;  %v1571_v0 = vpop.xlane.xlu1 %1570  ;;  %vm7629_vm13 = vcmp.lt.f32.partialorder %v7627_v34, %v7628_v26  ;;  %vm7632_vm10 = vcmp.lt.f32.partialorder %v7630_v11, %v7631_v62  ;;  %v2667_v30 = vld [vmem:[#allocation3 + $0x120] sm:$0xff]  ;;  %v1616_v5 = vshll.u32 %v1615_v38, 16  ;;  %v7639_v38 = vld [vmem:[#allocation55_spill] sm:$0xff] }
 0x346   : > { %v1967_v2 = vadd.s32 %v1966_v58, %v1964_v35  ;;  %v2734_v33 = vsel %vm7629_vm13, %v2037_v59, %v2670_v25  ;;  %v1572_v21 = vcvt.f32.s32 %v1571_v0  ;;  %v2637_v58 = vld [vmem:[#allocation3 + $0x30] sm:$0xff]  ;;  %v7634_v59 = vld [vmem:[#allocation59_spill] sm:$0xff]  ;;  %v1601_v26 = vcvt.f32.s32 %v7639_v38 }
 0x347   : > { %v1991_v63 = vpop.xlane.xlu0 %1990  ;;  %2798 = vst.msk [vmem:[#allocation3 + $0x138] sm:$0xff] %vm2566_vm2, %v2734_v33  ;;  %v7633_v25 = vld [vmem:[#allocation62_spill] sm:$0xff]  ;;  %v7640_v33 = vld [vmem:[#allocation73_spill] sm:$0xff] }
 0x348   : > { %v2729_v10 = vsel %vm7632_vm10, %v1967_v2, %v2665_v51  ;;  %v1992_v40 = vcvt.f32.s32 %v1991_v63  ;;  %v1575_v20 = vadd.s32 %v1574_v39, %v1572_v21  ;;  %vm7635_vm14 = vcmp.lt.f32.partialorder %v7633_v25, %v7634_v59  ;;  %v7636_v2 = vld [vmem:[#allocation57_spill] sm:$0xff]  ;;  %v7641_v21 = vld [vmem:[#allocation74_spill] sm:$0xff] }
 0x349   : > { %2793 = vst.msk [vmem:[#allocation3 + $0x110] sm:$0xff] %vm2566_vm2, %v2729_v10  ;;  %v1613_v15 = vpop.xlane.xlu1 %1612  ;;  %vm7638_vm7 = vcmp.lt.f32.partialorder %v7636_v2, %v7637_v56  ;;  %v2049_v11 = vcvt.f32.s32 %v7640_v33  ;;  %v2064_v10 = vshll.u32 %v2063_v27, 16  ;;  %v7647_v27 = vld [vmem:[#allocation64_spill] sm:$0xff]  ;;  %v7648_v56 = vld [vmem:[#allocation81_spill] sm:$0xff] }
 0x34a   : > { %v1995_v18 = vadd.s32 %v1994_v1, %v1992_v40  ;;  %v2701_v51 = vsel %vm7635_vm14, %v1575_v20, %v2637_v58  ;;  %v1614_v63 = vcvt.f32.s32 %v1613_v15  ;;  %v2640_v1 = vld [vmem:[#allocation3 + $0x48] sm:$0xff]  ;;  %v7642_v40 = vld [vmem:[#allocation71_spill] sm:$0xff]  ;;  %v7645_v20 = vld [vmem:[#allocation66_spill] sm:$0xff]  ;;  %v1643_v2 = vcvt.f32.s32 %v7647_v27 }
 0x34b   : > { %v2019_v35 = vpop.xlane.xlu0 %2018  ;;  %2765 = vst.msk [vmem:[#allocation3 + $0x30] sm:$0xff] %vm2566_vm2, %v2701_v51  ;;  %vm7643_vm1 = vcmp.lt.f32.partialorder %v7641_v21, %v7642_v40  ;;  %v2050_v25 = vshll.u32 %v2049_v11, 16  ;;  %v7651_v33 = vld [vmem:[#allocation92_spill] sm:$0xff]  ;;  %v7659_v27 = vld [vmem:[#allocation85_spill] sm:$0xff] }
 0x34c   : > { %v2731_v0 = vsel %vm7638_vm7, %v1995_v18, %v2667_v30  ;;  %v2020_v34 = vcvt.f32.s32 %v2019_v35  ;;  %v1617_v39 = vadd.s32 %v1616_v5, %v1614_v63  ;;  %v7644_v30 = vld [vmem:[#allocation69_spill] sm:$0xff]  ;;  %v1602_v35 = vshll.u32 %v1601_v26, 16  ;;  %v7653_v21 = vld [vmem:[#allocation72_spill] sm:$0xff] }
 0x34d   : > { %2795 = vst.msk [vmem:[#allocation3 + $0x120] sm:$0xff] %vm2566_vm2, %v2731_v0  ;;  %v2061_v62 = vpop.xlane.xlu1 %2060  ;;  %vm7646_vm11 = vcmp.lt.f32.partialorder %v7644_v30, %v7645_v20  ;;  %v7649_v0 = vld [vmem:[#allocation78_spill] sm:$0xff]  ;;  %v1644_v11 = vshll.u32 %v1643_v2, 16  ;;  %v7656_v30 = vld [vmem:[#allocation79_spill] sm:$0xff] }
 0x34e   : > { %v2023_v52 = vadd.s32 %v2022_v48, %v2020_v34  ;;  %v2704_v58 = vsel %vm7643_vm1, %v1617_v39, %v2640_v1  ;;  %v2062_v15 = vcvt.f32.s32 %v2061_v62  ;;  %v2672_v48 = vld [vmem:[#allocation3 + $0x148] sm:$0xff]  ;;  %vm7650_vm8 = vcmp.lt.f32.partialorder %v7648_v56, %v7649_v0  ;;  %v2671_v39 = vld [vmem:[#allocation3 + $0x140] sm:$0xff]  ;;  %v2674_v0 = vld [vmem:[#allocation3 + $0x158] sm:$0xff] }
 0x34f   : > { %2768 = vst.msk [vmem:[#allocation3 + $0x48] sm:$0xff] %vm2566_vm2, %v2704_v58  ;;  %v2091_v62 = vcvt.f32.s32 %v7651_v33  ;;  %v7655_v58 = vld [vmem:[#allocation82_spill] sm:$0xff]  ;;  %v7663_v33 = vld [vmem:[#allocation93_spill] sm:$0xff] }
 0x350   : > { %v2733_v18 = vsel %vm7646_vm11, %v2023_v52, %v2669_v47  ;;  %v2065_v5 = vadd.s32 %v2064_v10, %v2062_v15  ;;  %v2639_v47 = vld [vmem:[#allocation3 + $0x40] sm:$0xff]  ;;  %v7652_v10 = vld [vmem:[#allocation75_spill] sm:$0xff]  ;;  %vm7657_vm12 = vcmp.lt.f32.partialorder %v7655_v58, %v7656_v30 }
 0x351   : > { %2797 = vst.msk [vmem:[#allocation3 + $0x130] sm:$0xff] %vm2566_vm2, %v2733_v18  ;;  %v1599_v59 = vpop.xlane.xlu1 %1598  ;;  %v2047_v51 = vpop.xlane.xlu0 %2046  ;;  %vm7654_vm5 = vcmp.lt.f32.partialorder %v7652_v10, %v7653_v21  ;;  %v2642_v15 = vld [vmem:[#allocation3 + $0x58] sm:$0xff]  ;;  %v2673_v10 = vld [vmem:[#allocation3 + $0x150] sm:$0xff]  ;;  %v7665_v58 = vld [vmem:[#allocation76_spill] sm:$0xff] }
 0x352   : > { %v2736_v63 = vsel %vm7650_vm8, %v2065_v5, %v2672_v48  ;;  %v1600_v34 = vcvt.f32.s32 %v1599_v59  ;;  %v2048_v1 = vcvt.f32.s32 %v2047_v51  ;;  %v1629_v5 = vcvt.f32.s32 %v6291_v37  ;;  %v7658_v51 = vld [vmem:[#allocation88_spill] sm:$0xff]  ;;  %v7662_v37 = vld [vmem:[#allocation95_spill] sm:$0xff] }
 0x353   : > { %2800 = vst.msk [vmem:[#allocation3 + $0x148] sm:$0xff] %vm2566_vm2, %v2736_v63  ;;  %v2092_v59 = vshll.u32 %v2091_v62, 16  ;;  %vm7660_vm4 = vcmp.lt.f32.partialorder %v7658_v51, %v7659_v27  ;;  %vm7664_vm0 = vcmp.lt.f32.partialorder %v7662_v37, %v7663_v33  ;;  %v2119_v30 = vcvt.f32.s32 %v7665_v58  ;;  %v2644_v27 = vld [vmem:[#allocation3 + $0x68] sm:$0xff] }
 0x354   : > { %v1603_v52 = vadd.s32 %v1602_v35, %v1600_v34  ;;  %v2051_v38 = vadd.s32 %v2050_v25, %v2048_v1  ;;  %v2077_v35 = vcvt.f32.s32 %v6296_v46  ;;  %v1630_v34 = vshll.u32 %v1629_v5, 16  ;;  %v2676_v37 = vld [vmem:[#allocation3 + $0x168] sm:$0xff] }
 0x355   : > { %v1641_v26 = vpop.xlane.xlu1 %1640 }
 0x356   : > { %v2703_v40 = vsel %vm7654_vm5, %v1603_v52, %v2639_v47  ;;  %v2735_v20 = vsel %vm7657_vm12, %v2051_v38, %v2671_v39  ;;  %v1642_v18 = vcvt.f32.s32 %v1641_v26  ;;  %v2078_v1 = vshll.u32 %v2077_v35, 16  ;;  %v7661_v52 = vld [vmem:[#allocation70_spill] sm:$0xff]  ;;  %v7669_v35 = vld [vmem:[#allocation96_spill] sm:$0xff] }
 0x357   : > { %2767 = vst.msk [vmem:[#allocation3 + $0x40] sm:$0xff] %vm2566_vm2, %v2703_v40  ;;  %2799 = vst.msk [vmem:[#allocation3 + $0x140] sm:$0xff] %vm2566_vm2, %v2735_v20  ;;  %v1671_v38 = vcvt.f32.s32 %v7661_v52 }
 0x358   : > { %v1645_v48 = vadd.s32 %v1644_v11, %v1642_v18  ;;  %v2641_v11 = vld [vmem:[#allocation3 + $0x50] sm:$0xff] }
 0x359   : > { %v2089_v25 = vpop.xlane.xlu1 %2088  ;;  %v1672_v18 = vshll.u32 %v1671_v38, 16 }
 0x35a   : > { %v2706_v2 = vsel %vm7660_vm4, %v1645_v48, %v2642_v15  ;;  %v2090_v56 = vcvt.f32.s32 %v2089_v25  ;;  %v7666_v15 = vld [vmem:[#allocation89_spill] sm:$0xff]  ;;  %v7667_v48 = vld [vmem:[#allocation86_spill] sm:$0xff] }
 0x35b   : > { %2770 = vst.msk [vmem:[#allocation3 + $0x58] sm:$0xff] %vm2566_vm2, %v2706_v2  ;;  %vm7668_vm3 = vcmp.lt.f32.partialorder %v7666_v15, %v7667_v48  ;;  %v7670_v25 = vld [vmem:[#allocation94_spill] sm:$0xff]  ;;  %v2675_v15 = vld [vmem:[#allocation3 + $0x160] sm:$0xff] }
 0x35c   : > { %v2093_v63 = vadd.s32 %v2092_v59, %v2090_v56  ;;  %vm7671_vm6 = vcmp.lt.f32.partialorder %v7669_v35, %v7670_v25  ;;  %v1657_v56 = vcvt.f32.s32 %v6310_v19  ;;  %v7677_v19 = vld [vmem:[#allocation15_spill] sm:$0xff] }
 0x35d   : > { %v1627_v47 = vpop.xlane.xlu1 %1626  ;;  %v2075_v39 = vpop.xlane.xlu0 %2074  ;;  %v7680_v35 = vld [vmem:[#allocation83_spill] sm:$0xff] }
 0x35e   : > { %v2738_v46 = vsel %vm7664_vm0, %v2093_v63, %v2674_v0  ;;  %v1628_v62 = vcvt.f32.s32 %v1627_v47  ;;  %v2076_v26 = vcvt.f32.s32 %v2075_v39  ;;  %v7672_v0 = vld [vmem:[#allocation84_spill] sm:$0xff]  ;;  %v7673_v47 = vld [vmem:[#allocation14_spill] sm:$0xff]  ;;  %v7674_v39 = vld [vmem:[#allocation99_spill] sm:$0xff]  ;;  %v2147_v25 = vcvt.f32.s32 %v7680_v35 }
 0x35f   : > { %2802 = vst.msk [vmem:[#allocation3 + $0x158] sm:$0xff] %vm2566_vm2, %v2738_v46  ;;  %v2105_v63 = vcvt.f32.s32 %v7672_v0  ;;  %vm7675_vm9 = vcmp.lt.f32.partialorder %v7673_v47, %v7674_v39  ;;  %v1658_v46 = vshll.u32 %v1657_v56, 16  ;;  %v7684_v0 = vld [vmem:[#allocation108_spill] sm:$0xff]  ;;  %v2646_v47 = vld [vmem:[#allocation3 + $0x78] sm:$0xff] }
 0x360   : > { %v1631_v21 = vadd.s32 %v1630_v34, %v1628_v62  ;;  %v2079_v40 = vadd.s32 %v2078_v1, %v2076_v26  ;;  %v2120_v1 = vshll.u32 %v2119_v30, 16 }
 0x361   : > { %v1669_v20 = vpop.xlane.xlu1 %1668  ;;  %v2106_v62 = vshll.u32 %v2105_v63, 16  ;;  %v7685_v63 = vld [vmem:[#allocation107_spill] sm:$0xff] }
 0x362   : > { %v2705_v5 = vsel %vm7668_vm3, %v1631_v21, %v2641_v11  ;;  %v2737_v59 = vsel %vm7671_vm6, %v2079_v40, %v2673_v10  ;;  %v1670_v51 = vcvt.f32.s32 %v1669_v20  ;;  %v7676_v10 = vld [vmem:[#allocation97_spill] sm:$0xff]  ;;  %v7678_v40 = vld [vmem:[#allocation106_spill] sm:$0xff]  ;;  %vm7686_vm14 = vcmp.lt.f32.partialorder %v7684_v0, %v7685_v63 }
 0x363   : > { %2769 = vst.msk [vmem:[#allocation3 + $0x50] sm:$0xff] %vm2566_vm2, %v2705_v5  ;;  %2801 = vst.msk [vmem:[#allocation3 + $0x150] sm:$0xff] %vm2566_vm2, %v2737_v59  ;;  %v1699_v21 = vcvt.f32.s32 %v7676_v10  ;;  %vm7679_vm13 = vcmp.lt.f32.partialorder %v7677_v19, %v7678_v40 }
 0x364   : > { %v1673_v2 = vadd.s32 %v1672_v18, %v1670_v51  ;;  %v2643_v18 = vld [vmem:[#allocation3 + $0x60] sm:$0xff] }
 0x365   : > { %v2117_v34 = vpop.xlane.xlu1 %2116  ;;  %v1700_v51 = vshll.u32 %v1699_v21, 16  ;;  %v2678_v21 = vld [vmem:[#allocation3 + $0x178] sm:$0xff] }
 0x366   : > { %v2708_v52 = vsel %vm7675_vm9, %v1673_v2, %v2644_v27  ;;  %v2118_v38 = vcvt.f32.s32 %v2117_v34  ;;  %v7681_v27 = vld [vmem:[#allocation102_spill] sm:$0xff]  ;;  %v7682_v2 = vld [vmem:[#allocation100_spill] sm:$0xff] }
 0x367   : > { %2772 = vst.msk [vmem:[#allocation3 + $0x68] sm:$0xff] %vm2566_vm2, %v2708_v52  ;;  %vm7683_vm10 = vcmp.lt.f32.partialorder %v7681_v27, %v7682_v2  ;;  %v1685_v52 = vcvt.f32.s32 %v6332_v50  ;;  %v7691_v50 = vld [vmem:[#allocation17_spill] sm:$0xff]  ;;  %v7694_v2 = vld [vmem:[#allocation91_spill] sm:$0xff] }
 0x368   : > { %v2121_v33 = vadd.s32 %v2120_v1, %v2118_v38  ;;  %v7687_v38 = vld [vmem:[#allocation98_spill] sm:$0xff] }
 0x369   : > { %v1655_v26 = vpop.xlane.xlu1 %1654  ;;  %v1686_v40 = vshll.u32 %v1685_v52, 16 }
 0x36a   : > { %v2740_v58 = vsel %vm7679_vm13, %v2121_v33, %v2676_v37  ;;  %v1656_v30 = vcvt.f32.s32 %v1655_v26  ;;  %v2133_v37 = vcvt.f32.s32 %v7687_v38  ;;  %v7689_v26 = vld [vmem:[#allocation110_spill] sm:$0xff] }
 0x36b   : > { %v2103_v11 = vpop.xlane.xlu0 %2102  ;;  %2804 = vst.msk [vmem:[#allocation3 + $0x168] sm:$0xff] %vm2566_vm2, %v2740_v58 }
 0x36c   : > { %v2104_v20 = vcvt.f32.s32 %v2103_v11  ;;  %v1659_v48 = vadd.s32 %v1658_v46, %v1656_v30  ;;  %v2148_v46 = vshll.u32 %v2147_v25, 16  ;;  %v2134_v58 = vshll.u32 %v2133_v37, 16  ;;  %v2645_v25 = vld [vmem:[#allocation3 + $0x70] sm:$0xff]  ;;  %v2648_v37 = vld [vmem:[#allocation3 + $0x88] sm:$0xff] }
 0x36e   : > { %v2107_v5 = vadd.s32 %v2106_v62, %v2104_v20  ;;  %v2707_v56 = vsel %vm7683_vm10, %v1659_v48, %v2643_v18  ;;  %v7688_v62 = vld [vmem:[#allocation16_spill] sm:$0xff]  ;;  %v1727_v18 = vcvt.f32.s32 %v6348_v16 }
 0x36f   : > { %v1697_v59 = vpop.xlane.xlu1 %1696  ;;  %2771 = vst.msk [vmem:[#allocation3 + $0x60] sm:$0xff] %vm2566_vm2, %v2707_v56  ;;  %vm7690_vm7 = vcmp.lt.f32.partialorder %v7688_v62, %v7689_v26  ;;  %v2175_v56 = vcvt.f32.s32 %v7694_v2  ;;  %v2161_v62 = vcvt.f32.s32 %v6364_v57 }
 0x370   : > { %v2739_v34 = vsel %vm7686_vm14, %v2107_v5, %v2675_v15  ;;  %v1698_v1 = vcvt.f32.s32 %v1697_v59  ;;  %v7692_v15 = vld [vmem:[#allocation117_spill] sm:$0xff]  ;;  %v2677_v59 = vld [vmem:[#allocation3 + $0x170] sm:$0xff]  ;;  %v1728_v63 = vshll.u32 %v1727_v18, 16 }
 0x371   : > { %2803 = vst.msk [vmem:[#allocation3 + $0x160] sm:$0xff] %vm2566_vm2, %v2739_v34  ;;  %vm7693_vm1 = vcmp.lt.f32.partialorder %v7691_v50, %v7692_v15  ;;  %v7695_v34 = vld [vmem:[#allocation113_spill] sm:$0xff]  ;;  %v2162_v18 = vshll.u32 %v2161_v62, 16 }
 0x372   : > { %v1701_v39 = vadd.s32 %v1700_v51, %v1698_v1  ;;  %v7696_v1 = vld [vmem:[#allocation111_spill] sm:$0xff] }
 0x373   : > { %v2145_v33 = vpop.xlane.xlu1 %2144  ;;  %vm7697_vm11 = vcmp.lt.f32.partialorder %v7695_v34, %v7696_v1  ;;  %v7707_v34 = vld [vmem:[#allocation125_spill] sm:$0xff]  ;;  %v7708_v1 = vld [vmem:[#allocation123_spill] sm:$0xff] }
 0x374   : > { %v2710_v11 = vsel %vm7690_vm7, %v1701_v39, %v2646_v47  ;;  %v2146_v10 = vcvt.f32.s32 %v2145_v33  ;;  %v7698_v47 = vld [vmem:[#allocation119_spill] sm:$0xff]  ;;  %v7699_v39 = vld [vmem:[#allocation118_spill] sm:$0xff]  ;;  %vm7709_vm4 = vcmp.lt.f32.partialorder %v7707_v34, %v7708_v1 }
 0x375   : > { %2774 = vst.msk [vmem:[#allocation3 + $0x78] sm:$0xff] %vm2566_vm2, %v2710_v11  ;;  %vm7700_vm8 = vcmp.lt.f32.partialorder %v7698_v47, %v7699_v39  ;;  %v2176_v11 = vshll.u32 %v2175_v56, 16  ;;  %v2203_v56 = vcvt.f32.s32 %v6336_v7  ;;  %v7711_v47 = vld [vmem:[#allocation129_spill] sm:$0xff]  ;;  %v2189_v7 = vcvt.f32.s32 %v6386_v9 }
 0x376   : > { %v2149_v19 = vadd.s32 %v2148_v46, %v2146_v10  ;;  %v1713_v46 = vcvt.f32.s32 %v6356_v14  ;;  %v7701_v10 = vld [vmem:[#allocation18_spill] sm:$0xff]  ;;  %v7704_v14 = vld [vmem:[#allocation19_spill] sm:$0xff] }
 0x377   : > { %v1683_v30 = vpop.xlane.xlu1 %1682  ;;  %v2131_v20 = vpop.xlane.xlu0 %2130  ;;  %v2204_v62 = vshll.u32 %v2203_v56, 16  ;;  %v7720_v56 = vld [vmem:[#allocation133_spill] sm:$0xff] }
 0x378   : > { %v2742_v48 = vsel %vm7693_vm1, %v2149_v19, %v2678_v21  ;;  %v1684_v5 = vcvt.f32.s32 %v1683_v30  ;;  %v2132_v35 = vcvt.f32.s32 %v2131_v20  ;;  %v7702_v21 = vld [vmem:[#allocation122_spill] sm:$0xff]  ;;  %v1714_v20 = vshll.u32 %v1713_v46, 16 }
 0x379   : > { %2806 = vst.msk [vmem:[#allocation3 + $0x178] sm:$0xff] %vm2566_vm2, %v2742_v48  ;;  %vm7703_vm5 = vcmp.lt.f32.partialorder %v7701_v10, %v7702_v21  ;;  %v1755_v48 = vcvt.f32.s32 %v6370_v6 }
 0x37a   : > { %v1687_v51 = vadd.s32 %v1686_v40, %v1684_v5  ;;  %v2135_v27 = vadd.s32 %v2134_v58, %v2132_v35  ;;  %v2680_v58 = vld [vmem:[#allocation3 + $0x188] sm:$0xff]  ;;  %v7705_v5 = vld [vmem:[#allocation128_spill] sm:$0xff] }
 0x37b   : > { %v1725_v0 = vpop.xlane.xlu1 %1724  ;;  %vm7706_vm12 = vcmp.lt.f32.partialorder %v7704_v14, %v7705_v5  ;;  %v2649_v5 = vld [vmem:[#allocation3 + $0x90] sm:$0xff] }
 0x37c   : > { %v2709_v16 = vsel %vm7697_vm11, %v1687_v51, %v2645_v25  ;;  %v2741_v52 = vsel %vm7700_vm8, %v2135_v27, %v2677_v59  ;;  %v1726_v38 = vcvt.f32.s32 %v1725_v0  ;;  %v2647_v59 = vld [vmem:[#allocation3 + $0x80] sm:$0xff] }
 0x37d   : > { %2773 = vst.msk [vmem:[#allocation3 + $0x70] sm:$0xff] %vm2566_vm2, %v2709_v16  ;;  %2805 = vst.msk [vmem:[#allocation3 + $0x170] sm:$0xff] %vm2566_vm2, %v2741_v52  ;;  %v2679_v51 = vld [vmem:[#allocation3 + $0x180] sm:$0xff] }
 0x37e   : > { %v1729_v33 = vadd.s32 %v1728_v63, %v1726_v38  ;;  %v1756_v63 = vshll.u32 %v1755_v48, 16  ;;  %v7710_v16 = vld [vmem:[#allocation20_spill] sm:$0xff]  ;;  %v2650_v38 = vld [vmem:[#allocation3 + $0x98] sm:$0xff] }
 0x37f   : > { %v2173_v26 = vpop.xlane.xlu1 %2172  ;;  %vm7712_vm0 = vcmp.lt.f32.partialorder %v7710_v16, %v7711_v47  ;;  %v1769_v47 = vcvt.f32.s32 %v6400_v13  ;;  %v7728_v13 = vld [vmem:[#allocation152_spill] sm:$0xff] }
 0x380   : > { %v2712_v19 = vsel %vm7703_vm5, %v1729_v33, %v2648_v37  ;;  %v2174_v40 = vcvt.f32.s32 %v2173_v26  ;;  %v1741_v33 = vcvt.f32.s32 %v6378_v44  ;;  %v7713_v26 = vld [vmem:[#allocation136_spill] sm:$0xff]  ;;  %v7716_v44 = vld [vmem:[#allocation141_spill] sm:$0xff] }
 0x381   : > { %2776 = vst.msk [vmem:[#allocation3 + $0x88] sm:$0xff] %vm2566_vm2, %v2712_v19  ;;  %v2682_v19 = vld [vmem:[#allocation3 + $0x198] sm:$0xff] }
 0x382   : > { %v2177_v30 = vadd.s32 %v2176_v11, %v2174_v40  ;;  %v7714_v11 = vld [vmem:[#allocation132_spill] sm:$0xff] }
 0x383   : > { %v1711_v50 = vpop.xlane.xlu1 %1710  ;;  %v2159_v15 = vpop.xlane.xlu0 %2158  ;;  %vm7715_vm3 = vcmp.lt.f32.partialorder %v7713_v26, %v7714_v11  ;;  %v1770_v26 = vshll.u32 %v1769_v47, 16 }
 0x384   : > { %v2744_v57 = vsel %vm7706_vm12, %v2177_v30, %v2680_v58  ;;  %v1712_v35 = vcvt.f32.s32 %v1711_v50  ;;  %v2160_v25 = vcvt.f32.s32 %v2159_v15  ;;  %v1742_v58 = vshll.u32 %v1741_v33, 16  ;;  %v7717_v15 = vld [vmem:[#allocation139_spill] sm:$0xff] }
 0x385   : > { %2808 = vst.msk [vmem:[#allocation3 + $0x188] sm:$0xff] %vm2566_vm2, %v2744_v57  ;;  %v2190_v30 = vshll.u32 %v2189_v7, 16  ;;  %v1783_v50 = vcvt.f32.s32 %v6392_v45  ;;  %vm7718_vm6 = vcmp.lt.f32.partialorder %v7716_v44, %v7717_v15  ;;  %v2681_v57 = vld [vmem:[#allocation3 + $0x190] sm:$0xff]  ;;  %v2259_v15 = vcvt.f32.s32 %v6352_v42 }
 0x386   : > { %v1715_v27 = vadd.s32 %v1714_v20, %v1712_v35  ;;  %v2163_v2 = vadd.s32 %v2162_v18, %v2160_v25  ;;  %v2245_v42 = vcvt.f32.s32 %v6431_v22 }
 0x387   : > { %v1753_v0 = vpop.xlane.xlu1 %1752 }
 0x388   : > { %v2711_v6 = vsel %vm7709_vm4, %v1715_v27, %v2647_v59  ;;  %v2743_v39 = vsel %vm7712_vm0, %v2163_v2, %v2679_v51  ;;  %v1754_v52 = vcvt.f32.s32 %v1753_v0  ;;  %v2231_v59 = vcvt.f32.s32 %v6345_v53  ;;  %v7719_v2 = vld [vmem:[#allocation137_spill] sm:$0xff]  ;;  %v7722_v0 = vld [vmem:[#allocation142_spill] sm:$0xff] }
 0x389   : > { %2775 = vst.msk [vmem:[#allocation3 + $0x80] sm:$0xff] %vm2566_vm2, %v2711_v6  ;;  %2807 = vst.msk [vmem:[#allocation3 + $0x180] sm:$0xff] %vm2566_vm2, %v2743_v39  ;;  %v1784_v27 = vshll.u32 %v1783_v50, 16  ;;  %vm7721_vm9 = vcmp.lt.f32.partialorder %v7719_v2, %v7720_v56  ;;  %v2652_v6 = vld [vmem:[#allocation3 + $0xa8] sm:$0xff]  ;;  %v2217_v53 = vcvt.f32.s32 %v6408_v28  ;;  %v1797_v2 = vcvt.f32.s32 %v6422_v41  ;;  %v7740_v41 = vld [vmem:[#allocation164_spill] sm:$0xff] }
 0x38a   : > { %v1757_v37 = vadd.s32 %v1756_v63, %v1754_v52  ;;  %v7723_v63 = vld [vmem:[#allocation140_spill] sm:$0xff]  ;;  %v2232_v52 = vshll.u32 %v2231_v59, 16 }
 0x38b   : > { %v2201_v46 = vpop.xlane.xlu1 %2200  ;;  %vm7724_vm13 = vcmp.lt.f32.partialorder %v7722_v0, %v7723_v63  ;;  %v2218_v11 = vshll.u32 %v2217_v53, 16  ;;  %v7737_v0 = vld [vmem:[#allocation159_spill] sm:$0xff]  ;;  %v7738_v63 = vld [vmem:[#allocation156_spill] sm:$0xff]  ;;  %v1798_v47 = vshll.u32 %v1797_v2, 16  ;;  %v2246_v53 = vshll.u32 %v2245_v42, 16  ;;  %v7752_v42 = vld [vmem:[#allocation177_spill] sm:$0xff] }
 0x38c   : > { %v2714_v10 = vsel %vm7715_vm3, %v1757_v37, %v2650_v38  ;;  %v2202_v21 = vcvt.f32.s32 %v2201_v46  ;;  %v7725_v38 = vld [vmem:[#allocation148_spill] sm:$0xff]  ;;  %v7726_v37 = vld [vmem:[#allocation145_spill] sm:$0xff]  ;;  %vm7739_vm11 = vcmp.lt.f32.partialorder %v7737_v0, %v7738_v63 }
 0x38d   : > { %2778 = vst.msk [vmem:[#allocation3 + $0x98] sm:$0xff] %vm2566_vm2, %v2714_v10  ;;  %vm7727_vm10 = vcmp.lt.f32.partialorder %v7725_v38, %v7726_v37  ;;  %v2684_v46 = vld [vmem:[#allocation3 + $0x1a8] sm:$0xff]  ;;  %v1839_v38 = vcvt.f32.s32 %v6438_v12  ;;  %v7741_v37 = vld [vmem:[#allocation162_spill] sm:$0xff]  ;;  %v2655_v63 = vld [vmem:[#allocation3 + $0xc0] sm:$0xff] }
 0x38e   : > { %v2205_v40 = vadd.s32 %v2204_v62, %v2202_v21  ;;  %vm7742_vm8 = vcmp.lt.f32.partialorder %v7740_v41, %v7741_v37  ;;  %v7758_v37 = vld [vmem:[#allocation178_spill] sm:$0xff] }
 0x38f   : > { %v1739_v20 = vpop.xlane.xlu1 %1738  ;;  %v2187_v18 = vpop.xlane.xlu0 %2186 }
 0x390   : > { %v2746_v9 = vsel %vm7718_vm6, %v2205_v40, %v2682_v19  ;;  %v1740_v48 = vcvt.f32.s32 %v1739_v20  ;;  %v2188_v14 = vcvt.f32.s32 %v2187_v18  ;;  %v1811_v19 = vcvt.f32.s32 %v6414_v49  ;;  %v7729_v40 = vld [vmem:[#allocation150_spill] sm:$0xff]  ;;  %v2651_v20 = vld [vmem:[#allocation3 + $0xa0] sm:$0xff] }
 0x391   : > { %2810 = vst.msk [vmem:[#allocation3 + $0x198] sm:$0xff] %vm2566_vm2, %v2746_v9  ;;  %vm7730_vm14 = vcmp.lt.f32.partialorder %v7728_v13, %v7729_v40  ;;  %v2683_v18 = vld [vmem:[#allocation3 + $0x1a0] sm:$0xff]  ;;  %v7744_v40 = vld [vmem:[#allocation157_spill] sm:$0xff] }
 0x392   : > { %v1743_v35 = vadd.s32 %v1742_v58, %v1740_v48  ;;  %v2191_v25 = vadd.s32 %v2190_v30, %v2188_v14  ;;  %v1812_v48 = vshll.u32 %v1811_v19, 16  ;;  %v7731_v14 = vld [vmem:[#allocation149_spill] sm:$0xff]  ;;  %v1840_v19 = vshll.u32 %v1839_v38, 16  ;;  %v7743_v13 = vld [vmem:[#allocation160_spill] sm:$0xff] }
 0x393   : > { %v1781_v51 = vpop.xlane.xlu1 %1780  ;;  %vm7745_vm5 = vcmp.lt.f32.partialorder %v7743_v13, %v7744_v40  ;;  %v7756_v38 = vld [vmem:[#allocation169_spill] sm:$0xff] }
 0x394   : > { %v2713_v45 = vsel %vm7721_vm9, %v1743_v35, %v2649_v5  ;;  %v2745_v34 = vsel %vm7724_vm13, %v2191_v25, %v2681_v57  ;;  %v1782_v1 = vcvt.f32.s32 %v1781_v51  ;;  %v7732_v5 = vld [vmem:[#allocation146_spill] sm:$0xff]  ;;  %v7734_v57 = vld [vmem:[#allocation153_spill] sm:$0xff]  ;;  %v7735_v35 = vld [vmem:[#allocation151_spill] sm:$0xff] }
 0x395   : > { %2777 = vst.msk [vmem:[#allocation3 + $0x90] sm:$0xff] %vm2566_vm2, %v2713_v45  ;;  %2809 = vst.msk [vmem:[#allocation3 + $0x190] sm:$0xff] %vm2566_vm2, %v2745_v34  ;;  %vm7733_vm7 = vcmp.lt.f32.partialorder %v7731_v14, %v7732_v5  ;;  %vm7736_vm1 = vcmp.lt.f32.partialorder %v7734_v57, %v7735_v35  ;;  %v2654_v51 = vld [vmem:[#allocation3 + $0xb8] sm:$0xff]  ;;  %v2260_v45 = vshll.u32 %v2259_v15, 16  ;;  %v7750_v14 = vld [vmem:[#allocation168_spill] sm:$0xff] }
 0x396   : > { %v1785_v16 = vadd.s32 %v1784_v27, %v1782_v1  ;;  %v2688_v57 = vld [vmem:[#allocation3 + $0x1c8] sm:$0xff] }
 0x397   : > { %v2229_v39 = vpop.xlane.xlu1 %2228 }
 0x398   : > { %v2716_v33 = vsel %vm7727_vm10, %v1785_v16, %v2652_v6  ;;  %v2230_v7 = vcvt.f32.s32 %v2229_v39  ;;  %v2686_v6 = vld [vmem:[#allocation3 + $0x1b8] sm:$0xff] }
 0x399   : > { %2780 = vst.msk [vmem:[#allocation3 + $0xa8] sm:$0xff] %vm2566_vm2, %v2716_v33 }
 0x39a   : > { %v2233_v62 = vadd.s32 %v2232_v52, %v2230_v7 }
 0x39b   : > { %v1767_v10 = vpop.xlane.xlu1 %1766  ;;  %v2215_v21 = vpop.xlane.xlu0 %2214 }
 0x39c   : > { %v2748_v28 = vsel %vm7730_vm14, %v2233_v62, %v2684_v46  ;;  %v1768_v58 = vcvt.f32.s32 %v1767_v10  ;;  %v2216_v30 = vcvt.f32.s32 %v2215_v21  ;;  %v2653_v46 = vld [vmem:[#allocation3 + $0xb0] sm:$0xff]  ;;  %v2287_v10 = vcvt.f32.s32 %v6360_v4 }
 0x39d   : > { %2812 = vst.msk [vmem:[#allocation3 + $0x1a8] sm:$0xff] %vm2566_vm2, %v2748_v28  ;;  %v2685_v62 = vld [vmem:[#allocation3 + $0x1b0] sm:$0xff]  ;;  %v7746_v28 = vld [vmem:[#allocation165_spill] sm:$0xff] }
 0x39e   : > { %v1771_v50 = vadd.s32 %v1770_v26, %v1768_v58  ;;  %v2219_v44 = vadd.s32 %v2218_v11, %v2216_v30  ;;  %v7747_v58 = vld [vmem:[#allocation163_spill] sm:$0xff]  ;;  %v2288_v15 = vshll.u32 %v2287_v10, 16  ;;  %v1895_v10 = vcvt.f32.s32 %v6394_v17 }
 0x39f   : > { %v1809_v9 = vpop.xlane.xlu1 %1808  ;;  %vm7748_vm12 = vcmp.lt.f32.partialorder %v7746_v28, %v7747_v58  ;;  %v7762_v28 = vld [vmem:[#allocation180_spill] sm:$0xff]  ;;  %v2690_v17 = vld [vmem:[#allocation3 + $0x1d8] sm:$0xff] }
 0x3a0   : > { %v2715_v49 = vsel %vm7733_vm7, %v1771_v50, %v2651_v20  ;;  %v2747_v25 = vsel %vm7736_vm1, %v2219_v44, %v2683_v18  ;;  %v1810_v59 = vcvt.f32.s32 %v1809_v9  ;;  %v2656_v18 = vld [vmem:[#allocation3 + $0xc8] sm:$0xff]  ;;  %v1825_v44 = vcvt.f32.s32 %v6450_v54 }
 0x3a1   : > { %2779 = vst.msk [vmem:[#allocation3 + $0xa0] sm:$0xff] %vm2566_vm2, %v2715_v49  ;;  %2811 = vst.msk [vmem:[#allocation3 + $0x1a0] sm:$0xff] %vm2566_vm2, %v2747_v25  ;;  %v2273_v9 = vcvt.f32.s32 %v6459_v3  ;;  %v1867_v25 = vcvt.f32.s32 %v6372_v43  ;;  %v2315_v43 = vcvt.f32.s32 %v6382_v8  ;;  %v2658_v8 = vld [vmem:[#allocation3 + $0xd8] sm:$0xff] }
 0x3a2   : > { %v1813_v27 = vadd.s32 %v1812_v48, %v1810_v59  ;;  %v7749_v48 = vld [vmem:[#allocation171_spill] sm:$0xff]  ;;  %v1826_v59 = vshll.u32 %v1825_v44, 16 }
 0x3a3   : > { %v2257_v56 = vpop.xlane.xlu1 %2256  ;;  %vm7751_vm4 = vcmp.lt.f32.partialorder %v7749_v48, %v7750_v14  ;;  %v2274_v2 = vshll.u32 %v2273_v9, 16  ;;  %v1896_v9 = vshll.u32 %v1895_v10, 16  ;;  %v2343_v48 = vcvt.f32.s32 %v6404_v24  ;;  %v2660_v24 = vld [vmem:[#allocation3 + $0xe8] sm:$0xff] }
 0x3a4   : > { %v2718_v34 = vsel %vm7739_vm11, %v1813_v27, %v2654_v51  ;;  %v2258_v1 = vcvt.f32.s32 %v2257_v56  ;;  %v1853_v51 = vcvt.f32.s32 %v6472_v60  ;;  %v7753_v56 = vld [vmem:[#allocation175_spill] sm:$0xff]  ;;  %v2301_v60 = vcvt.f32.s32 %v6483_v61  ;;  %v7781_v10 = vld [vmem:[#allocation201_spill] sm:$0xff] }
 0x3a5   : > { %2782 = vst.msk [vmem:[#allocation3 + $0xb8] sm:$0xff] %vm2566_vm2, %v2718_v34  ;;  %vm7754_vm0 = vcmp.lt.f32.partialorder %v7752_v42, %v7753_v56  ;;  %v2687_v34 = vld [vmem:[#allocation3 + $0x1c0] sm:$0xff] }
 0x3a6   : > { %v2261_v16 = vadd.s32 %v2260_v45, %v2258_v1  ;;  %v2659_v56 = vld [vmem:[#allocation3 + $0xe0] sm:$0xff] }
 0x3a7   : > { %v1795_v39 = vpop.xlane.xlu1 %1794  ;;  %v2243_v52 = vpop.xlane.xlu0 %2242 }
 0x3a8   : > { %v2750_v22 = vsel %vm7742_vm8, %v2261_v16, %v2686_v6  ;;  %v1796_v33 = vcvt.f32.s32 %v1795_v39  ;;  %v2244_v7 = vcvt.f32.s32 %v2243_v52  ;;  %v1868_v16 = vshll.u32 %v1867_v25, 16  ;;  %v7755_v52 = vld [vmem:[#allocation172_spill] sm:$0xff]  ;;  %v7768_v25 = vld [vmem:[#allocation185_spill] sm:$0xff] }
 0x3a9   : > { %2814 = vst.msk [vmem:[#allocation3 + $0x1b8] sm:$0xff] %vm2566_vm2, %v2750_v22  ;;  %vm7757_vm3 = vcmp.lt.f32.partialorder %v7755_v52, %v7756_v38  ;;  %v7759_v22 = vld [vmem:[#allocation176_spill] sm:$0xff] }
 0x3aa   : > { %v1799_v26 = vadd.s32 %v1798_v47, %v1796_v33  ;;  %v2247_v11 = vadd.s32 %v2246_v53, %v2244_v7  ;;  %v1854_v47 = vshll.u32 %v1853_v51, 16  ;;  %vm7760_vm6 = vcmp.lt.f32.partialorder %v7758_v37, %v7759_v22  ;;  %v7770_v51 = vld [vmem:[#allocation189_spill] sm:$0xff] }
 0x3ab   : > { %v1837_v21 = vpop.xlane.xlu1 %1836 }
 0x3ac   : > { %v2717_v12 = vsel %vm7745_vm5, %v1799_v26, %v2653_v46  ;;  %v2749_v30 = vsel %vm7748_vm12, %v2247_v11, %v2685_v62  ;;  %v1838_v20 = vcvt.f32.s32 %v1837_v21  ;;  %v2657_v62 = vld [vmem:[#allocation3 + $0xd0] sm:$0xff]  ;;  %v2316_v11 = vshll.u32 %v2315_v43, 16  ;;  %v7774_v43 = vld [vmem:[#allocation191_spill] sm:$0xff] }
 0x3ad   : > { %2781 = vst.msk [vmem:[#allocation3 + $0xb0] sm:$0xff] %vm2566_vm2, %v2717_v12  ;;  %2813 = vst.msk [vmem:[#allocation3 + $0x1b0] sm:$0xff] %vm2566_vm2, %v2749_v30  ;;  %v2302_v21 = vshll.u32 %v2301_v60, 16  ;;  %v7761_v12 = vld [vmem:[#allocation183_spill] sm:$0xff]  ;;  %v7764_v30 = vld [vmem:[#allocation184_spill] sm:$0xff] }
 0x3ae   : > { %v1841_v50 = vadd.s32 %v1840_v19, %v1838_v20  ;;  %v1881_v19 = vcvt.f32.s32 %v6495_v23  ;;  %vm7763_vm9 = vcmp.lt.f32.partialorder %v7761_v12, %v7762_v28  ;;  %v7765_v20 = vld [vmem:[#allocation181_spill] sm:$0xff]  ;;  %v7776_v60 = vld [vmem:[#allocation195_spill] sm:$0xff]  ;;  %v2661_v12 = vld [vmem:[#allocation3 + $0xf0] sm:$0xff] }
 0x3af   : > { %v2285_v4 = vpop.xlane.xlu1 %2284  ;;  %vm7766_vm13 = vcmp.lt.f32.partialorder %v7764_v30, %v7765_v20 }
 0x3b0   : > { %v2720_v5 = vsel %vm7751_vm4, %v1841_v50, %v2656_v18  ;;  %v2286_v49 = vcvt.f32.s32 %v2285_v4  ;;  %v2689_v4 = vld [vmem:[#allocation3 + $0x1d0] sm:$0xff]  ;;  %v1882_v14 = vshll.u32 %v1881_v19, 16 }
 0x3b1   : > { %2784 = vst.msk [vmem:[#allocation3 + $0xc8] sm:$0xff] %vm2566_vm2, %v2720_v5  ;;  %v2329_v5 = vcvt.f32.s32 %v6511_v55 }
 0x3b2   : > { %v2289_v35 = vadd.s32 %v2288_v15, %v2286_v49 }
 0x3b3   : > { %v1823_v27 = vpop.xlane.xlu1 %1822  ;;  %v2271_v54 = vpop.xlane.xlu0 %2270 }
 0x3b4   : > { %v2752_v3 = vsel %vm7754_vm0, %v2289_v35, %v2688_v57  ;;  %v1824_v45 = vcvt.f32.s32 %v1823_v27  ;;  %v2272_v0 = vcvt.f32.s32 %v2271_v54  ;;  %v7767_v35 = vld [vmem:[#allocation188_spill] sm:$0xff]  ;;  %v7771_v27 = vld [vmem:[#allocation186_spill] sm:$0xff] }
 0x3b5   : > { %2816 = vst.msk [vmem:[#allocation3 + $0x1c8] sm:$0xff] %vm2566_vm2, %v2752_v3  ;;  %vm7769_vm10 = vcmp.lt.f32.partialorder %v7767_v35, %v7768_v25  ;;  %vm7772_vm14 = vcmp.lt.f32.partialorder %v7770_v51, %v7771_v27  ;;  %v7790_v35 = vld [vmem:[#allocation212_spill] sm:$0xff]  ;;  %v7791_v25 = vld [vmem:[#allocation209_spill] sm:$0xff]  ;;  %v7794_v27 = vld [vmem:[#allocation210_spill] sm:$0xff] }
 0x3b6   : > { %v1827_v1 = vadd.s32 %v1826_v59, %v1824_v45  ;;  %v2275_v6 = vadd.s32 %v2274_v2, %v2272_v0  ;;  %v2344_v45 = vshll.u32 %v2343_v48, 16  ;;  %v1923_v0 = vcvt.f32.s32 %v6416_v31  ;;  %v2692_v31 = vld [vmem:[#allocation3 + $0x1e8] sm:$0xff] }
 0x3b7   : > { %v1865_v53 = vpop.xlane.xlu1 %1864  ;;  %v1851_v39 = vpop.xlane.xlu0 %1850  ;;  %vm7792_vm5 = vcmp.lt.f32.partialorder %v7790_v35, %v7791_v25  ;;  %v7793_v51 = vld [vmem:[#allocation213_spill] sm:$0xff] }
 0x3b8   : > { %v2719_v41 = vsel %vm7757_vm3, %v1827_v1, %v2655_v63  ;;  %v2751_v33 = vsel %vm7760_vm6, %v2275_v6, %v2687_v34  ;;  %v1866_v7 = vcvt.f32.s32 %v1865_v53  ;;  %v1852_v46 = vcvt.f32.s32 %v1851_v39  ;;  %v7777_v53 = vld [vmem:[#allocation192_spill] sm:$0xff]  ;;  %v2888_v35 = vld [vmem:[#allocation2 + $0x1e8] sm:$0xff] (!%p3512_p6) }
 0x3b9   : > { %2783 = vst.msk [vmem:[#allocation3 + $0xc0] sm:$0xff] %vm2566_vm2, %v2719_v41  ;;  %2815 = vst.msk [vmem:[#allocation3 + $0x1c0] sm:$0xff] %vm2566_vm2, %v2751_v33  ;;  %v2330_v63 = vshll.u32 %v2329_v5, 16  ;;  %v1909_v34 = vcvt.f32.s32 %v6528_v36  ;;  %vm7778_vm1 = vcmp.lt.f32.partialorder %v7776_v60, %v7777_v53  ;;  %v2691_v41 = vld [vmem:[#allocation3 + $0x1e0] sm:$0xff]  ;;  %v1924_v22 = vshll.u32 %v1923_v0, 16  ;;  %v2693_v5 = vld [vmem:[#allocation3 + $0x1f0] sm:$0xff] }
 0x3ba   : > { %v1869_v26 = vadd.s32 %v1868_v16, %v1866_v7  ;;  %v1855_v61 = vadd.s32 %v1854_v47, %v1852_v46  ;;  %v7773_v16 = vld [vmem:[#allocation194_spill] sm:$0xff]  ;;  %v2371_v33 = vcvt.f32.s32 %v6426_v29  ;;  %v2357_v46 = vcvt.f32.s32 %v6543_v32  ;;  %v2662_v29 = vld [vmem:[#allocation3 + $0xf8] sm:$0xff]  ;;  %v2851_v53 = vld [vmem:[#allocation2 + $0xc0] sm:$0xff] (!%p3512_p6) }
 0x3bb   : > { %v2313_v13 = vpop.xlane.xlu1 %2312  ;;  %v2299_v40 = vpop.xlane.xlu0 %2298  ;;  %vm7775_vm7 = vcmp.lt.f32.partialorder %v7773_v16, %v7774_v43  ;;  %v1910_v7 = vshll.u32 %v1909_v34, 16  ;;  %vm7795_vm12 = vcmp.lt.f32.partialorder %v7793_v51, %v7794_v27  ;;  %v2830_v0 = vld [vmem:[#allocation2 + $0x18] sm:$0xff] (!%p3512_p6)  ;;  %v2831_v34 = vld [vmem:[#allocation2 + $0x20] sm:$0xff] (!%p3512_p6)  ;;  %v2849_v16 = vld [vmem:[#allocation2 + $0xb0] sm:$0xff] (!%p3512_p6) }
 0x3bc   : > { %v2722_v58 = vsel %vm7763_vm9, %v1869_v26, %v2658_v8  ;;  %v2721_v18 = vsel %vm7766_vm13, %v1855_v61, %v2657_v62  ;;  %v2314_v50 = vcvt.f32.s32 %v2313_v13  ;;  %v2300_v44 = vcvt.f32.s32 %v2299_v40  ;;  %v2833_v43 = vld [vmem:[#allocation2 + $0x30] sm:$0xff] (!%p3512_p6)  ;;  %v2834_v60 = vld [vmem:[#allocation2 + $0x38] sm:$0xff] (!%p3512_p6)  ;;  %v2872_v25 = vld [vmem:[#allocation2 + $0x168] sm:$0xff] (!%p3512_p6) }
 0x3bd   : > { %2786 = vst.msk [vmem:[#allocation3 + $0xd8] sm:$0xff] %vm2566_vm2, %v2722_v58  ;;  %2785 = vst.msk [vmem:[#allocation3 + $0xd0] sm:$0xff] %vm2566_vm2, %v2721_v18  ;;  %v2372_v58 = vshll.u32 %v2371_v33, 16  ;;  %v2358_v30 = vshll.u32 %v2357_v46, 16  ;;  %v2839_v33 = vld [vmem:[#allocation2 + $0x60] sm:$0xff] (!%p3512_p6)  ;;  %v2840_v46 = vld [vmem:[#allocation2 + $0x68] sm:$0xff] (!%p3512_p6) }
 0x3be   : > { %v2317_v15 = vadd.s32 %v2316_v11, %v2314_v50  ;;  %v2303_v23 = vadd.s32 %v2302_v21, %v2300_v44  ;;  %v7782_v21 = vld [vmem:[#allocation198_spill] sm:$0xff]  ;;  %v7785_v44 = vld [vmem:[#allocation203_spill] sm:$0xff] }
 0x3bf   : > { %v1893_v49 = vpop.xlane.xlu1 %1892  ;;  %v1879_v57 = vpop.xlane.xlu0 %1878  ;;  %vm7783_vm11 = vcmp.lt.f32.partialorder %v7781_v10, %v7782_v21  ;;  %v7784_v50 = vld [vmem:[#allocation206_spill] sm:$0xff]  ;;  %v2858_v26 = vld [vmem:[#allocation2 + $0xf8] sm:$0xff] (!%p3512_p6)  ;;  %v2859_v10 = vld [vmem:[#allocation2 + $0x100] sm:$0xff] (!%p3512_p6) }
 0x3c0   : > { %v2754_v59 = vsel %vm7769_vm10, %v2317_v15, %v2690_v17  ;;  %v2753_v54 = vsel %vm7772_vm14, %v2303_v23, %v2689_v4  ;;  %v1894_v2 = vcvt.f32.s32 %v1893_v49  ;;  %v1880_v42 = vcvt.f32.s32 %v1879_v57  ;;  %v7787_v4 = vld [vmem:[#allocation207_spill] sm:$0xff]  ;;  %v7788_v15 = vld [vmem:[#allocation204_spill] sm:$0xff]  ;;  %v2876_v21 = vld [vmem:[#allocation2 + $0x188] sm:$0xff] (!%p3512_p6) }
 0x3c1   : > { %2818 = vst.msk [vmem:[#allocation3 + $0x1d8] sm:$0xff] %vm2566_vm2, %v2754_v59  ;;  %2817 = vst.msk [vmem:[#allocation3 + $0x1d0] sm:$0xff] %vm2566_vm2, %v2753_v54  ;;  %vm7789_vm8 = vcmp.lt.f32.partialorder %v7787_v4, %v7788_v15  ;;  %v2842_v61 = vld [vmem:[#allocation2 + $0x78] sm:$0xff] (!%p3512_p6)  ;;  %v2867_v4 = vld [vmem:[#allocation2 + $0x140] sm:$0xff] (!%p3512_p6) }
 0x3c2   : > { %v1897_v3 = vadd.s32 %v1896_v9, %v1894_v2  ;;  %v1883_v55 = vadd.s32 %v1882_v14, %v1880_v42  ;;  %v2694_v14 = vld [vmem:[#allocation3 + $0x1f8] sm:$0xff]  ;;  %v2843_v2 = vld [vmem:[#allocation2 + $0x80] sm:$0xff] (!%p3512_p6)  ;;  %v2884_v15 = vld [vmem:[#allocation2 + $0x1c8] sm:$0xff] (!%p3512_p6) }
 0x3c3   : > { %v2341_v1 = vpop.xlane.xlu1 %2340  ;;  %v2327_v6 = vpop.xlane.xlu0 %2326  ;;  %v2827_v42 = vld [vmem:[#allocation2] sm:$0xff] (!%p3512_p6)  ;;  %2923 = vxpose.xlu1.b32.start [1/16] (narrow) (!%p3512_p6), %v2843_v2, 8  ;;  %v2873_v51 = vld [vmem:[#allocation2 + $0x170] sm:$0xff] (!%p3512_p6)  ;;  %v2890_v27 = vld [vmem:[#allocation2 + $0x1f8] sm:$0xff] (!%p3512_p6) }
 0x3c4   : > { %v2724_v47 = vsel %vm7775_vm7, %v1897_v3, %v2660_v24  ;;  %v2723_v39 = vsel %vm7778_vm1, %v1883_v55, %v2659_v56  ;;  %v2342_v52 = vcvt.f32.s32 %v2341_v1  ;;  %v2328_v38 = vcvt.f32.s32 %v2327_v6  ;;  %2891 = vxpose.xlu0.b32.start [1/16] (narrow) (!%p3512_p6), %v2827_v42, 8  ;;  %v2844_v24 = vld [vmem:[#allocation2 + $0x88] sm:$0xff] (!%p3512_p6)  ;;  %v2845_v3 = vld [vmem:[#allocation2 + $0x90] sm:$0xff] (!%p3512_p6)  ;;  %v3069_v2 = vld [vmem:[#allocation3 + $0x80] sm:$0xff] (!%p3512_p6) }
 0x3c5   : > { %2788 = vst.msk [vmem:[#allocation3 + $0xe8] sm:$0xff] %vm2566_vm2, %v2724_v47  ;;  %2787 = vst.msk [vmem:[#allocation3 + $0xe0] sm:$0xff] %vm2566_vm2, %v2723_v39  ;;  %v2828_v56 = vld [vmem:[#allocation2 + $0x8] sm:$0xff] (!%p3512_p6)  ;;  %v2829_v55 = vld [vmem:[#allocation2 + $0x10] sm:$0xff] (!%p3512_p6) }
 0x3c6   : > { %v2345_v37 = vadd.s32 %v2344_v45, %v2342_v52  ;;  %v2331_v36 = vadd.s32 %v2330_v63, %v2328_v38  ;;  %v2846_v45 = vld [vmem:[#allocation2 + $0x98] sm:$0xff] (!%p3512_p6)  ;;  %v2847_v63 = vld [vmem:[#allocation2 + $0xa0] sm:$0xff] (!%p3512_p6)  ;;  %v2848_v1 = vld [vmem:[#allocation2 + $0xa8] sm:$0xff] (!%p3512_p6) }
 0x3c7   : > { %v1921_v8 = vpop.xlane.xlu1 %1920  ;;  %v1907_v62 = vpop.xlane.xlu0 %1906  ;;  %2924 = vxpose.xlu1.b32.cont [2/16] (narrow) (!%p3512_p6), %v2844_v24, 8  ;;  %v2832_v6 = vld [vmem:[#allocation2 + $0x28] sm:$0xff] (!%p3512_p6)  ;;  %v2850_v47 = vld [vmem:[#allocation2 + $0xb8] sm:$0xff] (!%p3512_p6)  ;;  %v2835_v39 = vld [vmem:[#allocation2 + $0x40] sm:$0xff] (!%p3512_p6) }
 0x3c8   : > { %v2756_v11 = vsel %vm2499_vm15, %v2345_v37, %v2692_v31  ;;  %v2755_v19 = vsel %vm7783_vm11, %v2331_v36, %v2691_v41  ;;  %v1922_v13 = vcvt.f32.s32 %v1921_v8  ;;  %v1908_v40 = vcvt.f32.s32 %v1907_v62  ;;  %2892 = vxpose.xlu0.b32.cont [2/16] (narrow) (!%p3512_p6), %v2828_v56, 8  ;;  %v2852_v52 = vld [vmem:[#allocation2 + $0xc8] sm:$0xff] (!%p3512_p6)  ;;  %v2853_v31 = vld [vmem:[#allocation2 + $0xd0] sm:$0xff] (!%p3512_p6)  ;;  %v2854_v37 = vld [vmem:[#allocation2 + $0xd8] sm:$0xff] (!%p3512_p6) }
 0x3c9   : > { %2820 = vst.msk [vmem:[#allocation3 + $0x1e8] sm:$0xff] %vm2566_vm2, %v2756_v11  ;;  %2819 = vst.msk [vmem:[#allocation3 + $0x1e0] sm:$0xff] %vm2566_vm2, %v2755_v19  ;;  %vm7786_vm15 = vcmp.lt.f32.partialorder %v7784_v50, %v7785_v44  ;;  %v2836_v38 = vld [vmem:[#allocation2 + $0x48] sm:$0xff] (!%p3512_p6)  ;;  %v2837_v41 = vld [vmem:[#allocation2 + $0x50] sm:$0xff] (!%p3512_p6) }
 0x3ca   : > { %v1925_v28 = vadd.s32 %v1924_v22, %v1922_v13  ;;  %v1911_v32 = vadd.s32 %v1910_v7, %v1908_v40  ;;  %v2838_v36 = vld [vmem:[#allocation2 + $0x58] sm:$0xff] (!%p3512_p6)  ;;  %v2855_v22 = vld [vmem:[#allocation2 + $0xe0] sm:$0xff] (!%p3512_p6)  ;;  %v2856_v7 = vld [vmem:[#allocation2 + $0xe8] sm:$0xff] (!%p3512_p6) }
 0x3cb   : > { %v2369_v20 = vpop.xlane.xlu1 %2368  ;;  %v2355_v18 = vpop.xlane.xlu0 %2354  ;;  %2826 = sbr.rel (%p3512_p6) target bundleno = 1294 (0x50e), region = 78  ;;  %2925 = vxpose.xlu1.b32.cont [3/16] (narrow) (!%p3512_p6), %v2845_v3, 8  ;;  %v2857_v8 = vld [vmem:[#allocation2 + $0xf0] sm:$0xff] (!%p3512_p6)  ;;  %v2875_v11 = vld [vmem:[#allocation2 + $0x180] sm:$0xff] (!%p3512_p6)  ;;  %v2860_v19 = vld [vmem:[#allocation2 + $0x108] sm:$0xff] (!%p3512_p6) }
 0x3cc   : > { %v2726_v17 = vsel %vm7786_vm15, %v1925_v28, %v2662_v29  ;;  %v2725_v23 = vsel %vm7789_vm8, %v1911_v32, %v2661_v12  ;;  %v2370_v9 = vcvt.f32.s32 %v2369_v20  ;;  %v2356_v48 = vcvt.f32.s32 %v2355_v18  ;;  %2893 = vxpose.xlu0.b32.cont [3/16] (narrow) (!%p3512_p6), %v2829_v55, 8  ;;  %v2841_v62 = vld [vmem:[#allocation2 + $0x70] sm:$0xff] (!%p3512_p6)  ;;  %v2878_v29 = vld [vmem:[#allocation2 + $0x198] sm:$0xff] (!%p3512_p6)  ;;  %v2879_v28 = vld [vmem:[#allocation2 + $0x1a0] sm:$0xff] (!%p3512_p6) }
 0x3cd   : > { %2790 = vst.msk [vmem:[#allocation3 + $0xf8] sm:$0xff] %vm2566_vm2, %v2726_v17  ;;  %2789 = vst.msk [vmem:[#allocation3 + $0xf0] sm:$0xff] %vm2566_vm2, %v2725_v23  ;;  %v2877_v13 = vld [vmem:[#allocation2 + $0x190] sm:$0xff] (!%p3512_p6)  ;;  %v2862_v12 = vld [vmem:[#allocation2 + $0x118] sm:$0xff] (!%p3512_p6) }
 0x3ce   : > { %v2373_v49 = vadd.s32 %v2372_v58, %v2370_v9  ;;  %v2359_v57 = vadd.s32 %v2358_v30, %v2356_v48  ;;  %v2861_v40 = vld [vmem:[#allocation2 + $0x110] sm:$0xff] (!%p3512_p6)  ;;  %v2863_v32 = vld [vmem:[#allocation2 + $0x120] sm:$0xff] (!%p3512_p6)  ;;  %v2880_v58 = vld [vmem:[#allocation2 + $0x1a8] sm:$0xff] (!%p3512_p6) }
 0x3cf   : > { %2926 = vxpose.xlu1.b32.cont [4/16] (narrow) (!%p3512_p6), %v2846_v45, 8  ;;  %v2864_v30 = vld [vmem:[#allocation2 + $0x128] sm:$0xff] (!%p3512_p6)  ;;  %v2881_v20 = vld [vmem:[#allocation2 + $0x1b0] sm:$0xff] (!%p3512_p6)  ;;  %v2882_v50 = vld [vmem:[#allocation2 + $0x1b8] sm:$0xff] (!%p3512_p6) }
 0x3d0   : > { %v2758_v59 = vsel %vm7792_vm5, %v2373_v49, %v2694_v14  ;;  %v2757_v54 = vsel %vm7795_vm12, %v2359_v57, %v2693_v5  ;;  %2894 = vxpose.xlu0.b32.cont [4/16] (narrow) (!%p3512_p6), %v2830_v0, 8  ;;  %v2865_v18 = vld [vmem:[#allocation2 + $0x130] sm:$0xff] (!%p3512_p6)  ;;  %v2866_v44 = vld [vmem:[#allocation2 + $0x138] sm:$0xff] (!%p3512_p6)  ;;  %v2883_v17 = vld [vmem:[#allocation2 + $0x1c0] sm:$0xff] (!%p3512_p6) }
 0x3d1   : > { %2822 = vst.msk [vmem:[#allocation3 + $0x1f8] sm:$0xff] %vm2566_vm2, %v2758_v59  ;;  %2821 = vst.msk [vmem:[#allocation3 + $0x1f0] sm:$0xff] %vm2566_vm2, %v2757_v54  ;;  %v2868_v23 = vld [vmem:[#allocation2 + $0x148] sm:$0xff] (!%p3512_p6)  ;;  %v2885_v9 = vld [vmem:[#allocation2 + $0x1d0] sm:$0xff] (!%p3512_p6) }
 0x3d2   : > { %v2869_v48 = vld [vmem:[#allocation2 + $0x150] sm:$0xff]  ;;  %v2886_v14 = vld [vmem:[#allocation2 + $0x1d8] sm:$0xff]  ;;  %v2887_v49 = vld [vmem:[#allocation2 + $0x1e0] sm:$0xff] }
 0x3d3   : > { %2927 = vxpose.xlu1.b32.cont [5/16] (narrow) %v2847_v63, 8  ;;  %v2870_v5 = vld [vmem:[#allocation2 + $0x158] sm:$0xff]  ;;  %v2871_v57 = vld [vmem:[#allocation2 + $0x160] sm:$0xff]  ;;  %v2889_v59 = vld [vmem:[#allocation2 + $0x1f0] sm:$0xff] }
 0x3d4   : > { %2895 = vxpose.xlu0.b32.cont [5/16] (narrow) %v2831_v34, 8  ;;  %v2874_v54 = vld [vmem:[#allocation2 + $0x178] sm:$0xff]  ;;  %v3053_v42 = vld [vmem:[#allocation3] sm:$0xff]  ;;  %v3070_v24 = vld [vmem:[#allocation3 + $0x88] sm:$0xff] }
 0x3d5   : > { %v3054_v56 = vld [vmem:[#allocation3 + $0x8] sm:$0xff]  ;;  %v3071_v3 = vld [vmem:[#allocation3 + $0x90] sm:$0xff]  ;;  %v3072_v45 = vld [vmem:[#allocation3 + $0x98] sm:$0xff] }
 0x3d6   : > { %v3055_v55 = vld [vmem:[#allocation3 + $0x10] sm:$0xff]  ;;  %v3056_v0 = vld [vmem:[#allocation3 + $0x18] sm:$0xff]  ;;  %v3073_v63 = vld [vmem:[#allocation3 + $0xa0] sm:$0xff] }
 0x3d7   : > { %2928 = vxpose.xlu1.b32.cont [6/16] (narrow) %v2848_v1, 8  ;;  %v3057_v34 = vld [vmem:[#allocation3 + $0x20] sm:$0xff]  ;;  %v3074_v1 = vld [vmem:[#allocation3 + $0xa8] sm:$0xff] }
 0x3d8   : > { %2896 = vxpose.xlu0.b32.cont [6/16] (narrow) %v2832_v6, 8  ;;  %v3058_v6 = vld [vmem:[#allocation3 + $0x28] sm:$0xff] }
 0x3db   : > { %2929 = vxpose.xlu1.b32.cont [7/16] (narrow) %v2849_v16, 8  ;;  %v3075_v16 = vld [vmem:[#allocation3 + $0xb0] sm:$0xff] }
 0x3dc   : > { %2897 = vxpose.xlu0.b32.cont [7/16] (narrow) %v2833_v43, 8  ;;  %v3059_v43 = vld [vmem:[#allocation3 + $0x30] sm:$0xff] }
 0x3df   : > { %2930 = vxpose.xlu1.b32.cont [8/16] (narrow) %v2850_v47, 8  ;;  %v3076_v47 = vld [vmem:[#allocation3 + $0xb8] sm:$0xff] }
 0x3e0   : > { %2898 = vxpose.xlu0.b32.cont [8/16] (narrow) %v2834_v60, 8  ;;  %v3060_v60 = vld [vmem:[#allocation3 + $0x38] sm:$0xff] }
 0x3e3   : > { %2931 = vxpose.xlu1.b32.cont [9/16] (narrow) %v2851_v53, 8  ;;  %v3077_v53 = vld [vmem:[#allocation3 + $0xc0] sm:$0xff] }
 0x3e4   : > { %2899 = vxpose.xlu0.b32.cont [9/16] (narrow) %v2835_v39, 8  ;;  %v3061_v39 = vld [vmem:[#allocation3 + $0x40] sm:$0xff] }
 0x3e7   : > { %2932 = vxpose.xlu1.b32.cont [10/16] (narrow) %v2852_v52, 8  ;;  %v3078_v52 = vld [vmem:[#allocation3 + $0xc8] sm:$0xff] }
 0x3e8   : > { %2900 = vxpose.xlu0.b32.cont [10/16] (narrow) %v2836_v38, 8  ;;  %v3062_v38 = vld [vmem:[#allocation3 + $0x48] sm:$0xff] }
 0x3eb   : > { %2933 = vxpose.xlu1.b32.cont [11/16] (narrow) %v2853_v31, 8  ;;  %v3079_v31 = vld [vmem:[#allocation3 + $0xd0] sm:$0xff] }
 0x3ec   : > { %2901 = vxpose.xlu0.b32.cont [11/16] (narrow) %v2837_v41, 8  ;;  %v3063_v41 = vld [vmem:[#allocation3 + $0x50] sm:$0xff] }
 0x3ef   : > { %2934 = vxpose.xlu1.b32.cont [12/16] (narrow) %v2854_v37, 8  ;;  %v3080_v37 = vld [vmem:[#allocation3 + $0xd8] sm:$0xff] }
 0x3f0   : > { %2902 = vxpose.xlu0.b32.cont [12/16] (narrow) %v2838_v36, 8  ;;  %v3064_v36 = vld [vmem:[#allocation3 + $0x58] sm:$0xff] }
 0x3f3   : > { %2935 = vxpose.xlu1.b32.cont [13/16] (narrow) %v2855_v22, 8  ;;  %v3081_v22 = vld [vmem:[#allocation3 + $0xe0] sm:$0xff] }
 0x3f4   : > { %2903 = vxpose.xlu0.b32.cont [13/16] (narrow) %v2839_v33, 8  ;;  %v3065_v33 = vld [vmem:[#allocation3 + $0x60] sm:$0xff] }
 0x3f7   : > { %2936 = vxpose.xlu1.b32.cont [14/16] (narrow) %v2856_v7, 8  ;;  %v3082_v7 = vld [vmem:[#allocation3 + $0xe8] sm:$0xff] }
 0x3f8   : > { %2904 = vxpose.xlu0.b32.cont [14/16] (narrow) %v2840_v46, 8  ;;  %v3066_v46 = vld [vmem:[#allocation3 + $0x68] sm:$0xff] }
 0x3fb   : > { %2937 = vxpose.xlu1.b32.cont [15/16] (narrow) %v2857_v8, 8  ;;  %v3083_v8 = vld [vmem:[#allocation3 + $0xf0] sm:$0xff] }
 0x3fc   : > { %2905 = vxpose.xlu0.b32.cont [15/16] (narrow) %v2841_v62, 8  ;;  %v3067_v62 = vld [vmem:[#allocation3 + $0x70] sm:$0xff] }
 0x3ff   : > { %2938 = vxpose.xlu1.b32.end [16/16] (narrow) %v2858_v26, 8  ;;  %v3948_v26 = vmov 1966171168  }
 0x400   : > { %2906 = vxpose.xlu0.b32.end [16/16] (narrow) %v2842_v61, 8  ;;  %v3026_v61 = vunpack.c.l.s4 %v3948_v26 }
 0x403   : > { %2987 = vxpose.xlu1.b32.start [1/16] (narrow) %v2875_v11, 8  ;;  %v3084_v11 = vld [vmem:[#allocation3 + $0xf8] sm:$0xff] }
 0x404   : > { %2955 = vxpose.xlu0.b32.start [1/16] (narrow) %v2859_v10, 8  ;;  %v3068_v10 = vld [vmem:[#allocation3 + $0x78] sm:$0xff] }
 0x407   : > { %2988 = vxpose.xlu1.b32.cont [2/16] (narrow) %v2876_v21, 8  ;;  %v3027_v21 = vunpack.c.0.s8 %v3026_v61 }
 0x408   : > { %2956 = vxpose.xlu0.b32.cont [2/16] (narrow) %v2860_v19, 8  ;;  %v7796_v19 = vlaneseq }
 0x40a   : > { %vm6839_vm2 = vcmp.lt.s32.totalorder %v7796_v19, 512 }
 0x40b   : > { %2989 = vxpose.xlu1.b32.cont [3/16] (narrow) %v2877_v13, 8  ;;  %v3029_v13 = vshrl.u32 %v7796_v19, 7 }
 0x40c   : > { %2957 = vxpose.xlu0.b32.cont [3/16] (narrow) %v2861_v40, 8 }
 0x40f   : > { %2990 = vxpose.xlu1.b32.cont [4/16] (narrow) %v2878_v29, 8 }
 0x410   : > { %2958 = vxpose.xlu0.b32.cont [4/16] (narrow) %v2862_v12, 8  ;;  %v3101_v12 = vld [vmem:[#allocation3 + $0x180] sm:$0xff] }
 0x413   : > { %2991 = vxpose.xlu1.b32.cont [5/16] (narrow) %v2879_v28, 8  ;;  %v3085_v28 = vld [vmem:[#allocation3 + $0x100] sm:$0xff] }
 0x414   : > { %2959 = vxpose.xlu0.b32.cont [5/16] (narrow) %v2863_v32, 8  ;;  %v6834_v32 = vsub.s32 %v3027_v21, %v3029_v13 }
 0x417   : > { %2992 = vxpose.xlu1.b32.cont [6/16] (narrow) %v2880_v58, 8 }
 0x418   : > { %2960 = vxpose.xlu0.b32.cont [6/16] (narrow) %v2864_v30, 8 }
 0x41b   : > { %2993 = vxpose.xlu1.b32.cont [7/16] (narrow) %v2881_v20, 8 }
 0x41c   : > { %2961 = vxpose.xlu0.b32.cont [7/16] (narrow) %v2865_v18, 8  ;;  %v3102_v18 = vld [vmem:[#allocation3 + $0x188] sm:$0xff] }
 0x41f   : > { %2994 = vxpose.xlu1.b32.cont [8/16] (narrow) %v2882_v50, 8  ;;  %v3086_v50 = vld [vmem:[#allocation3 + $0x108] sm:$0xff] }
 0x420   : > { %2962 = vxpose.xlu0.b32.cont [8/16] (narrow) %v2866_v44, 8 }
 0x423   : > { %2995 = vxpose.xlu1.b32.cont [9/16] (narrow) %v2883_v17, 8 }
 0x424   : > { %2963 = vxpose.xlu0.b32.cont [9/16] (narrow) %v2867_v4, 8 }
 0x427   : > { %2996 = vxpose.xlu1.b32.cont [10/16] (narrow) %v2884_v15, 8  ;;  %v3103_v15 = vld [vmem:[#allocation3 + $0x190] sm:$0xff] }
 0x428   : > { %2964 = vxpose.xlu0.b32.cont [10/16] (narrow) %v2868_v23, 8  ;;  %v3087_v23 = vld [vmem:[#allocation3 + $0x110] sm:$0xff] }
 0x42b   : > { %2997 = vxpose.xlu1.b32.cont [11/16] (narrow) %v2885_v9, 8 }
 0x42c   : > { %2965 = vxpose.xlu0.b32.cont [11/16] (narrow) %v2869_v48, 8 }
 0x42f   : > { %2998 = vxpose.xlu1.b32.cont [12/16] (narrow) %v2886_v14, 8 }
 0x430   : > { %2966 = vxpose.xlu0.b32.cont [12/16] (narrow) %v2870_v5, 8  ;;  %v3104_v5 = vld [vmem:[#allocation3 + $0x198] sm:$0xff] }
 0x433   : > { %2999 = vxpose.xlu1.b32.cont [13/16] (narrow) %v2887_v49, 8  ;;  %v3088_v49 = vld [vmem:[#allocation3 + $0x118] sm:$0xff] }
 0x434   : > { %2967 = vxpose.xlu0.b32.cont [13/16] (narrow) %v2871_v57, 8  ;;  %v3105_v57 = vld [vmem:[#allocation3 + $0x1a0] sm:$0xff] }
 0x437   : > { %3000 = vxpose.xlu1.b32.cont [14/16] (narrow) %v2888_v35, 8  ;;  %v3089_v35 = vld [vmem:[#allocation3 + $0x120] sm:$0xff] }
 0x438   : > { %2968 = vxpose.xlu0.b32.cont [14/16] (narrow) %v2872_v25, 8  ;;  %v3106_v25 = vld [vmem:[#allocation3 + $0x1a8] sm:$0xff] }
 0x43b   : > { %3001 = vxpose.xlu1.b32.cont [15/16] (narrow) %v2889_v59, 8  ;;  %v3090_v59 = vld [vmem:[#allocation3 + $0x128] sm:$0xff] }
 0x43c   : > { %2969 = vxpose.xlu0.b32.cont [15/16] (narrow) %v2873_v51, 8  ;;  %v3107_v51 = vld [vmem:[#allocation3 + $0x1b0] sm:$0xff] }
 0x43f   : > { %3002 = vxpose.xlu1.b32.end [16/16] (narrow) %v2890_v27, 8  ;;  %v3091_v27 = vld [vmem:[#allocation3 + $0x130] sm:$0xff] }
 0x440   : > { %2970 = vxpose.xlu0.b32.end [16/16] (narrow) %v2874_v54, 8  ;;  %v3108_v54 = vld [vmem:[#allocation3 + $0x1b8] sm:$0xff] }
 0x443   : > { %3149 = vxpose.xlu1.b32.start [1/16] (narrow) %v3069_v2, 8  ;;  %v2939_v40 = vpop.trf.xlu1  ;;  %v3092_v2 = vld [vmem:[#allocation3 + $0x138] sm:$0xff] }
 0x444   : > { %3117 = vxpose.xlu0.b32.start [1/16] (narrow) %v3053_v42, 8  ;;  %v2907_v29 = vpop.trf.xlu0  ;;  %v3109_v42 = vld [vmem:[#allocation3 + $0x1c0] sm:$0xff] }
 0x445   : > { %v3023_v58 = vcombine.low %v2907_v29, %v2939_v40 }
 0x447   : > { %3150 = vxpose.xlu1.b32.cont [2/16] (narrow) %v3070_v24, 8  ;;  %v3031_v44 = vrot.slane %v3023_v58, %v6834_v32  ;;  %v3093_v24 = vld [vmem:[#allocation3 + $0x140] sm:$0xff] }
 0x448   : > { %3118 = vxpose.xlu0.b32.cont [2/16] (narrow) %v3054_v56, 8  ;;  %v3110_v56 = vld [vmem:[#allocation3 + $0x1c8] sm:$0xff] }
 0x44b   : > { %3151 = vxpose.xlu1.b32.cont [3/16] (narrow) %v3071_v3, 8  ;;  %v3094_v3 = vld [vmem:[#allocation3 + $0x148] sm:$0xff] }
 0x44c   : > { %3119 = vxpose.xlu0.b32.cont [3/16] (narrow) %v3055_v55, 8  ;;  %v3111_v55 = vld [vmem:[#allocation3 + $0x1d0] sm:$0xff] }
 0x44f   : > { %3152 = vxpose.xlu1.b32.cont [4/16] (narrow) %v3072_v45, 8  ;;  %v3095_v45 = vld [vmem:[#allocation3 + $0x150] sm:$0xff] }
 0x450   : > { %3120 = vxpose.xlu0.b32.cont [4/16] (narrow) %v3056_v0, 8  ;;  %v3112_v0 = vld [vmem:[#allocation3 + $0x1d8] sm:$0xff] }
 0x453   : > { %3153 = vxpose.xlu1.b32.cont [5/16] (narrow) %v3073_v63, 8  ;;  %v3096_v63 = vld [vmem:[#allocation3 + $0x158] sm:$0xff] }
 0x454   : > { %3121 = vxpose.xlu0.b32.cont [5/16] (narrow) %v3057_v34, 8  ;;  %v3113_v34 = vld [vmem:[#allocation3 + $0x1e0] sm:$0xff] }
 0x457   : > { %3154 = vxpose.xlu1.b32.cont [6/16] (narrow) %v3074_v1, 8  ;;  %v3097_v1 = vld [vmem:[#allocation3 + $0x160] sm:$0xff] }
 0x458   : > { %3122 = vxpose.xlu0.b32.cont [6/16] (narrow) %v3058_v6, 8  ;;  %v3114_v6 = vld [vmem:[#allocation3 + $0x1e8] sm:$0xff] }
 0x45b   : > { %3155 = vxpose.xlu1.b32.cont [7/16] (narrow) %v3075_v16, 8  ;;  %v3098_v16 = vld [vmem:[#allocation3 + $0x168] sm:$0xff] }
 0x45c   : > { %3123 = vxpose.xlu0.b32.cont [7/16] (narrow) %v3059_v43, 8  ;;  %v3115_v43 = vld [vmem:[#allocation3 + $0x1f0] sm:$0xff] }
 0x45f   : > { %3156 = vxpose.xlu1.b32.cont [8/16] (narrow) %v3076_v47, 8  ;;  %v3099_v47 = vld [vmem:[#allocation3 + $0x170] sm:$0xff] }
 0x460   : > { %3124 = vxpose.xlu0.b32.cont [8/16] (narrow) %v3060_v60, 8  ;;  %v3116_v60 = vld [vmem:[#allocation3 + $0x1f8] sm:$0xff] }
 0x463   : > { %3157 = vxpose.xlu1.b32.cont [9/16] (narrow) %v3077_v53, 8  ;;  %v3100_v53 = vld [vmem:[#allocation3 + $0x178] sm:$0xff] }
 0x464   : > { %3125 = vxpose.xlu0.b32.cont [9/16] (narrow) %v3061_v39, 8 }
 0x467   : > { %3158 = vxpose.xlu1.b32.cont [10/16] (narrow) %v3078_v52, 8 }
 0x468   : > { %3126 = vxpose.xlu0.b32.cont [10/16] (narrow) %v3062_v38, 8 }
 0x46b   : > { %3159 = vxpose.xlu1.b32.cont [11/16] (narrow) %v3079_v31, 8 }
 0x46c   : > { %3127 = vxpose.xlu0.b32.cont [11/16] (narrow) %v3063_v41, 8 }
 0x46f   : > { %3160 = vxpose.xlu1.b32.cont [12/16] (narrow) %v3080_v37, 8 }
 0x470   : > { %3128 = vxpose.xlu0.b32.cont [12/16] (narrow) %v3064_v36, 8 }
 0x473   : > { %3161 = vxpose.xlu1.b32.cont [13/16] (narrow) %v3081_v22, 8 }
 0x474   : > { %3129 = vxpose.xlu0.b32.cont [13/16] (narrow) %v3065_v33, 8 }
 0x477   : > { %3162 = vxpose.xlu1.b32.cont [14/16] (narrow) %v3082_v7, 8 }
 0x478   : > { %3130 = vxpose.xlu0.b32.cont [14/16] (narrow) %v3066_v46, 8 }
 0x47b   : > { %3163 = vxpose.xlu1.b32.cont [15/16] (narrow) %v3083_v8, 8 }
 0x47c   : > { %3131 = vxpose.xlu0.b32.cont [15/16] (narrow) %v3067_v62, 8 }
 0x47f   : > { %3164 = vxpose.xlu1.b32.end [16/16] (narrow) %v3084_v11, 8 }
 0x480   : > { %3132 = vxpose.xlu0.b32.end [16/16] (narrow) %v3068_v10, 8 }
 0x483   : > { %3213 = vxpose.xlu1.b32.start [1/16] (narrow) %v3101_v12, 8  ;;  %v3003_v30 = vpop.trf.xlu1 }
 0x484   : > { %3181 = vxpose.xlu0.b32.start [1/16] (narrow) %v3085_v28, 8  ;;  %v2971_v20 = vpop.trf.xlu0 }
 0x485   : > { %v3024_v17 = vcombine.low %v2971_v20, %v3003_v30 }
 0x487   : > { %v3038_v4 = vrot.slane %v3024_v17, %v6834_v32  ;;  %3214 = vxpose.xlu1.b32.cont [2/16] (narrow) %v3102_v18, 8 }
 0x488   : > { %3182 = vxpose.xlu0.b32.cont [2/16] (narrow) %v3086_v50, 8 }
 0x489   : > { %v3039_v9 = vcombine.low %v3031_v44, %v3038_v4 }
 0x48b   : > { %v3046_v14 = vrot.slane %v3039_v9, %v6834_v32  ;;  %3215 = vxpose.xlu1.b32.cont [3/16] (narrow) %v3103_v15, 8 }
 0x48c   : > { %3183 = vxpose.xlu0.b32.cont [3/16] (narrow) %v3087_v23, 8 }
 0x48d   : > { %3052 = vst.msk [vmem:[%s4101_s27] sm:$0xf] %vm6839_vm2, %v3046_v14 }
 0x48f   : > { %3216 = vxpose.xlu1.b32.cont [4/16] (narrow) %v3104_v5, 8 }
 0x490   : > { %3184 = vxpose.xlu0.b32.cont [4/16] (narrow) %v3088_v49, 8 }
 0x493   : > { %3217 = vxpose.xlu1.b32.cont [5/16] (narrow) %v3105_v57, 8 }
 0x494   : > { %3185 = vxpose.xlu0.b32.cont [5/16] (narrow) %v3089_v35, 8 }
 0x497   : > { %3218 = vxpose.xlu1.b32.cont [6/16] (narrow) %v3106_v25, 8 }
 0x498   : > { %3186 = vxpose.xlu0.b32.cont [6/16] (narrow) %v3090_v59, 8 }
 0x49b   : > { %3219 = vxpose.xlu1.b32.cont [7/16] (narrow) %v3107_v51, 8 }
 0x49c   : > { %3187 = vxpose.xlu0.b32.cont [7/16] (narrow) %v3091_v27, 8 }
 0x49f   : > { %3220 = vxpose.xlu1.b32.cont [8/16] (narrow) %v3108_v54, 8 }
 0x4a0   : > { %3188 = vxpose.xlu0.b32.cont [8/16] (narrow) %v3092_v2, 8 }
 0x4a3   : > { %3221 = vxpose.xlu1.b32.cont [9/16] (narrow) %v3109_v42, 8 }
 0x4a4   : > { %3189 = vxpose.xlu0.b32.cont [9/16] (narrow) %v3093_v24, 8 }
 0x4a7   : > { %3222 = vxpose.xlu1.b32.cont [10/16] (narrow) %v3110_v56, 8 }
 0x4a8   : > { %3190 = vxpose.xlu0.b32.cont [10/16] (narrow) %v3094_v3, 8 }
 0x4ab   : > { %3223 = vxpose.xlu1.b32.cont [11/16] (narrow) %v3111_v55, 8 }
 0x4ac   : > { %3191 = vxpose.xlu0.b32.cont [11/16] (narrow) %v3095_v45, 8 }
 0x4af   : > { %3224 = vxpose.xlu1.b32.cont [12/16] (narrow) %v3112_v0, 8 }
 0x4b0   : > { %3192 = vxpose.xlu0.b32.cont [12/16] (narrow) %v3096_v63, 8 }
 0x4b3   : > { %3225 = vxpose.xlu1.b32.cont [13/16] (narrow) %v3113_v34, 8 }
 0x4b4   : > { %3193 = vxpose.xlu0.b32.cont [13/16] (narrow) %v3097_v1, 8 }
 0x4b7   : > { %3226 = vxpose.xlu1.b32.cont [14/16] (narrow) %v3114_v6, 8 }
 0x4b8   : > { %3194 = vxpose.xlu0.b32.cont [14/16] (narrow) %v3098_v16, 8 }
 0x4bb   : > { %3227 = vxpose.xlu1.b32.cont [15/16] (narrow) %v3115_v43, 8 }
 0x4bc   : > { %3195 = vxpose.xlu0.b32.cont [15/16] (narrow) %v3099_v47, 8 }
 0x4bf   : > { %3228 = vxpose.xlu1.b32.end [16/16] (narrow) %v3116_v60, 8 }
 0x4c0   : > { %3196 = vxpose.xlu0.b32.end [16/16] (narrow) %v3100_v53, 8 }
 0x4c3   : > { %v3165_v39 = vpop.trf.xlu1 }
 0x4c4   : > { %v3133_v52 = vpop.trf.xlu0 }
 0x4c5   : > { %v3245_v38 = vcombine.low %v3133_v52, %v3165_v39 }
 0x4c7   : > { %v3253_v36 = vrot.slane %v3245_v38, %v6834_v32 }
 0x503   : > { %v3229_v31 = vpop.trf.xlu1 }
 0x504   : > { %v3197_v41 = vpop.trf.xlu0 }
 0x505   : > { %v3246_v37 = vcombine.low %v3197_v41, %v3229_v31 }
 0x507   : > { %v3260_v22 = vrot.slane %v3246_v37, %v6834_v32 }
 0x509   : > { %v3261_v33 = vcombine.low %v3253_v36, %v3260_v22 }
 0x50b   : > { %v3268_v7 = vrot.slane %v3261_v33, %v6834_v32 }
 0x50d   : > { %3269 = vst.msk [vmem:[%s4103_s23] sm:$0xf] %vm6839_vm2, %v3268_v7 }
 0x50e PF: > { %s6857_s14 = scalar_lea.hbm %s6946_s3, %s4082_s13  ;;  %s3290_s25 = sshll.u32 %s4101_s27, 4  ;;  %s6860_s25 = int_to_ptr.vmem [resolvable:$true] %s3290_s25 }
 0x50f   : > { %s6866_s30 = scalar_lea.hbm %s6947_s4, %s4082_s13  ;;  %s3271_s18 = scalar_lea.sflag [#allocation6], %s4078_s6 }
 0x510   : > { %s3802_s5 = scalar_lea.vmem %s6860_s25, 64  ;;  %s3949_s21 = smov [#allocation5]  }
 0x511   : > { %p3803_p7 = scmp.ne.s32.totalorder %s6860_s25, %s3802_s5  ;;  %s3806_s1 = sshll.u32 %s3949_s21, 4  ;;  %s3807_s1 = int_to_ptr.vmem [resolvable:$false] %s3806_s1 }
 0x512   : > { %s3808_s27 = scalar_lea.vmem %s3807_s1, 128  ;;  %p3809_p11 = scmp.lt.s32.totalorder %s6860_s25, %s3807_s1 }
 0x513   : > { %p3804_p8 = pnand %p3803_p7, %p4055_p10  ;;  %p3810_p13 = scmp.lt.s32.totalorder %s3808_s27, %s3802_s5 }
 0x515   : > { %p3805_p9 = pneg %p3804_p8  ;;  %p3811_p0 = por %p3810_p13, %p3809_p11 }
 0x517   : > { %p3812_p1 = pnand %p3811_p0, %p3805_p9 }
 0x519   : > { %3815 = shalt.err (!%p3812_p1)
}
 0x51a   : > { %s3816_s13 = scalar_lea.hbm %s6857_s14, 64  ;;  %s3820_s20 = scalar_lea.hbm %s6946_s3, 128 }
 0x51b   : > { %p3817_p2 = scmp.ne.s32.totalorder %s6857_s14, %s3816_s13  ;;  %p3821_p5 = scmp.lt.u32.totalorder %s6857_s14, %s6946_s3 }
 0x51c   : > { %p3822_p6 = scmp.lt.u32.totalorder %s3820_s20, %s3816_s13  ;;  %p3824_p8 = scmp.lt.u32.totalorder %s3816_s13, %s6857_s14 }
 0x51d   : > { %p3818_p3 = pnand %p3817_p2, %p4055_p10 }
 0x51e   : > { %p3823_p7 = por %p3822_p6, %p3821_p5 }
 0x51f   : > { %p3819_p4 = pneg %p3818_p3 }
 0x520   : > { %p3825_p9 = por %p3824_p8, %p3823_p7 }
 0x522   : > { %p3826_p11 = pnand %p3825_p9, %p3819_p4 }
 0x524   : > { %3829 = shalt.err (!%p3826_p11)
}
 0x525   : > { %3707 = dma.vmem_to_hbm [thread:$0]  (%p4055_p10), %s6860_s25, 64, %s6857_s14, %s3271_s18  }
 0x526   : > { %s3304_s26 = sshll.u32 %s4103_s23, 4  ;;  %s3276_s5 = scalar_lea.sflag [#allocation8], %s4078_s6  ;;  %s3305_s26 = int_to_ptr.vmem [resolvable:$true] %s3304_s26 }
 0x527   : > { %s3830_s21 = scalar_lea.vmem %s3305_s26, 64  ;;  %s3950_s1 = smov [#allocation7]  }
 0x528   : > { %p3831_p13 = scmp.ne.s32.totalorder %s3305_s26, %s3830_s21  ;;  %s3834_s27 = sshll.u32 %s3950_s1, 4  ;;  %s3835_s27 = int_to_ptr.vmem [resolvable:$false] %s3834_s27 }
 0x529   : > { %s3836_s13 = scalar_lea.vmem %s3835_s27, 128  ;;  %p3837_p2 = scmp.lt.s32.totalorder %s3305_s26, %s3835_s27 }
 0x52a   : > { %p3832_p0 = pnand %p3831_p13, %p4055_p10  ;;  %p3838_p3 = scmp.lt.s32.totalorder %s3836_s13, %s3830_s21 }
 0x52c   : > { %p3833_p1 = pneg %p3832_p0  ;;  %p3839_p4 = por %p3838_p3, %p3837_p2 }
 0x52e   : > { %p3840_p5 = pnand %p3839_p4, %p3833_p1 }
 0x530   : > { %3843 = shalt.err (!%p3840_p5)
}
 0x531   : > { %s3844_s23 = scalar_lea.hbm %s6866_s30, 64  ;;  %s3848_s25 = scalar_lea.hbm %s6947_s4, 128 }
 0x532   : > { %p3845_p6 = scmp.ne.s32.totalorder %s6866_s30, %s3844_s23  ;;  %p3849_p9 = scmp.lt.u32.totalorder %s6866_s30, %s6947_s4 }
 0x533   : > { %p3850_p11 = scmp.lt.u32.totalorder %s3848_s25, %s3844_s23  ;;  %p3852_p0 = scmp.lt.u32.totalorder %s3844_s23, %s6866_s30 }
 0x534   : > { %p3846_p7 = pnand %p3845_p6, %p4055_p10 }
 0x535   : > { %p3851_p13 = por %p3850_p11, %p3849_p9 }
 0x536   : > { %p3847_p8 = pneg %p3846_p7 }
 0x537   : > { %p3853_p1 = por %p3852_p0, %p3851_p13 }
 0x539   : > { %p3854_p2 = pnand %p3853_p1, %p3847_p8 }
 0x53b   : > { %3857 = shalt.err (!%p3854_p2)
}
 0x53c   : > { %3708 = dma.vmem_to_hbm [thread:$0]  (%p4055_p10), %s3305_s26, 64, %s6866_s30, %s3276_s5  }
 0x53d PF: > { %p3718_p3 = scmp.ge.s32.totalorder %s3944_s24, 2  ;;  %s3316_s8 = sand.u32 1, %s3908_s15  }
 0x53e   : > { %s3317_s20 = scalar_lea.sflag [#allocation6], %s3316_s8 }
 0x53f   : > { %p3712_p4 = pnand %p3718_p3, %p4062_p12 }
 0x541   : > { %3899 = dma.done.wait (!%p3712_p4), %s3317_s20, 64  }
 0x542   : > { %3901 = vsyncadd (!%p3712_p4), %s3317_s20, 4294967232  ;;  %s3326_s12 = scalar_lea.sflag [#allocation8], %s3316_s8 }
 0x543   : > { %3903 = dma.done.wait (!%p3712_p4), %s3326_s12, 64  }
 0x544   : > { %3905 = vsyncadd (!%p3712_p4), %s3326_s12, 4294967232  ;;  %s21_s24 = sadd.s32 1, %s3944_s24   ;;  %s7799_s21 = sld [smem:[#allocation11_spill]] }
 0x545   : > { %p18_p5 = scmp.ge.s32.totalorder %s21_s24, 6   ;;  %s7800_s9 = sld [smem:[#allocation12_spill]] }
 0x546   : > { %s7801_s23 = sld [smem:[#allocation13_spill]]  ;;  %s7802_s15 = smov %s3912_s16 }
 0x547   : > { %s7803_s16 = smov %s3916_s17  ;;  %s7804_s17 = smov %s4060_s10 }
 0x548   : > { %s7805_s18 = smov %s3924_s19  ;;  %s7806_s19 = smov %s4049_s7 }
 0x549   : > { %s7807_s20 = smov %s3936_s22  ;;  %20 = sbr.rel (!%p18_p5) target bundleno = 10 (0xa), region = 141 }
 0x54b   : > { %s7808_s22 = smov %s7800_s9 }
 0x550   :  { %3331 = vsyncpa [#allocation6], 1 }
 0x551   :  { %3333 = vsyncpa [#allocation6 + $0x1], 1 }
 0x552   :  { %3334 = vsyncpa [#allocation8], 1 }
 0x553   :  { %3336 = vsyncpa [#allocation8 + $0x1], 1 }

</bundles_post_ra>
